<compile_context>
chip_gen: v7x
topology: tpu7x:2x2x1
jax: 0.10.0
libtpu: 0.0.40
codegen_flags: <defaults>
</compile_context>

<pallas_src>
import jax
import jax.numpy as jnp
from jax.experimental import pallas as pl
from jax.experimental.pallas import tpu as pltpu

KSIZE = 7
PAD = KSIZE // 2


def _sublane_pack(itemsize):
    # Native sublane packing: 8 rows for f32, 16 for bf16, 32 for int8/fp8.
    return max(8, 32 // max(1, itemsize))


def _pick_c_tile(C, L, itemsize, budget_bytes):
    """Channel tile: a multiple of the dtype sublane pack whose (TC, L) block
    stays under budget_bytes.  Prefers an exact divisor of C (no masked tail)."""
    pack = _sublane_pack(itemsize)
    if C <= pack:
        return C
    row_bytes = max(1, L * itemsize)
    by_budget = max(pack, (budget_bytes // row_bytes) // pack * pack)
    tc_max = min(by_budget, (C // pack) * pack)
    for cand in range(tc_max, pack - 1, -pack):
        if C % cand == 0:
            return cand
    return tc_max


def spatial_attention(x, weight):
    """x: (N, C, H, W); weight: (1, 2, KSIZE, KSIZE) conv weight (bias=False)."""
    N, C, H, W = x.shape
    L = H * W
    Z = PAD * (W + 1)          # zero-pad length on each side of the flat pooled map

    try:
        vmem_cap = int(pltpu.get_tpu_info().vmem_capacity_bytes)
    except Exception:
        vmem_cap = 64 * 1024 * 1024
    # ~16 MiB blocks on 128 MiB parts (v5e/v6e), ~8 MiB on v7x (64 MiB VMEM).
    block_budget = max(2 << 20, vmem_cap // 8)

    TC = _pick_c_tile(C, L, x.dtype.itemsize, block_budget)
    num_c = pl.cdiv(C, TC)
    has_tail = (C % TC) != 0
    R = min(8, TC)             # accumulator rows

    block_bytes = TC * L * x.dtype.itemsize
    scratch_bytes = 2 * 8 * L * 4 + 4 * (L + 2 * Z + 256)
    want = 2 * block_bytes + scratch_bytes + 2 * L * x.dtype.itemsize + (2 << 20)
    vmem_limit = int(min(max(want, 32 << 20), int(vmem_cap * 0.9)))

    # Free reshape: H, W are the trailing contiguous dims of NCHW.
    x_flat = x.reshape(N, C, L)

    # Fold 1/C into the avg-branch weights -> kernel only needs a channel sum.
    w2 = weight.astype(jnp.float32).reshape(2, KSIZE * KSIZE)
    w_flat = jnp.concatenate([w2[0] / C, w2[1]])               # (2*49,) -> SMEM

    def kernel(x_ref, w_ref, o_ref, sum_ref, max_ref):
        c = pl.program_id(1)

        @pl.when(c == 0)
        def _init():
            sum_ref[...] = jnp.zeros_like(sum_ref)
            max_ref[...] = jnp.full_like(max_ref, -jnp.inf)

        xs = x_ref[0].astype(jnp.float32)                      # (TC, L)
        if has_tail:
            row = jax.lax.broadcasted_iota(jnp.int32, (TC, 1), 0)
            valid_c = row < (C - c * TC)
            xs_s = jnp.where(valid_c, xs, 0.0)
            xs_m = jnp.where(valid_c, xs, -jnp.inf)
        else:
            xs_s, xs_m = xs, xs

        # Per-lane (VALU-only) accumulation over static R-row slices:
        # no cross-sublane reduce in the hot loop.
        g8 = TC // R
        for g in range(g8):
            blk_s = xs_s[g * R:(g + 1) * R, :]
            blk_m = xs_m[g * R:(g + 1) * R, :]
            sum_ref[...] = sum_ref[...] + blk_s
            max_ref[...] = jnp.maximum(max_ref[...], blk_m)
        rem = TC - g8 * R
        if rem:
            sum_ref[0:rem, :] = sum_ref[0:rem, :] + xs_s[g8 * R:, :]
            max_ref[0:rem, :] = jnp.maximum(max_ref[0:rem, :], xs_m[g8 * R:, :])

        @pl.when(c == pl.num_programs(1) - 1)
        def _finalize():
            # Single R -> 1 cross-sublane reduce per batch element.
            s_row = jnp.sum(sum_ref[...], axis=0, keepdims=True)   # (1, L)
            m_row = jnp.max(max_ref[...], axis=0, keepdims=True)   # (1, L)

            # Zero-pad the pooled maps in the flat domain; stack them so one
            # lane shift per tap serves both the avg and the max branch.
            zpad = jnp.zeros((2, Z), jnp.float32)
            stacked = jnp.concatenate([s_row, m_row], axis=0)       # (2, L)
            padded = jnp.concatenate([zpad, stacked, zpad], axis=1)  # (2, L+2Z)

            col = jax.lax.broadcasted_iota(jnp.int32, (1, L), 1) % W
            row2 = jax.lax.broadcasted_iota(jnp.int32, (2, L), 0)

            # TODO(synk): for very large H*W, stage `padded` in a VMEM scratch
            # ref and chunk this accumulation over lane windows to bound vreg
            # live ranges.
            acc = jnp.zeros((2, L), jnp.float32)
            for dx in range(KSIZE):
                part = jnp.zeros((2, L), jnp.float32)
                for dy in range(KSIZE):
                    off = dy * W + dx
                    wa = w_ref[dy * KSIZE + dx]                 # avg weight (pre /C)
                    wm = w_ref[KSIZE * KSIZE + dy * KSIZE + dx]
                    w_tap = jnp.where(row2 == 0, wa, wm)        # per-sublane pair
                    part = part + padded[:, off:off + L] * w_tap
                # Column-validity mask for this kernel column (kx = dx - PAD):
                # zero out taps that would wrap across image rows.
                lo = max(0, PAD - dx)
                hi = W - max(0, dx - PAD)
                valid = (col >= lo) & (col < hi)                # (1, L)
                acc = acc + jnp.where(valid, part, 0.0)

            y = acc[0:1, :] + acc[1:2, :]                       # 2 -> 1 combine
            o_ref[0] = jax.nn.sigmoid(y).astype(o_ref.dtype)

    out = pl.pallas_call(
        kernel,
        out_shape=jax.ShapeDtypeStruct((N, 1, L), x.dtype),
        grid_spec=pltpu.PrefetchScalarGridSpec(
            num_scalar_prefetch=0,
            grid=(N, num_c),
            in_specs=[
                pl.BlockSpec((1, TC, L), lambda n, c: (n, c, 0)),
                pl.BlockSpec(memory_space=pltpu.MemorySpace.SMEM),
            ],
            out_specs=pl.BlockSpec((1, 1, L), lambda n, c: (n, 0, 0)),
            scratch_shapes=[pltpu.VMEM((R, L), jnp.float32),
                            pltpu.VMEM((R, L), jnp.float32)],
        ),
        # TODO(synk): on v7x (2 TCs) add a lane/H-split parallel grid axis (with a
        # PAD-row halo for the 7x7 conv) so both cores stay busy when N is small.
        compiler_params=pltpu.CompilerParams(
            dimension_semantics=("parallel", "arbitrary"),
            vmem_limit_bytes=vmem_limit),
    )(x_flat, w_flat)
    return out.reshape(N, 1, H, W)


def spatial_attention_ref(x, weight):
    """Pure-JAX reference mirroring the PyTorch forward."""
    xf = x.astype(jnp.float32)
    avg = jnp.mean(xf, axis=1, keepdims=True)
    mx = jnp.max(xf, axis=1, keepdims=True)
    cat = jnp.concatenate([avg, mx], axis=1)
    y = jax.lax.conv_general_dilated(
        cat, weight.astype(jnp.float32), window_strides=(1, 1),
        padding=((PAD, PAD), (PAD, PAD)),
        dimension_numbers=("NCHW", "OIHW", "NCHW"))
    return jax.nn.sigmoid(y)


if __name__ == "__main__":
    key = jax.random.PRNGKey(0)
    kx, kw = jax.random.split(key)

    N, C, H, W = 2, 4, 16, 16
    x = jax.random.normal(kx, (N, C, H, W), dtype=jnp.float32)
    # Deterministic synthetic conv weight, shape (out=1, in=2, 7, 7).
    weight = (jax.random.normal(kw, (1, 2, KSIZE, KSIZE), dtype=jnp.float32)
              * (1.0 / (2 * KSIZE * KSIZE) ** 0.5))

    out = spatial_attention(x, weight)
    out = jax.block_until_ready(out)

    ref = spatial_attention_ref(x, weight)
    assert out.shape == (N, 1, H, W)
    assert jnp.allclose(out.astype(jnp.float32), ref, atol=2e-5, rtol=1e-5), \
        "mismatch vs reference"

    print("KERNEL_OK")
</pallas_src>

<mosaic_0001>
module attributes {stable_mosaic.version = 11 : i64} {
  func.func @kernel(%arg0: i32, %arg1: i32, %arg2: memref<1x4x256xf32, #tpu.memory_space<vmem>>, %arg3: memref<98xf32, #tpu.memory_space<smem>>, %arg4: memref<1x1x256xf32, #tpu.memory_space<vmem>>, %arg5: memref<4x256xf32, #tpu.memory_space<vmem>>, %arg6: memref<4x256xf32, #tpu.memory_space<vmem>>) attributes {dimension_semantics = [#tpu.dimension_semantics<parallel>, #tpu.dimension_semantics<arbitrary>], iteration_bounds = array<i64: 2, 1>, scalar_prefetch = 0 : i64, scratch_operands = 2 : i64, tpu.core_type = #tpu.core_type<tc>, window_params = [{transform_indices = @transform_0, window_bounds = array<i64: 1, 4, 256>}, {transform_indices = @transform_1, window_bounds = array<i64: 98>}, {transform_indices = @transform_2, window_bounds = array<i64: 1, 1, 256>}]} {
    %c0_i32 = arith.constant 0 : i32
    %0 = arith.cmpi eq, %arg1, %c0_i32 : i32
    %1 = arith.extui %0 : i1 to i32
    %c0_i32_0 = arith.constant 0 : i32
    %2 = arith.cmpi ne, %1, %c0_i32_0 : i32
    scf.if %2 {
      %cst = arith.constant 0.000000e+00 : f32
      %14 = vector.broadcast %cst : f32 to vector<4x256xf32>
      %c0_13 = arith.constant 0 : index
      %c0_14 = arith.constant 0 : index
      %15 = vector.load %arg5[%c0_13, %c0_14] : memref<4x256xf32, #tpu.memory_space<vmem>>, vector<4x256xf32>
      tpu.vector_store %arg5[%c0_13, %c0_14], %14 {strides = array<i32>} : memref<4x256xf32, #tpu.memory_space<vmem>>, vector<4x256xf32>,
      %cst_15 = arith.constant 0xFF800000 : f32
      %16 = vector.broadcast %cst_15 : f32 to vector<4x256xf32>
      %c0_16 = arith.constant 0 : index
      %c0_17 = arith.constant 0 : index
      %17 = vector.load %arg6[%c0_16, %c0_17] : memref<4x256xf32, #tpu.memory_space<vmem>>, vector<4x256xf32>
      tpu.vector_store %arg6[%c0_16, %c0_17], %16 {strides = array<i32>} : memref<4x256xf32, #tpu.memory_space<vmem>>, vector<4x256xf32>,
    } else {
    }
    %c0 = arith.constant 0 : index
    %c0_1 = arith.constant 0 : index
    %c0_2 = arith.constant 0 : index
    %3 = vector.load %arg2[%c0, %c0_1, %c0_2] : memref<1x4x256xf32, #tpu.memory_space<vmem>>, vector<1x4x256xf32>
    %4 = vector.shape_cast %3 : vector<1x4x256xf32> to vector<4x256xf32>
    %c0_3 = arith.constant 0 : index
    %c0_4 = arith.constant 0 : index
    %5 = vector.load %arg5[%c0_3, %c0_4] : memref<4x256xf32, #tpu.memory_space<vmem>>, vector<4x256xf32>
    %6 = arith.addf %5, %4 : vector<4x256xf32>
    %c0_5 = arith.constant 0 : index
    %c0_6 = arith.constant 0 : index
    %7 = vector.load %arg5[%c0_5, %c0_6] : memref<4x256xf32, #tpu.memory_space<vmem>>, vector<4x256xf32>
    tpu.vector_store %arg5[%c0_5, %c0_6], %6 {strides = array<i32>} : memref<4x256xf32, #tpu.memory_space<vmem>>, vector<4x256xf32>,
    %c0_7 = arith.constant 0 : index
    %c0_8 = arith.constant 0 : index
    %8 = vector.load %arg6[%c0_7, %c0_8] : memref<4x256xf32, #tpu.memory_space<vmem>>, vector<4x256xf32>
    %9 = arith.maximumf %8, %4 : vector<4x256xf32>
    %c0_9 = arith.constant 0 : index
    %c0_10 = arith.constant 0 : index
    %10 = vector.load %arg6[%c0_9, %c0_10] : memref<4x256xf32, #tpu.memory_space<vmem>>, vector<4x256xf32>
    tpu.vector_store %arg6[%c0_9, %c0_10], %9 {strides = array<i32>} : memref<4x256xf32, #tpu.memory_space<vmem>>, vector<4x256xf32>,
    %c0_i32_11 = arith.constant 0 : i32
    %11 = arith.cmpi eq, %arg1, %c0_i32_11 : i32
    %12 = arith.extui %11 : i1 to i32
    %c0_i32_12 = arith.constant 0 : i32
    %13 = arith.cmpi ne, %12, %c0_i32_12 : i32
    scf.if %13 {
      %c0_13 = arith.constant 0 : index
      %c0_14 = arith.constant 0 : index
      %14 = vector.load %arg5[%c0_13, %c0_14] : memref<4x256xf32, #tpu.memory_space<vmem>>, vector<4x256xf32>
      %cst = arith.constant dense<0.000000e+00> : vector<256xf32>
      %15 = vector.multi_reduction <add>, %14, %cst [0] : vector<4x256xf32> to vector<256xf32>
      %16 = vector.shape_cast %15 : vector<256xf32> to vector<1x256xf32>
      %c0_15 = arith.constant 0 : index
      %c0_16 = arith.constant 0 : index
      %17 = vector.load %arg6[%c0_15, %c0_16] : memref<4x256xf32, #tpu.memory_space<vmem>>, vector<4x256xf32>
      %cst_17 = arith.constant dense<0xFF800000> : vector<256xf32>
      %18 = vector.multi_reduction <maximumf>, %17, %cst_17 [0] : vector<4x256xf32> to vector<256xf32>
      %19 = vector.shape_cast %18 : vector<256xf32> to vector<1x256xf32>
      %cst_18 = arith.constant 0.000000e+00 : f32
      %20 = vector.broadcast %cst_18 : f32 to vector<2x51xf32>
      %21 = tpu.concatenate %16, %19 in 0 : vector<1x256xf32>, vector<1x256xf32> -> vector<2x256xf32>
      %22 = tpu.concatenate %20, %21, %20 in 1 : vector<2x51xf32>, vector<2x256xf32>, vector<2x51xf32> -> vector<2x358xf32>
      %23 = tpu.iota {dimensions = array<i32: 1>} : vector<1x256xi32>
      %c16_i32 = arith.constant 16 : i32
      %c0_i32_19 = arith.constant 0 : i32
      %24 = arith.cmpi eq, %c16_i32, %c0_i32_19 : i32
      %c1_i32 = arith.constant 1 : i32
      %25 = arith.select %24, %c1_i32, %c16_i32 : i32
      %26 = vector.broadcast %25 : i32 to vector<1x256xi32>
      %27 = arith.remsi %23, %26 : vector<1x256xi32>
      %c0_i32_20 = arith.constant 0 : i32
      %28 = vector.broadcast %c0_i32_20 : i32 to vector<1x256xi32>
      %29 = arith.cmpi ne, %27, %28 : vector<1x256xi32>
      %c0_i32_21 = arith.constant 0 : i32
      %30 = vector.broadcast %c0_i32_21 : i32 to vector<1x256xi32>
      %31 = arith.cmpi slt, %27, %30 : vector<1x256xi32>
      %c0_i32_22 = arith.constant 0 : i32
      %32 = arith.cmpi slt, %25, %c0_i32_22 : i32
      %33 = vector.broadcast %32 : i1 to vector<1x256xi1>
      %34 = vector.broadcast %33 : vector<1x256xi1> to vector<1x256xi1>
      %35 = arith.xori %31, %34 : vector<1x256xi1>
      %36 = arith.andi %35, %29 : vector<1x256xi1>
      %37 = vector.broadcast %25 : i32 to vector<1x256xi32>
      %38 = arith.addi %27, %37 : vector<1x256xi32>
      %39 = arith.select %36, %38, %27 : vector<1x256xi1>, vector<1x256xi32>
      %40 = tpu.iota {dimensions = array<i32: 0>} : vector<2x256xi32>
      %cst_23 = arith.constant 0.000000e+00 : f32
      %41 = vector.broadcast %cst_23 : f32 to vector<2x256xf32>
      %cst_24 = arith.constant 0.000000e+00 : f32
      %42 = vector.broadcast %cst_24 : f32 to vector<2x256xf32>
      %c0_25 = arith.constant 0 : index
      %43 = memref.load %arg3[%c0_25] : memref<98xf32, #tpu.memory_space<smem>>
      %c49 = arith.constant 49 : index
      %44 = memref.load %arg3[%c49] : memref<98xf32, #tpu.memory_space<smem>>
      %c0_i32_26 = arith.constant 0 : i32
      %45 = vector.broadcast %c0_i32_26 : i32 to vector<2x256xi32>
      %46 = arith.cmpi eq, %40, %45 : vector<2x256xi32>
      %47 = vector.broadcast %43 : f32 to vector<2x256xf32>
      %48 = vector.broadcast %44 : f32 to vector<2x256xf32>
      %49 = arith.select %46, %47, %48 : vector<2x256xi1>, vector<2x256xf32>
      %50 = vector.extract_strided_slice %22 {offsets = [0, 0], sizes = [2, 256], strides = [1, 1]} : vector<2x358xf32> to vector<2x256xf32>
      %51 = arith.mulf %50, %49 : vector<2x256xf32>
      %52 = arith.addf %42, %51 : vector<2x256xf32>
      %c7 = arith.constant 7 : index
      %53 = memref.load %arg3[%c7] : memref<98xf32, #tpu.memory_space<smem>>
      %c56 = arith.constant 56 : index
      %54 = memref.load %arg3[%c56] : memref<98xf32, #tpu.memory_space<smem>>
      %c0_i32_27 = arith.constant 0 : i32
      %55 = vector.broadcast %c0_i32_27 : i32 to vector<2x256xi32>
      %56 = arith.cmpi eq, %40, %55 : vector<2x256xi32>
      %57 = vector.broadcast %53 : f32 to vector<2x256xf32>
      %58 = vector.broadcast %54 : f32 to vector<2x256xf32>
      %59 = arith.select %56, %57, %58 : vector<2x256xi1>, vector<2x256xf32>
      %60 = vector.extract_strided_slice %22 {offsets = [0, 16], sizes = [2, 256], strides = [1, 1]} : vector<2x358xf32> to vector<2x256xf32>
      %61 = arith.mulf %60, %59 : vector<2x256xf32>
      %62 = arith.addf %52, %61 : vector<2x256xf32>
      %c14 = arith.constant 14 : index
      %63 = memref.load %arg3[%c14] : memref<98xf32, #tpu.memory_space<smem>>
      %c63 = arith.constant 63 : index
      %64 = memref.load %arg3[%c63] : memref<98xf32, #tpu.memory_space<smem>>
      %c0_i32_28 = arith.constant 0 : i32
      %65 = vector.broadcast %c0_i32_28 : i32 to vector<2x256xi32>
      %66 = arith.cmpi eq, %40, %65 : vector<2x256xi32>
      %67 = vector.broadcast %63 : f32 to vector<2x256xf32>
      %68 = vector.broadcast %64 : f32 to vector<2x256xf32>
      %69 = arith.select %66, %67, %68 : vector<2x256xi1>, vector<2x256xf32>
      %70 = vector.extract_strided_slice %22 {offsets = [0, 32], sizes = [2, 256], strides = [1, 1]} : vector<2x358xf32> to vector<2x256xf32>
      %71 = arith.mulf %70, %69 : vector<2x256xf32>
      %72 = arith.addf %62, %71 : vector<2x256xf32>
      %c21 = arith.constant 21 : index
      %73 = memref.load %arg3[%c21] : memref<98xf32, #tpu.memory_space<smem>>
      %c70 = arith.constant 70 : index
      %74 = memref.load %arg3[%c70] : memref<98xf32, #tpu.memory_space<smem>>
      %c0_i32_29 = arith.constant 0 : i32
      %75 = vector.broadcast %c0_i32_29 : i32 to vector<2x256xi32>
      %76 = arith.cmpi eq, %40, %75 : vector<2x256xi32>
      %77 = vector.broadcast %73 : f32 to vector<2x256xf32>
      %78 = vector.broadcast %74 : f32 to vector<2x256xf32>
      %79 = arith.select %76, %77, %78 : vector<2x256xi1>, vector<2x256xf32>
      %80 = vector.extract_strided_slice %22 {offsets = [0, 48], sizes = [2, 256], strides = [1, 1]} : vector<2x358xf32> to vector<2x256xf32>
      %81 = arith.mulf %80, %79 : vector<2x256xf32>
      %82 = arith.addf %72, %81 : vector<2x256xf32>
      %c28 = arith.constant 28 : index
      %83 = memref.load %arg3[%c28] : memref<98xf32, #tpu.memory_space<smem>>
      %c77 = arith.constant 77 : index
      %84 = memref.load %arg3[%c77] : memref<98xf32, #tpu.memory_space<smem>>
      %c0_i32_30 = arith.constant 0 : i32
      %85 = vector.broadcast %c0_i32_30 : i32 to vector<2x256xi32>
      %86 = arith.cmpi eq, %40, %85 : vector<2x256xi32>
      %87 = vector.broadcast %83 : f32 to vector<2x256xf32>
      %88 = vector.broadcast %84 : f32 to vector<2x256xf32>
      %89 = arith.select %86, %87, %88 : vector<2x256xi1>, vector<2x256xf32>
      %90 = vector.extract_strided_slice %22 {offsets = [0, 64], sizes = [2, 256], strides = [1, 1]} : vector<2x358xf32> to vector<2x256xf32>
      %91 = arith.mulf %90, %89 : vector<2x256xf32>
      %92 = arith.addf %82, %91 : vector<2x256xf32>
      %c35 = arith.constant 35 : index
      %93 = memref.load %arg3[%c35] : memref<98xf32, #tpu.memory_space<smem>>
      %c84 = arith.constant 84 : index
      %94 = memref.load %arg3[%c84] : memref<98xf32, #tpu.memory_space<smem>>
      %c0_i32_31 = arith.constant 0 : i32
      %95 = vector.broadcast %c0_i32_31 : i32 to vector<2x256xi32>
      %96 = arith.cmpi eq, %40, %95 : vector<2x256xi32>
      %97 = vector.broadcast %93 : f32 to vector<2x256xf32>
      %98 = vector.broadcast %94 : f32 to vector<2x256xf32>
      %99 = arith.select %96, %97, %98 : vector<2x256xi1>, vector<2x256xf32>
      %100 = vector.extract_strided_slice %22 {offsets = [0, 80], sizes = [2, 256], strides = [1, 1]} : vector<2x358xf32> to vector<2x256xf32>
      %101 = arith.mulf %100, %99 : vector<2x256xf32>
      %102 = arith.addf %92, %101 : vector<2x256xf32>
      %c42 = arith.constant 42 : index
      %103 = memref.load %arg3[%c42] : memref<98xf32, #tpu.memory_space<smem>>
      %c91 = arith.constant 91 : index
      %104 = memref.load %arg3[%c91] : memref<98xf32, #tpu.memory_space<smem>>
      %c0_i32_32 = arith.constant 0 : i32
      %105 = vector.broadcast %c0_i32_32 : i32 to vector<2x256xi32>
      %106 = arith.cmpi eq, %40, %105 : vector<2x256xi32>
      %107 = vector.broadcast %103 : f32 to vector<2x256xf32>
      %108 = vector.broadcast %104 : f32 to vector<2x256xf32>
      %109 = arith.select %106, %107, %108 : vector<2x256xi1>, vector<2x256xf32>
      %110 = vector.extract_strided_slice %22 {offsets = [0, 96], sizes = [2, 256], strides = [1, 1]} : vector<2x358xf32> to vector<2x256xf32>
      %111 = arith.mulf %110, %109 : vector<2x256xf32>
      %112 = arith.addf %102, %111 : vector<2x256xf32>
      %c3_i32 = arith.constant 3 : i32
      %113 = vector.broadcast %c3_i32 : i32 to vector<1x256xi32>
      %114 = arith.cmpi sge, %39, %113 : vector<1x256xi32>
      %c16_i32_33 = arith.constant 16 : i32
      %115 = vector.broadcast %c16_i32_33 : i32 to vector<1x256xi32>
      %116 = arith.cmpi slt, %39, %115 : vector<1x256xi32>
      %117 = arith.andi %114, %116 : vector<1x256xi1>
      %cst_34 = arith.constant 0.000000e+00 : f32
      %118 = vector.shape_cast %117 : vector<1x256xi1> to vector<1x256xi1>
      %119 = vector.broadcast %118 : vector<1x256xi1> to vector<2x256xi1>
      %120 = vector.broadcast %cst_34 : f32 to vector<2x256xf32>
      %121 = arith.select %119, %112, %120 : vector<2x256xi1>, vector<2x256xf32>
      %122 = arith.addf %41, %121 : vector<2x256xf32>
      %cst_35 = arith.constant 0.000000e+00 : f32
      %123 = vector.broadcast %cst_35 : f32 to vector<2x256xf32>
      %c1 = arith.constant 1 : index
      %124 = memref.load %arg3[%c1] : memref<98xf32, #tpu.memory_space<smem>>
      %c50 = arith.constant 50 : index
      %125 = memref.load %arg3[%c50] : memref<98xf32, #tpu.memory_space<smem>>
      %c0_i32_36 = arith.constant 0 : i32
      %126 = vector.broadcast %c0_i32_36 : i32 to vector<2x256xi32>
      %127 = arith.cmpi eq, %40, %126 : vector<2x256xi32>
      %128 = vector.broadcast %124 : f32 to vector<2x256xf32>
      %129 = vector.broadcast %125 : f32 to vector<2x256xf32>
      %130 = arith.select %127, %128, %129 : vector<2x256xi1>, vector<2x256xf32>
      %131 = vector.extract_strided_slice %22 {offsets = [0, 1], sizes = [2, 256], strides = [1, 1]} : vector<2x358xf32> to vector<2x256xf32>
      %132 = arith.mulf %131, %130 : vector<2x256xf32>
      %133 = arith.addf %123, %132 : vector<2x256xf32>
      %c8 = arith.constant 8 : index
      %134 = memref.load %arg3[%c8] : memref<98xf32, #tpu.memory_space<smem>>
      %c57 = arith.constant 57 : index
      %135 = memref.load %arg3[%c57] : memref<98xf32, #tpu.memory_space<smem>>
      %c0_i32_37 = arith.constant 0 : i32
      %136 = vector.broadcast %c0_i32_37 : i32 to vector<2x256xi32>
      %137 = arith.cmpi eq, %40, %136 : vector<2x256xi32>
      %138 = vector.broadcast %134 : f32 to vector<2x256xf32>
      %139 = vector.broadcast %135 : f32 to vector<2x256xf32>
      %140 = arith.select %137, %138, %139 : vector<2x256xi1>, vector<2x256xf32>
      %141 = vector.extract_strided_slice %22 {offsets = [0, 17], sizes = [2, 256], strides = [1, 1]} : vector<2x358xf32> to vector<2x256xf32>
      %142 = arith.mulf %141, %140 : vector<2x256xf32>
      %143 = arith.addf %133, %142 : vector<2x256xf32>
      %c15 = arith.constant 15 : index
      %144 = memref.load %arg3[%c15] : memref<98xf32, #tpu.memory_space<smem>>
      %c64 = arith.constant 64 : index
      %145 = memref.load %arg3[%c64] : memref<98xf32, #tpu.memory_space<smem>>
      %c0_i32_38 = arith.constant 0 : i32
      %146 = vector.broadcast %c0_i32_38 : i32 to vector<2x256xi32>
      %147 = arith.cmpi eq, %40, %146 : vector<2x256xi32>
      %148 = vector.broadcast %144 : f32 to vector<2x256xf32>
      %149 = vector.broadcast %145 : f32 to vector<2x256xf32>
      %150 = arith.select %147, %148, %149 : vector<2x256xi1>, vector<2x256xf32>
      %151 = vector.extract_strided_slice %22 {offsets = [0, 33], sizes = [2, 256], strides = [1, 1]} : vector<2x358xf32> to vector<2x256xf32>
      %152 = arith.mulf %151, %150 : vector<2x256xf32>
      %153 = arith.addf %143, %152 : vector<2x256xf32>
      %c22 = arith.constant 22 : index
      %154 = memref.load %arg3[%c22] : memref<98xf32, #tpu.memory_space<smem>>
      %c71 = arith.constant 71 : index
      %155 = memref.load %arg3[%c71] : memref<98xf32, #tpu.memory_space<smem>>
      %c0_i32_39 = arith.constant 0 : i32
      %156 = vector.broadcast %c0_i32_39 : i32 to vector<2x256xi32>
      %157 = arith.cmpi eq, %40, %156 : vector<2x256xi32>
      %158 = vector.broadcast %154 : f32 to vector<2x256xf32>
      %159 = vector.broadcast %155 : f32 to vector<2x256xf32>
      %160 = arith.select %157, %158, %159 : vector<2x256xi1>, vector<2x256xf32>
      %161 = vector.extract_strided_slice %22 {offsets = [0, 49], sizes = [2, 256], strides = [1, 1]} : vector<2x358xf32> to vector<2x256xf32>
      %162 = arith.mulf %161, %160 : vector<2x256xf32>
      %163 = arith.addf %153, %162 : vector<2x256xf32>
      %c29 = arith.constant 29 : index
      %164 = memref.load %arg3[%c29] : memref<98xf32, #tpu.memory_space<smem>>
      %c78 = arith.constant 78 : index
      %165 = memref.load %arg3[%c78] : memref<98xf32, #tpu.memory_space<smem>>
      %c0_i32_40 = arith.constant 0 : i32
      %166 = vector.broadcast %c0_i32_40 : i32 to vector<2x256xi32>
      %167 = arith.cmpi eq, %40, %166 : vector<2x256xi32>
      %168 = vector.broadcast %164 : f32 to vector<2x256xf32>
      %169 = vector.broadcast %165 : f32 to vector<2x256xf32>
      %170 = arith.select %167, %168, %169 : vector<2x256xi1>, vector<2x256xf32>
      %171 = vector.extract_strided_slice %22 {offsets = [0, 65], sizes = [2, 256], strides = [1, 1]} : vector<2x358xf32> to vector<2x256xf32>
      %172 = arith.mulf %171, %170 : vector<2x256xf32>
      %173 = arith.addf %163, %172 : vector<2x256xf32>
      %c36 = arith.constant 36 : index
      %174 = memref.load %arg3[%c36] : memref<98xf32, #tpu.memory_space<smem>>
      %c85 = arith.constant 85 : index
      %175 = memref.load %arg3[%c85] : memref<98xf32, #tpu.memory_space<smem>>
      %c0_i32_41 = arith.constant 0 : i32
      %176 = vector.broadcast %c0_i32_41 : i32 to vector<2x256xi32>
      %177 = arith.cmpi eq, %40, %176 : vector<2x256xi32>
      %178 = vector.broadcast %174 : f32 to vector<2x256xf32>
      %179 = vector.broadcast %175 : f32 to vector<2x256xf32>
      %180 = arith.select %177, %178, %179 : vector<2x256xi1>, vector<2x256xf32>
      %181 = vector.extract_strided_slice %22 {offsets = [0, 81], sizes = [2, 256], strides = [1, 1]} : vector<2x358xf32> to vector<2x256xf32>
      %182 = arith.mulf %181, %180 : vector<2x256xf32>
      %183 = arith.addf %173, %182 : vector<2x256xf32>
      %c43 = arith.constant 43 : index
      %184 = memref.load %arg3[%c43] : memref<98xf32, #tpu.memory_space<smem>>
      %c92 = arith.constant 92 : index
      %185 = memref.load %arg3[%c92] : memref<98xf32, #tpu.memory_space<smem>>
      %c0_i32_42 = arith.constant 0 : i32
      %186 = vector.broadcast %c0_i32_42 : i32 to vector<2x256xi32>
      %187 = arith.cmpi eq, %40, %186 : vector<2x256xi32>
      %188 = vector.broadcast %184 : f32 to vector<2x256xf32>
      %189 = vector.broadcast %185 : f32 to vector<2x256xf32>
      %190 = arith.select %187, %188, %189 : vector<2x256xi1>, vector<2x256xf32>
      %191 = vector.extract_strided_slice %22 {offsets = [0, 97], sizes = [2, 256], strides = [1, 1]} : vector<2x358xf32> to vector<2x256xf32>
      %192 = arith.mulf %191, %190 : vector<2x256xf32>
      %193 = arith.addf %183, %192 : vector<2x256xf32>
      %c2_i32 = arith.constant 2 : i32
      %194 = vector.broadcast %c2_i32 : i32 to vector<1x256xi32>
      %195 = arith.cmpi sge, %39, %194 : vector<1x256xi32>
      %c16_i32_43 = arith.constant 16 : i32
      %196 = vector.broadcast %c16_i32_43 : i32 to vector<1x256xi32>
      %197 = arith.cmpi slt, %39, %196 : vector<1x256xi32>
      %198 = arith.andi %195, %197 : vector<1x256xi1>
      %cst_44 = arith.constant 0.000000e+00 : f32
      %199 = vector.shape_cast %198 : vector<1x256xi1> to vector<1x256xi1>
      %200 = vector.broadcast %199 : vector<1x256xi1> to vector<2x256xi1>
      %201 = vector.broadcast %cst_44 : f32 to vector<2x256xf32>
      %202 = arith.select %200, %193, %201 : vector<2x256xi1>, vector<2x256xf32>
      %203 = arith.addf %122, %202 : vector<2x256xf32>
      %cst_45 = arith.constant 0.000000e+00 : f32
      %204 = vector.broadcast %cst_45 : f32 to vector<2x256xf32>
      %c2 = arith.constant 2 : index
      %205 = memref.load %arg3[%c2] : memref<98xf32, #tpu.memory_space<smem>>
      %c51 = arith.constant 51 : index
      %206 = memref.load %arg3[%c51] : memref<98xf32, #tpu.memory_space<smem>>
      %c0_i32_46 = arith.constant 0 : i32
      %207 = vector.broadcast %c0_i32_46 : i32 to vector<2x256xi32>
      %208 = arith.cmpi eq, %40, %207 : vector<2x256xi32>
      %209 = vector.broadcast %205 : f32 to vector<2x256xf32>
      %210 = vector.broadcast %206 : f32 to vector<2x256xf32>
      %211 = arith.select %208, %209, %210 : vector<2x256xi1>, vector<2x256xf32>
      %212 = vector.extract_strided_slice %22 {offsets = [0, 2], sizes = [2, 256], strides = [1, 1]} : vector<2x358xf32> to vector<2x256xf32>
      %213 = arith.mulf %212, %211 : vector<2x256xf32>
      %214 = arith.addf %204, %213 : vector<2x256xf32>
      %c9 = arith.constant 9 : index
      %215 = memref.load %arg3[%c9] : memref<98xf32, #tpu.memory_space<smem>>
      %c58 = arith.constant 58 : index
      %216 = memref.load %arg3[%c58] : memref<98xf32, #tpu.memory_space<smem>>
      %c0_i32_47 = arith.constant 0 : i32
      %217 = vector.broadcast %c0_i32_47 : i32 to vector<2x256xi32>
      %218 = arith.cmpi eq, %40, %217 : vector<2x256xi32>
      %219 = vector.broadcast %215 : f32 to vector<2x256xf32>
      %220 = vector.broadcast %216 : f32 to vector<2x256xf32>
      %221 = arith.select %218, %219, %220 : vector<2x256xi1>, vector<2x256xf32>
      %222 = vector.extract_strided_slice %22 {offsets = [0, 18], sizes = [2, 256], strides = [1, 1]} : vector<2x358xf32> to vector<2x256xf32>
      %223 = arith.mulf %222, %221 : vector<2x256xf32>
      %224 = arith.addf %214, %223 : vector<2x256xf32>
      %c16 = arith.constant 16 : index
      %225 = memref.load %arg3[%c16] : memref<98xf32, #tpu.memory_space<smem>>
      %c65 = arith.constant 65 : index
      %226 = memref.load %arg3[%c65] : memref<98xf32, #tpu.memory_space<smem>>
      %c0_i32_48 = arith.constant 0 : i32
      %227 = vector.broadcast %c0_i32_48 : i32 to vector<2x256xi32>
      %228 = arith.cmpi eq, %40, %227 : vector<2x256xi32>
      %229 = vector.broadcast %225 : f32 to vector<2x256xf32>
      %230 = vector.broadcast %226 : f32 to vector<2x256xf32>
      %231 = arith.select %228, %229, %230 : vector<2x256xi1>, vector<2x256xf32>
      %232 = vector.extract_strided_slice %22 {offsets = [0, 34], sizes = [2, 256], strides = [1, 1]} : vector<2x358xf32> to vector<2x256xf32>
      %233 = arith.mulf %232, %231 : vector<2x256xf32>
      %234 = arith.addf %224, %233 : vector<2x256xf32>
      %c23 = arith.constant 23 : index
      %235 = memref.load %arg3[%c23] : memref<98xf32, #tpu.memory_space<smem>>
      %c72 = arith.constant 72 : index
      %236 = memref.load %arg3[%c72] : memref<98xf32, #tpu.memory_space<smem>>
      %c0_i32_49 = arith.constant 0 : i32
      %237 = vector.broadcast %c0_i32_49 : i32 to vector<2x256xi32>
      %238 = arith.cmpi eq, %40, %237 : vector<2x256xi32>
      %239 = vector.broadcast %235 : f32 to vector<2x256xf32>
      %240 = vector.broadcast %236 : f32 to vector<2x256xf32>
      %241 = arith.select %238, %239, %240 : vector<2x256xi1>, vector<2x256xf32>
      %242 = vector.extract_strided_slice %22 {offsets = [0, 50], sizes = [2, 256], strides = [1, 1]} : vector<2x358xf32> to vector<2x256xf32>
      %243 = arith.mulf %242, %241 : vector<2x256xf32>
      %244 = arith.addf %234, %243 : vector<2x256xf32>
      %c30 = arith.constant 30 : index
      %245 = memref.load %arg3[%c30] : memref<98xf32, #tpu.memory_space<smem>>
      %c79 = arith.constant 79 : index
      %246 = memref.load %arg3[%c79] : memref<98xf32, #tpu.memory_space<smem>>
      %c0_i32_50 = arith.constant 0 : i32
      %247 = vector.broadcast %c0_i32_50 : i32 to vector<2x256xi32>
      %248 = arith.cmpi eq, %40, %247 : vector<2x256xi32>
      %249 = vector.broadcast %245 : f32 to vector<2x256xf32>
      %250 = vector.broadcast %246 : f32 to vector<2x256xf32>
      %251 = arith.select %248, %249, %250 : vector<2x256xi1>, vector<2x256xf32>
      %252 = vector.extract_strided_slice %22 {offsets = [0, 66], sizes = [2, 256], strides = [1, 1]} : vector<2x358xf32> to vector<2x256xf32>
      %253 = arith.mulf %252, %251 : vector<2x256xf32>
      %254 = arith.addf %244, %253 : vector<2x256xf32>
      %c37 = arith.constant 37 : index
      %255 = memref.load %arg3[%c37] : memref<98xf32, #tpu.memory_space<smem>>
      %c86 = arith.constant 86 : index
      %256 = memref.load %arg3[%c86] : memref<98xf32, #tpu.memory_space<smem>>
      %c0_i32_51 = arith.constant 0 : i32
      %257 = vector.broadcast %c0_i32_51 : i32 to vector<2x256xi32>
      %258 = arith.cmpi eq, %40, %257 : vector<2x256xi32>
      %259 = vector.broadcast %255 : f32 to vector<2x256xf32>
      %260 = vector.broadcast %256 : f32 to vector<2x256xf32>
      %261 = arith.select %258, %259, %260 : vector<2x256xi1>, vector<2x256xf32>
      %262 = vector.extract_strided_slice %22 {offsets = [0, 82], sizes = [2, 256], strides = [1, 1]} : vector<2x358xf32> to vector<2x256xf32>
      %263 = arith.mulf %262, %261 : vector<2x256xf32>
      %264 = arith.addf %254, %263 : vector<2x256xf32>
      %c44 = arith.constant 44 : index
      %265 = memref.load %arg3[%c44] : memref<98xf32, #tpu.memory_space<smem>>
      %c93 = arith.constant 93 : index
      %266 = memref.load %arg3[%c93] : memref<98xf32, #tpu.memory_space<smem>>
      %c0_i32_52 = arith.constant 0 : i32
      %267 = vector.broadcast %c0_i32_52 : i32 to vector<2x256xi32>
      %268 = arith.cmpi eq, %40, %267 : vector<2x256xi32>
      %269 = vector.broadcast %265 : f32 to vector<2x256xf32>
      %270 = vector.broadcast %266 : f32 to vector<2x256xf32>
      %271 = arith.select %268, %269, %270 : vector<2x256xi1>, vector<2x256xf32>
      %272 = vector.extract_strided_slice %22 {offsets = [0, 98], sizes = [2, 256], strides = [1, 1]} : vector<2x358xf32> to vector<2x256xf32>
      %273 = arith.mulf %272, %271 : vector<2x256xf32>
      %274 = arith.addf %264, %273 : vector<2x256xf32>
      %c1_i32_53 = arith.constant 1 : i32
      %275 = vector.broadcast %c1_i32_53 : i32 to vector<1x256xi32>
      %276 = arith.cmpi sge, %39, %275 : vector<1x256xi32>
      %c16_i32_54 = arith.constant 16 : i32
      %277 = vector.broadcast %c16_i32_54 : i32 to vector<1x256xi32>
      %278 = arith.cmpi slt, %39, %277 : vector<1x256xi32>
      %279 = arith.andi %276, %278 : vector<1x256xi1>
      %cst_55 = arith.constant 0.000000e+00 : f32
      %280 = vector.shape_cast %279 : vector<1x256xi1> to vector<1x256xi1>
      %281 = vector.broadcast %280 : vector<1x256xi1> to vector<2x256xi1>
      %282 = vector.broadcast %cst_55 : f32 to vector<2x256xf32>
      %283 = arith.select %281, %274, %282 : vector<2x256xi1>, vector<2x256xf32>
      %284 = arith.addf %203, %283 : vector<2x256xf32>
      %cst_56 = arith.constant 0.000000e+00 : f32
      %285 = vector.broadcast %cst_56 : f32 to vector<2x256xf32>
      %c3 = arith.constant 3 : index
      %286 = memref.load %arg3[%c3] : memref<98xf32, #tpu.memory_space<smem>>
      %c52 = arith.constant 52 : index
      %287 = memref.load %arg3[%c52] : memref<98xf32, #tpu.memory_space<smem>>
      %c0_i32_57 = arith.constant 0 : i32
      %288 = vector.broadcast %c0_i32_57 : i32 to vector<2x256xi32>
      %289 = arith.cmpi eq, %40, %288 : vector<2x256xi32>
      %290 = vector.broadcast %286 : f32 to vector<2x256xf32>
      %291 = vector.broadcast %287 : f32 to vector<2x256xf32>
      %292 = arith.select %289, %290, %291 : vector<2x256xi1>, vector<2x256xf32>
      %293 = vector.extract_strided_slice %22 {offsets = [0, 3], sizes = [2, 256], strides = [1, 1]} : vector<2x358xf32> to vector<2x256xf32>
      %294 = arith.mulf %293, %292 : vector<2x256xf32>
      %295 = arith.addf %285, %294 : vector<2x256xf32>
      %c10 = arith.constant 10 : index
      %296 = memref.load %arg3[%c10] : memref<98xf32, #tpu.memory_space<smem>>
      %c59 = arith.constant 59 : index
      %297 = memref.load %arg3[%c59] : memref<98xf32, #tpu.memory_space<smem>>
      %c0_i32_58 = arith.constant 0 : i32
      %298 = vector.broadcast %c0_i32_58 : i32 to vector<2x256xi32>
      %299 = arith.cmpi eq, %40, %298 : vector<2x256xi32>
      %300 = vector.broadcast %296 : f32 to vector<2x256xf32>
      %301 = vector.broadcast %297 : f32 to vector<2x256xf32>
      %302 = arith.select %299, %300, %301 : vector<2x256xi1>, vector<2x256xf32>
      %303 = vector.extract_strided_slice %22 {offsets = [0, 19], sizes = [2, 256], strides = [1, 1]} : vector<2x358xf32> to vector<2x256xf32>
      %304 = arith.mulf %303, %302 : vector<2x256xf32>
      %305 = arith.addf %295, %304 : vector<2x256xf32>
      %c17 = arith.constant 17 : index
      %306 = memref.load %arg3[%c17] : memref<98xf32, #tpu.memory_space<smem>>
      %c66 = arith.constant 66 : index
      %307 = memref.load %arg3[%c66] : memref<98xf32, #tpu.memory_space<smem>>
      %c0_i32_59 = arith.constant 0 : i32
      %308 = vector.broadcast %c0_i32_59 : i32 to vector<2x256xi32>
      %309 = arith.cmpi eq, %40, %308 : vector<2x256xi32>
      %310 = vector.broadcast %306 : f32 to vector<2x256xf32>
      %311 = vector.broadcast %307 : f32 to vector<2x256xf32>
      %312 = arith.select %309, %310, %311 : vector<2x256xi1>, vector<2x256xf32>
      %313 = vector.extract_strided_slice %22 {offsets = [0, 35], sizes = [2, 256], strides = [1, 1]} : vector<2x358xf32> to vector<2x256xf32>
      %314 = arith.mulf %313, %312 : vector<2x256xf32>
      %315 = arith.addf %305, %314 : vector<2x256xf32>
      %c24 = arith.constant 24 : index
      %316 = memref.load %arg3[%c24] : memref<98xf32, #tpu.memory_space<smem>>
      %c73 = arith.constant 73 : index
      %317 = memref.load %arg3[%c73] : memref<98xf32, #tpu.memory_space<smem>>
      %c0_i32_60 = arith.constant 0 : i32
      %318 = vector.broadcast %c0_i32_60 : i32 to vector<2x256xi32>
      %319 = arith.cmpi eq, %40, %318 : vector<2x256xi32>
      %320 = vector.broadcast %316 : f32 to vector<2x256xf32>
      %321 = vector.broadcast %317 : f32 to vector<2x256xf32>
      %322 = arith.select %319, %320, %321 : vector<2x256xi1>, vector<2x256xf32>
      %323 = vector.extract_strided_slice %22 {offsets = [0, 51], sizes = [2, 256], strides = [1, 1]} : vector<2x358xf32> to vector<2x256xf32>
      %324 = arith.mulf %323, %322 : vector<2x256xf32>
      %325 = arith.addf %315, %324 : vector<2x256xf32>
      %c31 = arith.constant 31 : index
      %326 = memref.load %arg3[%c31] : memref<98xf32, #tpu.memory_space<smem>>
      %c80 = arith.constant 80 : index
      %327 = memref.load %arg3[%c80] : memref<98xf32, #tpu.memory_space<smem>>
      %c0_i32_61 = arith.constant 0 : i32
      %328 = vector.broadcast %c0_i32_61 : i32 to vector<2x256xi32>
      %329 = arith.cmpi eq, %40, %328 : vector<2x256xi32>
      %330 = vector.broadcast %326 : f32 to vector<2x256xf32>
      %331 = vector.broadcast %327 : f32 to vector<2x256xf32>
      %332 = arith.select %329, %330, %331 : vector<2x256xi1>, vector<2x256xf32>
      %333 = vector.extract_strided_slice %22 {offsets = [0, 67], sizes = [2, 256], strides = [1, 1]} : vector<2x358xf32> to vector<2x256xf32>
      %334 = arith.mulf %333, %332 : vector<2x256xf32>
      %335 = arith.addf %325, %334 : vector<2x256xf32>
      %c38 = arith.constant 38 : index
      %336 = memref.load %arg3[%c38] : memref<98xf32, #tpu.memory_space<smem>>
      %c87 = arith.constant 87 : index
      %337 = memref.load %arg3[%c87] : memref<98xf32, #tpu.memory_space<smem>>
      %c0_i32_62 = arith.constant 0 : i32
      %338 = vector.broadcast %c0_i32_62 : i32 to vector<2x256xi32>
      %339 = arith.cmpi eq, %40, %338 : vector<2x256xi32>
      %340 = vector.broadcast %336 : f32 to vector<2x256xf32>
      %341 = vector.broadcast %337 : f32 to vector<2x256xf32>
      %342 = arith.select %339, %340, %341 : vector<2x256xi1>, vector<2x256xf32>
      %343 = vector.extract_strided_slice %22 {offsets = [0, 83], sizes = [2, 256], strides = [1, 1]} : vector<2x358xf32> to vector<2x256xf32>
      %344 = arith.mulf %343, %342 : vector<2x256xf32>
      %345 = arith.addf %335, %344 : vector<2x256xf32>
      %c45 = arith.constant 45 : index
      %346 = memref.load %arg3[%c45] : memref<98xf32, #tpu.memory_space<smem>>
      %c94 = arith.constant 94 : index
      %347 = memref.load %arg3[%c94] : memref<98xf32, #tpu.memory_space<smem>>
      %c0_i32_63 = arith.constant 0 : i32
      %348 = vector.broadcast %c0_i32_63 : i32 to vector<2x256xi32>
      %349 = arith.cmpi eq, %40, %348 : vector<2x256xi32>
      %350 = vector.broadcast %346 : f32 to vector<2x256xf32>
      %351 = vector.broadcast %347 : f32 to vector<2x256xf32>
      %352 = arith.select %349, %350, %351 : vector<2x256xi1>, vector<2x256xf32>
      %353 = vector.extract_strided_slice %22 {offsets = [0, 99], sizes = [2, 256], strides = [1, 1]} : vector<2x358xf32> to vector<2x256xf32>
      %354 = arith.mulf %353, %352 : vector<2x256xf32>
      %355 = arith.addf %345, %354 : vector<2x256xf32>
      %c0_i32_64 = arith.constant 0 : i32
      %356 = vector.broadcast %c0_i32_64 : i32 to vector<1x256xi32>
      %357 = arith.cmpi sge, %39, %356 : vector<1x256xi32>
      %c16_i32_65 = arith.constant 16 : i32
      %358 = vector.broadcast %c16_i32_65 : i32 to vector<1x256xi32>
      %359 = arith.cmpi slt, %39, %358 : vector<1x256xi32>
      %360 = arith.andi %357, %359 : vector<1x256xi1>
      %cst_66 = arith.constant 0.000000e+00 : f32
      %361 = vector.shape_cast %360 : vector<1x256xi1> to vector<1x256xi1>
      %362 = vector.broadcast %361 : vector<1x256xi1> to vector<2x256xi1>
      %363 = vector.broadcast %cst_66 : f32 to vector<2x256xf32>
      %364 = arith.select %362, %355, %363 : vector<2x256xi1>, vector<2x256xf32>
      %365 = arith.addf %284, %364 : vector<2x256xf32>
      %cst_67 = arith.constant 0.000000e+00 : f32
      %366 = vector.broadcast %cst_67 : f32 to vector<2x256xf32>
      %c4 = arith.constant 4 : index
      %367 = memref.load %arg3[%c4] : memref<98xf32, #tpu.memory_space<smem>>
      %c53 = arith.constant 53 : index
      %368 = memref.load %arg3[%c53] : memref<98xf32, #tpu.memory_space<smem>>
      %c0_i32_68 = arith.constant 0 : i32
      %369 = vector.broadcast %c0_i32_68 : i32 to vector<2x256xi32>
      %370 = arith.cmpi eq, %40, %369 : vector<2x256xi32>
      %371 = vector.broadcast %367 : f32 to vector<2x256xf32>
      %372 = vector.broadcast %368 : f32 to vector<2x256xf32>
      %373 = arith.select %370, %371, %372 : vector<2x256xi1>, vector<2x256xf32>
      %374 = vector.extract_strided_slice %22 {offsets = [0, 4], sizes = [2, 256], strides = [1, 1]} : vector<2x358xf32> to vector<2x256xf32>
      %375 = arith.mulf %374, %373 : vector<2x256xf32>
      %376 = arith.addf %366, %375 : vector<2x256xf32>
      %c11 = arith.constant 11 : index
      %377 = memref.load %arg3[%c11] : memref<98xf32, #tpu.memory_space<smem>>
      %c60 = arith.constant 60 : index
      %378 = memref.load %arg3[%c60] : memref<98xf32, #tpu.memory_space<smem>>
      %c0_i32_69 = arith.constant 0 : i32
      %379 = vector.broadcast %c0_i32_69 : i32 to vector<2x256xi32>
      %380 = arith.cmpi eq, %40, %379 : vector<2x256xi32>
      %381 = vector.broadcast %377 : f32 to vector<2x256xf32>
      %382 = vector.broadcast %378 : f32 to vector<2x256xf32>
      %383 = arith.select %380, %381, %382 : vector<2x256xi1>, vector<2x256xf32>
      %384 = vector.extract_strided_slice %22 {offsets = [0, 20], sizes = [2, 256], strides = [1, 1]} : vector<2x358xf32> to vector<2x256xf32>
      %385 = arith.mulf %384, %383 : vector<2x256xf32>
      %386 = arith.addf %376, %385 : vector<2x256xf32>
      %c18 = arith.constant 18 : index
      %387 = memref.load %arg3[%c18] : memref<98xf32, #tpu.memory_space<smem>>
      %c67 = arith.constant 67 : index
      %388 = memref.load %arg3[%c67] : memref<98xf32, #tpu.memory_space<smem>>
      %c0_i32_70 = arith.constant 0 : i32
      %389 = vector.broadcast %c0_i32_70 : i32 to vector<2x256xi32>
      %390 = arith.cmpi eq, %40, %389 : vector<2x256xi32>
      %391 = vector.broadcast %387 : f32 to vector<2x256xf32>
      %392 = vector.broadcast %388 : f32 to vector<2x256xf32>
      %393 = arith.select %390, %391, %392 : vector<2x256xi1>, vector<2x256xf32>
      %394 = vector.extract_strided_slice %22 {offsets = [0, 36], sizes = [2, 256], strides = [1, 1]} : vector<2x358xf32> to vector<2x256xf32>
      %395 = arith.mulf %394, %393 : vector<2x256xf32>
      %396 = arith.addf %386, %395 : vector<2x256xf32>
      %c25 = arith.constant 25 : index
      %397 = memref.load %arg3[%c25] : memref<98xf32, #tpu.memory_space<smem>>
      %c74 = arith.constant 74 : index
      %398 = memref.load %arg3[%c74] : memref<98xf32, #tpu.memory_space<smem>>
      %c0_i32_71 = arith.constant 0 : i32
      %399 = vector.broadcast %c0_i32_71 : i32 to vector<2x256xi32>
      %400 = arith.cmpi eq, %40, %399 : vector<2x256xi32>
      %401 = vector.broadcast %397 : f32 to vector<2x256xf32>
      %402 = vector.broadcast %398 : f32 to vector<2x256xf32>
      %403 = arith.select %400, %401, %402 : vector<2x256xi1>, vector<2x256xf32>
      %404 = vector.extract_strided_slice %22 {offsets = [0, 52], sizes = [2, 256], strides = [1, 1]} : vector<2x358xf32> to vector<2x256xf32>
      %405 = arith.mulf %404, %403 : vector<2x256xf32>
      %406 = arith.addf %396, %405 : vector<2x256xf32>
      %c32 = arith.constant 32 : index
      %407 = memref.load %arg3[%c32] : memref<98xf32, #tpu.memory_space<smem>>
      %c81 = arith.constant 81 : index
      %408 = memref.load %arg3[%c81] : memref<98xf32, #tpu.memory_space<smem>>
      %c0_i32_72 = arith.constant 0 : i32
      %409 = vector.broadcast %c0_i32_72 : i32 to vector<2x256xi32>
      %410 = arith.cmpi eq, %40, %409 : vector<2x256xi32>
      %411 = vector.broadcast %407 : f32 to vector<2x256xf32>
      %412 = vector.broadcast %408 : f32 to vector<2x256xf32>
      %413 = arith.select %410, %411, %412 : vector<2x256xi1>, vector<2x256xf32>
      %414 = vector.extract_strided_slice %22 {offsets = [0, 68], sizes = [2, 256], strides = [1, 1]} : vector<2x358xf32> to vector<2x256xf32>
      %415 = arith.mulf %414, %413 : vector<2x256xf32>
      %416 = arith.addf %406, %415 : vector<2x256xf32>
      %c39 = arith.constant 39 : index
      %417 = memref.load %arg3[%c39] : memref<98xf32, #tpu.memory_space<smem>>
      %c88 = arith.constant 88 : index
      %418 = memref.load %arg3[%c88] : memref<98xf32, #tpu.memory_space<smem>>
      %c0_i32_73 = arith.constant 0 : i32
      %419 = vector.broadcast %c0_i32_73 : i32 to vector<2x256xi32>
      %420 = arith.cmpi eq, %40, %419 : vector<2x256xi32>
      %421 = vector.broadcast %417 : f32 to vector<2x256xf32>
      %422 = vector.broadcast %418 : f32 to vector<2x256xf32>
      %423 = arith.select %420, %421, %422 : vector<2x256xi1>, vector<2x256xf32>
      %424 = vector.extract_strided_slice %22 {offsets = [0, 84], sizes = [2, 256], strides = [1, 1]} : vector<2x358xf32> to vector<2x256xf32>
      %425 = arith.mulf %424, %423 : vector<2x256xf32>
      %426 = arith.addf %416, %425 : vector<2x256xf32>
      %c46 = arith.constant 46 : index
      %427 = memref.load %arg3[%c46] : memref<98xf32, #tpu.memory_space<smem>>
      %c95 = arith.constant 95 : index
      %428 = memref.load %arg3[%c95] : memref<98xf32, #tpu.memory_space<smem>>
      %c0_i32_74 = arith.constant 0 : i32
      %429 = vector.broadcast %c0_i32_74 : i32 to vector<2x256xi32>
      %430 = arith.cmpi eq, %40, %429 : vector<2x256xi32>
      %431 = vector.broadcast %427 : f32 to vector<2x256xf32>
      %432 = vector.broadcast %428 : f32 to vector<2x256xf32>
      %433 = arith.select %430, %431, %432 : vector<2x256xi1>, vector<2x256xf32>
      %434 = vector.extract_strided_slice %22 {offsets = [0, 100], sizes = [2, 256], strides = [1, 1]} : vector<2x358xf32> to vector<2x256xf32>
      %435 = arith.mulf %434, %433 : vector<2x256xf32>
      %436 = arith.addf %426, %435 : vector<2x256xf32>
      %c0_i32_75 = arith.constant 0 : i32
      %437 = vector.broadcast %c0_i32_75 : i32 to vector<1x256xi32>
      %438 = arith.cmpi sge, %39, %437 : vector<1x256xi32>
      %c15_i32 = arith.constant 15 : i32
      %439 = vector.broadcast %c15_i32 : i32 to vector<1x256xi32>
      %440 = arith.cmpi slt, %39, %439 : vector<1x256xi32>
      %441 = arith.andi %438, %440 : vector<1x256xi1>
      %cst_76 = arith.constant 0.000000e+00 : f32
      %442 = vector.shape_cast %441 : vector<1x256xi1> to vector<1x256xi1>
      %443 = vector.broadcast %442 : vector<1x256xi1> to vector<2x256xi1>
      %444 = vector.broadcast %cst_76 : f32 to vector<2x256xf32>
      %445 = arith.select %443, %436, %444 : vector<2x256xi1>, vector<2x256xf32>
      %446 = arith.addf %365, %445 : vector<2x256xf32>
      %cst_77 = arith.constant 0.000000e+00 : f32
      %447 = vector.broadcast %cst_77 : f32 to vector<2x256xf32>
      %c5 = arith.constant 5 : index
      %448 = memref.load %arg3[%c5] : memref<98xf32, #tpu.memory_space<smem>>
      %c54 = arith.constant 54 : index
      %449 = memref.load %arg3[%c54] : memref<98xf32, #tpu.memory_space<smem>>
      %c0_i32_78 = arith.constant 0 : i32
      %450 = vector.broadcast %c0_i32_78 : i32 to vector<2x256xi32>
      %451 = arith.cmpi eq, %40, %450 : vector<2x256xi32>
      %452 = vector.broadcast %448 : f32 to vector<2x256xf32>
      %453 = vector.broadcast %449 : f32 to vector<2x256xf32>
      %454 = arith.select %451, %452, %453 : vector<2x256xi1>, vector<2x256xf32>
      %455 = vector.extract_strided_slice %22 {offsets = [0, 5], sizes = [2, 256], strides = [1, 1]} : vector<2x358xf32> to vector<2x256xf32>
      %456 = arith.mulf %455, %454 : vector<2x256xf32>
      %457 = arith.addf %447, %456 : vector<2x256xf32>
      %c12 = arith.constant 12 : index
      %458 = memref.load %arg3[%c12] : memref<98xf32, #tpu.memory_space<smem>>
      %c61 = arith.constant 61 : index
      %459 = memref.load %arg3[%c61] : memref<98xf32, #tpu.memory_space<smem>>
      %c0_i32_79 = arith.constant 0 : i32
      %460 = vector.broadcast %c0_i32_79 : i32 to vector<2x256xi32>
      %461 = arith.cmpi eq, %40, %460 : vector<2x256xi32>
      %462 = vector.broadcast %458 : f32 to vector<2x256xf32>
      %463 = vector.broadcast %459 : f32 to vector<2x256xf32>
      %464 = arith.select %461, %462, %463 : vector<2x256xi1>, vector<2x256xf32>
      %465 = vector.extract_strided_slice %22 {offsets = [0, 21], sizes = [2, 256], strides = [1, 1]} : vector<2x358xf32> to vector<2x256xf32>
      %466 = arith.mulf %465, %464 : vector<2x256xf32>
      %467 = arith.addf %457, %466 : vector<2x256xf32>
      %c19 = arith.constant 19 : index
      %468 = memref.load %arg3[%c19] : memref<98xf32, #tpu.memory_space<smem>>
      %c68 = arith.constant 68 : index
      %469 = memref.load %arg3[%c68] : memref<98xf32, #tpu.memory_space<smem>>
      %c0_i32_80 = arith.constant 0 : i32
      %470 = vector.broadcast %c0_i32_80 : i32 to vector<2x256xi32>
      %471 = arith.cmpi eq, %40, %470 : vector<2x256xi32>
      %472 = vector.broadcast %468 : f32 to vector<2x256xf32>
      %473 = vector.broadcast %469 : f32 to vector<2x256xf32>
      %474 = arith.select %471, %472, %473 : vector<2x256xi1>, vector<2x256xf32>
      %475 = vector.extract_strided_slice %22 {offsets = [0, 37], sizes = [2, 256], strides = [1, 1]} : vector<2x358xf32> to vector<2x256xf32>
      %476 = arith.mulf %475, %474 : vector<2x256xf32>
      %477 = arith.addf %467, %476 : vector<2x256xf32>
      %c26 = arith.constant 26 : index
      %478 = memref.load %arg3[%c26] : memref<98xf32, #tpu.memory_space<smem>>
      %c75 = arith.constant 75 : index
      %479 = memref.load %arg3[%c75] : memref<98xf32, #tpu.memory_space<smem>>
      %c0_i32_81 = arith.constant 0 : i32
      %480 = vector.broadcast %c0_i32_81 : i32 to vector<2x256xi32>
      %481 = arith.cmpi eq, %40, %480 : vector<2x256xi32>
      %482 = vector.broadcast %478 : f32 to vector<2x256xf32>
      %483 = vector.broadcast %479 : f32 to vector<2x256xf32>
      %484 = arith.select %481, %482, %483 : vector<2x256xi1>, vector<2x256xf32>
      %485 = vector.extract_strided_slice %22 {offsets = [0, 53], sizes = [2, 256], strides = [1, 1]} : vector<2x358xf32> to vector<2x256xf32>
      %486 = arith.mulf %485, %484 : vector<2x256xf32>
      %487 = arith.addf %477, %486 : vector<2x256xf32>
      %c33 = arith.constant 33 : index
      %488 = memref.load %arg3[%c33] : memref<98xf32, #tpu.memory_space<smem>>
      %c82 = arith.constant 82 : index
      %489 = memref.load %arg3[%c82] : memref<98xf32, #tpu.memory_space<smem>>
      %c0_i32_82 = arith.constant 0 : i32
      %490 = vector.broadcast %c0_i32_82 : i32 to vector<2x256xi32>
      %491 = arith.cmpi eq, %40, %490 : vector<2x256xi32>
      %492 = vector.broadcast %488 : f32 to vector<2x256xf32>
      %493 = vector.broadcast %489 : f32 to vector<2x256xf32>
      %494 = arith.select %491, %492, %493 : vector<2x256xi1>, vector<2x256xf32>
      %495 = vector.extract_strided_slice %22 {offsets = [0, 69], sizes = [2, 256], strides = [1, 1]} : vector<2x358xf32> to vector<2x256xf32>
      %496 = arith.mulf %495, %494 : vector<2x256xf32>
      %497 = arith.addf %487, %496 : vector<2x256xf32>
      %c40 = arith.constant 40 : index
      %498 = memref.load %arg3[%c40] : memref<98xf32, #tpu.memory_space<smem>>
      %c89 = arith.constant 89 : index
      %499 = memref.load %arg3[%c89] : memref<98xf32, #tpu.memory_space<smem>>
      %c0_i32_83 = arith.constant 0 : i32
      %500 = vector.broadcast %c0_i32_83 : i32 to vector<2x256xi32>
      %501 = arith.cmpi eq, %40, %500 : vector<2x256xi32>
      %502 = vector.broadcast %498 : f32 to vector<2x256xf32>
      %503 = vector.broadcast %499 : f32 to vector<2x256xf32>
      %504 = arith.select %501, %502, %503 : vector<2x256xi1>, vector<2x256xf32>
      %505 = vector.extract_strided_slice %22 {offsets = [0, 85], sizes = [2, 256], strides = [1, 1]} : vector<2x358xf32> to vector<2x256xf32>
      %506 = arith.mulf %505, %504 : vector<2x256xf32>
      %507 = arith.addf %497, %506 : vector<2x256xf32>
      %c47 = arith.constant 47 : index
      %508 = memref.load %arg3[%c47] : memref<98xf32, #tpu.memory_space<smem>>
      %c96 = arith.constant 96 : index
      %509 = memref.load %arg3[%c96] : memref<98xf32, #tpu.memory_space<smem>>
      %c0_i32_84 = arith.constant 0 : i32
      %510 = vector.broadcast %c0_i32_84 : i32 to vector<2x256xi32>
      %511 = arith.cmpi eq, %40, %510 : vector<2x256xi32>
      %512 = vector.broadcast %508 : f32 to vector<2x256xf32>
      %513 = vector.broadcast %509 : f32 to vector<2x256xf32>
      %514 = arith.select %511, %512, %513 : vector<2x256xi1>, vector<2x256xf32>
      %515 = vector.extract_strided_slice %22 {offsets = [0, 101], sizes = [2, 256], strides = [1, 1]} : vector<2x358xf32> to vector<2x256xf32>
      %516 = arith.mulf %515, %514 : vector<2x256xf32>
      %517 = arith.addf %507, %516 : vector<2x256xf32>
      %c0_i32_85 = arith.constant 0 : i32
      %518 = vector.broadcast %c0_i32_85 : i32 to vector<1x256xi32>
      %519 = arith.cmpi sge, %39, %518 : vector<1x256xi32>
      %c14_i32 = arith.constant 14 : i32
      %520 = vector.broadcast %c14_i32 : i32 to vector<1x256xi32>
      %521 = arith.cmpi slt, %39, %520 : vector<1x256xi32>
      %522 = arith.andi %519, %521 : vector<1x256xi1>
      %cst_86 = arith.constant 0.000000e+00 : f32
      %523 = vector.shape_cast %522 : vector<1x256xi1> to vector<1x256xi1>
      %524 = vector.broadcast %523 : vector<1x256xi1> to vector<2x256xi1>
      %525 = vector.broadcast %cst_86 : f32 to vector<2x256xf32>
      %526 = arith.select %524, %517, %525 : vector<2x256xi1>, vector<2x256xf32>
      %527 = arith.addf %446, %526 : vector<2x256xf32>
      %cst_87 = arith.constant 0.000000e+00 : f32
      %528 = vector.broadcast %cst_87 : f32 to vector<2x256xf32>
      %c6 = arith.constant 6 : index
      %529 = memref.load %arg3[%c6] : memref<98xf32, #tpu.memory_space<smem>>
      %c55 = arith.constant 55 : index
      %530 = memref.load %arg3[%c55] : memref<98xf32, #tpu.memory_space<smem>>
      %c0_i32_88 = arith.constant 0 : i32
      %531 = vector.broadcast %c0_i32_88 : i32 to vector<2x256xi32>
      %532 = arith.cmpi eq, %40, %531 : vector<2x256xi32>
      %533 = vector.broadcast %529 : f32 to vector<2x256xf32>
      %534 = vector.broadcast %530 : f32 to vector<2x256xf32>
      %535 = arith.select %532, %533, %534 : vector<2x256xi1>, vector<2x256xf32>
      %536 = vector.extract_strided_slice %22 {offsets = [0, 6], sizes = [2, 256], strides = [1, 1]} : vector<2x358xf32> to vector<2x256xf32>
      %537 = arith.mulf %536, %535 : vector<2x256xf32>
      %538 = arith.addf %528, %537 : vector<2x256xf32>
      %c13 = arith.constant 13 : index
      %539 = memref.load %arg3[%c13] : memref<98xf32, #tpu.memory_space<smem>>
      %c62 = arith.constant 62 : index
      %540 = memref.load %arg3[%c62] : memref<98xf32, #tpu.memory_space<smem>>
      %c0_i32_89 = arith.constant 0 : i32
      %541 = vector.broadcast %c0_i32_89 : i32 to vector<2x256xi32>
      %542 = arith.cmpi eq, %40, %541 : vector<2x256xi32>
      %543 = vector.broadcast %539 : f32 to vector<2x256xf32>
      %544 = vector.broadcast %540 : f32 to vector<2x256xf32>
      %545 = arith.select %542, %543, %544 : vector<2x256xi1>, vector<2x256xf32>
      %546 = vector.extract_strided_slice %22 {offsets = [0, 22], sizes = [2, 256], strides = [1, 1]} : vector<2x358xf32> to vector<2x256xf32>
      %547 = arith.mulf %546, %545 : vector<2x256xf32>
      %548 = arith.addf %538, %547 : vector<2x256xf32>
      %c20 = arith.constant 20 : index
      %549 = memref.load %arg3[%c20] : memref<98xf32, #tpu.memory_space<smem>>
      %c69 = arith.constant 69 : index
      %550 = memref.load %arg3[%c69] : memref<98xf32, #tpu.memory_space<smem>>
      %c0_i32_90 = arith.constant 0 : i32
      %551 = vector.broadcast %c0_i32_90 : i32 to vector<2x256xi32>
      %552 = arith.cmpi eq, %40, %551 : vector<2x256xi32>
      %553 = vector.broadcast %549 : f32 to vector<2x256xf32>
      %554 = vector.broadcast %550 : f32 to vector<2x256xf32>
      %555 = arith.select %552, %553, %554 : vector<2x256xi1>, vector<2x256xf32>
      %556 = vector.extract_strided_slice %22 {offsets = [0, 38], sizes = [2, 256], strides = [1, 1]} : vector<2x358xf32> to vector<2x256xf32>
      %557 = arith.mulf %556, %555 : vector<2x256xf32>
      %558 = arith.addf %548, %557 : vector<2x256xf32>
      %c27 = arith.constant 27 : index
      %559 = memref.load %arg3[%c27] : memref<98xf32, #tpu.memory_space<smem>>
      %c76 = arith.constant 76 : index
      %560 = memref.load %arg3[%c76] : memref<98xf32, #tpu.memory_space<smem>>
      %c0_i32_91 = arith.constant 0 : i32
      %561 = vector.broadcast %c0_i32_91 : i32 to vector<2x256xi32>
      %562 = arith.cmpi eq, %40, %561 : vector<2x256xi32>
      %563 = vector.broadcast %559 : f32 to vector<2x256xf32>
      %564 = vector.broadcast %560 : f32 to vector<2x256xf32>
      %565 = arith.select %562, %563, %564 : vector<2x256xi1>, vector<2x256xf32>
      %566 = vector.extract_strided_slice %22 {offsets = [0, 54], sizes = [2, 256], strides = [1, 1]} : vector<2x358xf32> to vector<2x256xf32>
      %567 = arith.mulf %566, %565 : vector<2x256xf32>
      %568 = arith.addf %558, %567 : vector<2x256xf32>
      %c34 = arith.constant 34 : index
      %569 = memref.load %arg3[%c34] : memref<98xf32, #tpu.memory_space<smem>>
      %c83 = arith.constant 83 : index
      %570 = memref.load %arg3[%c83] : memref<98xf32, #tpu.memory_space<smem>>
      %c0_i32_92 = arith.constant 0 : i32
      %571 = vector.broadcast %c0_i32_92 : i32 to vector<2x256xi32>
      %572 = arith.cmpi eq, %40, %571 : vector<2x256xi32>
      %573 = vector.broadcast %569 : f32 to vector<2x256xf32>
      %574 = vector.broadcast %570 : f32 to vector<2x256xf32>
      %575 = arith.select %572, %573, %574 : vector<2x256xi1>, vector<2x256xf32>
      %576 = vector.extract_strided_slice %22 {offsets = [0, 70], sizes = [2, 256], strides = [1, 1]} : vector<2x358xf32> to vector<2x256xf32>
      %577 = arith.mulf %576, %575 : vector<2x256xf32>
      %578 = arith.addf %568, %577 : vector<2x256xf32>
      %c41 = arith.constant 41 : index
      %579 = memref.load %arg3[%c41] : memref<98xf32, #tpu.memory_space<smem>>
      %c90 = arith.constant 90 : index
      %580 = memref.load %arg3[%c90] : memref<98xf32, #tpu.memory_space<smem>>
      %c0_i32_93 = arith.constant 0 : i32
      %581 = vector.broadcast %c0_i32_93 : i32 to vector<2x256xi32>
      %582 = arith.cmpi eq, %40, %581 : vector<2x256xi32>
      %583 = vector.broadcast %579 : f32 to vector<2x256xf32>
      %584 = vector.broadcast %580 : f32 to vector<2x256xf32>
      %585 = arith.select %582, %583, %584 : vector<2x256xi1>, vector<2x256xf32>
      %586 = vector.extract_strided_slice %22 {offsets = [0, 86], sizes = [2, 256], strides = [1, 1]} : vector<2x358xf32> to vector<2x256xf32>
      %587 = arith.mulf %586, %585 : vector<2x256xf32>
      %588 = arith.addf %578, %587 : vector<2x256xf32>
      %c48 = arith.constant 48 : index
      %589 = memref.load %arg3[%c48] : memref<98xf32, #tpu.memory_space<smem>>
      %c97 = arith.constant 97 : index
      %590 = memref.load %arg3[%c97] : memref<98xf32, #tpu.memory_space<smem>>
      %c0_i32_94 = arith.constant 0 : i32
      %591 = vector.broadcast %c0_i32_94 : i32 to vector<2x256xi32>
      %592 = arith.cmpi eq, %40, %591 : vector<2x256xi32>
      %593 = vector.broadcast %589 : f32 to vector<2x256xf32>
      %594 = vector.broadcast %590 : f32 to vector<2x256xf32>
      %595 = arith.select %592, %593, %594 : vector<2x256xi1>, vector<2x256xf32>
      %596 = vector.extract_strided_slice %22 {offsets = [0, 102], sizes = [2, 256], strides = [1, 1]} : vector<2x358xf32> to vector<2x256xf32>
      %597 = arith.mulf %596, %595 : vector<2x256xf32>
      %598 = arith.addf %588, %597 : vector<2x256xf32>
      %c0_i32_95 = arith.constant 0 : i32
      %599 = vector.broadcast %c0_i32_95 : i32 to vector<1x256xi32>
      %600 = arith.cmpi sge, %39, %599 : vector<1x256xi32>
      %c13_i32 = arith.constant 13 : i32
      %601 = vector.broadcast %c13_i32 : i32 to vector<1x256xi32>
      %602 = arith.cmpi slt, %39, %601 : vector<1x256xi32>
      %603 = arith.andi %600, %602 : vector<1x256xi1>
      %cst_96 = arith.constant 0.000000e+00 : f32
      %604 = vector.shape_cast %603 : vector<1x256xi1> to vector<1x256xi1>
      %605 = vector.broadcast %604 : vector<1x256xi1> to vector<2x256xi1>
      %606 = vector.broadcast %cst_96 : f32 to vector<2x256xf32>
      %607 = arith.select %605, %598, %606 : vector<2x256xi1>, vector<2x256xf32>
      %608 = arith.addf %527, %607 : vector<2x256xf32>
      %609 = vector.extract_strided_slice %608 {offsets = [0, 0], sizes = [1, 256], strides = [1, 1]} : vector<2x256xf32> to vector<1x256xf32>
      %610 = vector.extract_strided_slice %608 {offsets = [1, 0], sizes = [1, 256], strides = [1, 1]} : vector<2x256xf32> to vector<1x256xf32>
      %611 = arith.addf %609, %610 : vector<1x256xf32>
      %612 = arith.negf %611 : vector<1x256xf32>
      %613 = math.exp %612 : vector<1x256xf32>
      %cst_97 = arith.constant 1.000000e+00 : f32
      %614 = vector.broadcast %cst_97 : f32 to vector<1x256xf32>
      %615 = arith.addf %614, %613 : vector<1x256xf32>
      %616 = arith.divf %614, %615 : vector<1x256xf32>
      %c0_98 = arith.constant 0 : index
      %c0_99 = arith.constant 0 : index
      %c0_100 = arith.constant 0 : index
      %617 = vector.load %arg4[%c0_98, %c0_99, %c0_100] : memref<1x1x256xf32, #tpu.memory_space<vmem>>, vector<1x1x256xf32>
      %618 = vector.shape_cast %617 : vector<1x1x256xf32> to vector<1x256xf32>
      %619 = vector.shape_cast %616 : vector<1x256xf32> to vector<1x1x256xf32>
      tpu.vector_store %arg4[%c0_98, %c0_99, %c0_100], %619 {strides = array<i32>} : memref<1x1x256xf32, #tpu.memory_space<vmem>>, vector<1x1x256xf32>,
    } else {
    }
    return
  }
  func.func @transform_0(%arg0: i32, %arg1: i32) -> (i32, i32, i32) {
    %c0_i32 = arith.constant 0 : i32
    %c0_i32_0 = arith.constant 0 : i32
    return %arg0, %arg1, %c0_i32 : i32, i32, i32
  }
  func.func @transform_1(%arg0: i32, %arg1: i32) -> i32 {
    %c0_i32 = arith.constant 0 : i32
    %c0_i32_0 = arith.constant 0 : i32
    return %c0_i32 : i32
  }
  func.func @transform_2(%arg0: i32, %arg1: i32) -> (i32, i32, i32) {
    %c0_i32 = arith.constant 0 : i32
    %c0_i32_0 = arith.constant 0 : i32
    %c0_i32_1 = arith.constant 0 : i32
    return %arg0, %c0_i32, %c0_i32_0 : i32, i32, i32
  }
}

</mosaic_0001>

<bundles_post_ra>
// kernel: tpu_custom_call.1
= control target key start
LH: loop header
LB: loop body
LE: loop exit
PB: predicated region body
PF: predicated region fallthrough
CT: control target
= control target key end

     0   :  { %s3915_s0 = inlined_call_operand.hbm [shape: f32[2,4,256], index: 0, kind: input, shape index: {}]   ;;  %s3916_s1 = inlined_call_operand.vmem [shape: f32[98], index: 1, kind: input, shape index: {}]   ;;  %s3917_s2 = inlined_call_operand.hbm [shape: f32[2,1,256], index: 2, kind: output, shape index: {}]  }
   0x1   :  { %3955 = sst [smem:[#allocation100_spill]] %s3915_s0 }
   0x2   :  { %3956 = sst [smem:[#allocation101_spill]] %s3916_s1 }
   0x3   :  { %3957 = sst [smem:[#allocation102_spill]] %s3917_s2 }
   0x4   :  { %7 = vsyncpa [#allocation5], 0 }
   0x5   :  { %9 = vsyncpa [#allocation5 + $0x1], 0 }
   0x6   :  { %10 = vsyncpa [#allocation7], 0 }
   0x7   :  { %11 = vsyncpa [#allocation6], 0 }
   0x8   :  { %13 = vsyncpa [#allocation6 + $0x1], 0  ;;  %s2108_s9 = smov 0   ;;  %s2110_s10 = smov 0  }
   0x9   :  { %s2112_s11 = smov 0   ;;  %s2114_s12 = smov 0  }
   0xa   :  { %s2116_s13 = smov 0   ;;  %s2118_s14 = smov 0  }
   0xb LB: > { %3958 = sst [smem:[#allocation13_spill]] %s2054_s9  ;;  %s1729_s15 = sadd.s32 4294967295, %s2074_s14   ;;  %s2074_s14 = sphi %s2118_s14, %s19_s14   ;;  %s2070_s13 = sphi %s2116_s13, %s4198_s13   ;;  %s2066_s12 = sphi %s2114_s12, %s4197_s12   ;;  %s2062_s11 = sphi %s2112_s11, %s4196_s11   ;;  %s2058_s10 = sphi %s2110_s10, %s4195_s10   ;;  %s2054_s9 = sphi %s2108_s9, %s4194_s9  }
   0xc   : > { %3959 = sst [smem:[#allocation14_spill]] %s2058_s10  ;;  %s1730_s16 = sadd.s32 4294967294, %s2074_s14  }
   0xd   : > { %3960 = sst [smem:[#allocation15_spill]] %s2062_s11  ;;  %p53_p0 = scmp.ne.s32.totalorder %s2058_s10, %s2054_s9 }
   0xe   : > { %3961 = sst [smem:[#allocation16_spill]] %s2066_s12  ;;  %p2142_p1 = scmp.eq.s32.totalorder %s1729_s15, 0 }
   0xf   : > { %3962 = sst [smem:[#allocation17_spill]] %s2070_s13  ;;  %p2146_p2 = scmp.eq.s32.totalorder %s1729_s15, 1 }
  0x10   : > { %3963 = sst [smem:[#allocation18_spill]] %s2074_s14  ;;  %p104_p3 = scmp.eq.s32.totalorder %s1730_s16, 1 }
  0x11   : > { %s3964_s17 = scalar_select %p2142_p1, 1, 0 }
  0x12   : > { %p2152_p4 = por %p2142_p1, %p53_p0  ;;  %p1731_p5 = scmp.ge.s32.totalorder %s2074_s14, 1 }
  0x13   : > { %p2157_p6 = por %p104_p3, %p53_p0  ;;  %p111_p7 = scmp.lt.s32.totalorder %s2074_s14, 3 }
  0x14   : > { %s3966_s19 = scalar_select %p2152_p4, 1, 0 }
  0x15   : > { %s3967_s20 = scalar_select %p2157_p6, 1, 0 }
  0x16   : > { %s3969_s1 = sld [smem:[#allocation101_spill]]  ;;  %p2165_p8 = pnand %p1731_p5, %p111_p7 }
  0x17   : > { %3968 = sst [smem:[#allocation19_spill]] %s3967_s20  ;;  %s31_s26 = sadd.s32 1, %s2070_s13 }
  0x18   : > { %p1855_p10 = pneg %p2165_p8  ;;  %s40_s27 = sadd.s32 1, %s2062_s11 }
  0x19   : > { %p33_p12 = scmp.ge.s32.totalorder %s31_s26, 2 }
  0x1a   : > { %p2174_p11 = pnand %p1855_p10, %p2142_p1 }
  0x1c   : > { %s124_s23 = sshll.u32 %s3969_s1, 4  ;;  %p1945_p0 = pneg %p2174_p11  ;;  %s125_s23 = int_to_ptr.vmem [resolvable:$true] %s124_s23 }
  0x1d   : > { %s1943_s28 = scalar_lea.vmem %s125_s23, 16  ;;  %p1951_p7 = scmp.lt.s32.totalorder %s125_s23, %s125_s23 }
  0x1e   : > { %p1944_p13 = scmp.ne.s32.totalorder %s125_s23, %s1943_s28  ;;  %p1952_p6 = scmp.lt.s32.totalorder %s1943_s28, %s1943_s28 }
  0x20   : > { %p1946_p3 = pnand %p1945_p0, %p1944_p13  ;;  %p1953_p9 = por %p1952_p6, %p1951_p7 }
  0x22   : > { %p1947_p5 = pneg %p1946_p3 }
  0x24   : > { %p1954_p4 = pnand %p1953_p9, %p1947_p5 }
  0x26   : > { %1957 = shalt.err (!%p1954_p4)
}
  0x27   : > { %s2076_s29 = smov [#allocation8]   ;;  %s4200_s26 = smov (%p33_p12, %s31_s26), 0 }
  0x28   : > { %1858 = dma.vmem_to_smem (!%p2174_p11), %s125_s23, 16, %s2076_s29, [#allocation7]  }
  0x29   : > { %3972 = sst [smem:[#allocation20_spill]] %s4200_s26  ;;  %p47_p10 = scmp.ne.s32.totalorder %s2062_s11, %s2058_s10 }
  0x2a   : > { %p48_p6 = scmp.eq.s32.totalorder %s2074_s14, 0  ;;  %s35_s30 = ssub.s32 %s2070_s13, %s4200_s26 }
  0x2b   : > { %p1868_p4 = scmp.lt.s32.totalorder %s2074_s14, 2  ;;  %p38_p9 = scmp.eq.s32.totalorder %s35_s30, 0 }
  0x2c   : > { %p49_p13 = por %p48_p6, %p47_p10  ;;  %p2194_p0 = por %p2146_p2, %p47_p10 }
  0x2d   : > { %s135_s4 = sand.u32 1, %s2062_s11   ;;  %s1845_s7 = sshll.u32 %s2070_s13, 7 }
  0x2e   : > { %s3973_s3 = scalar_select %p2194_p0, 1, 0 }
  0x2f   : > { %s2200_s5 = scalar_select %p38_p9, %s2062_s11, %s40_s27  }
  0x30   : > { %3974 = sst [smem:[#allocation21_spill]] %s3973_s3  ;;  %s1734_s6 = sshll.u32 %s135_s4, 3 }
  0x31   : > { %3975 = sst [smem:[#allocation22_spill]] %s2200_s5  ;;  %s3976_s0 = sld [smem:[#allocation100_spill]] }
  0x32   : > { %s139_s21 = scalar_lea.vmem [#allocation4], %s1734_s6  ;;  %p2210_p2 = pnand %p1868_p4, %p49_p13 }
  0x33   : > { %s149_s18 = sshll.u32 %s139_s21, 4  ;;  %s136_s23 = scalar_lea.sflag [#allocation5], %s135_s4  ;;  %s2208_s18 = int_to_ptr.vmem [resolvable:$true] %s149_s18 }
  0x34   : > { %p1960_p12 = pneg %p2210_p2 }
  0x37   : > { %s2206_s16 = scalar_lea.hbm %s3976_s0, %s1845_s7  ;;  %s1963_s29 = scalar_lea.hbm %s3976_s0, 256 }
  0x38   : > { %s1958_s25 = scalar_lea.hbm %s2206_s16, 128  ;;  %p1964_p7 = scmp.lt.u32.totalorder %s2206_s16, %s3976_s0 }
  0x39   : > { %p1959_p11 = scmp.ne.s32.totalorder %s2206_s16, %s1958_s25  ;;  %p1965_p10 = scmp.lt.u32.totalorder %s1963_s29, %s1958_s25 }
  0x3a   : > { %p1967_p4 = scmp.lt.u32.totalorder %s1958_s25, %s2206_s16 }
  0x3b   : > { %p1961_p3 = pnand %p1960_p12, %p1959_p11  ;;  %p1966_p6 = por %p1965_p10, %p1964_p7 }
  0x3d   : > { %p1962_p5 = pneg %p1961_p3  ;;  %p1968_p9 = por %p1967_p4, %p1966_p6 }
  0x3f   : > { %p1969_p13 = pnand %p1968_p9, %p1962_p5 }
  0x41   : > { %1972 = shalt.err (!%p1969_p13)
}
  0x42   : > { %s1973_s4 = scalar_lea.vmem %s2208_s18, 128  ;;  %s2077_s7 = smov [#allocation4]  }
  0x43   : > { %p1974_p11 = scmp.ne.s32.totalorder %s2208_s18, %s1973_s4  ;;  %s1978_s8 = sshll.u32 %s2077_s7, 4  ;;  %s1979_s8 = int_to_ptr.vmem [resolvable:$false] %s1978_s8 }
  0x44   : > { %s1980_s15 = scalar_lea.vmem %s1979_s8, 256  ;;  %p1981_p1 = scmp.lt.s32.totalorder %s2208_s18, %s1979_s8 }
  0x45   : > { %p1976_p3 = pnand %p1974_p11, %p1960_p12  ;;  %p1982_p7 = scmp.lt.s32.totalorder %s1980_s15, %s1973_s4 }
  0x47   : > { %p1977_p0 = pneg %p1976_p3  ;;  %p1983_p10 = por %p1982_p7, %p1981_p1 }
  0x49   : > { %p1984_p6 = pnand %p1983_p10, %p1977_p0 }
  0x4b   : > { %1987 = shalt.err (!%p1984_p6)
}
  0x4c   : > { %1862 = dma.hbm_to_vmem [thread:$0]  (!%p2210_p2), %s2206_s16, 128, %s2208_s18, %s136_s23  }
  0x4d   : > { %158 = sbr.rel (%p2165_p8) target bundleno = 770 (0x302), region = 28 }
  0x54   : > { %s2242_s21 = sand.u32 1, %s2058_s10   ;;  %p3979_p1 = scmp.ne.s32.totalorder %s3966_s19, 0 }
  0x55   : > { %3978 = sst [smem:[#allocation23_spill]] %s2242_s21  ;;  %s1738_s25 = sshll.u32 %s2242_s21, 3 }
  0x56   : > { %s161_s27 = scalar_lea.sflag [#allocation5], %s2242_s21  ;;  %s164_s28 = scalar_lea.vmem [#allocation4], %s1738_s25 }
  0x57   : > { %2041 = dma.done.wait (%p3979_p1), %s161_s27, 128  }
  0x58   : > { %2043 = vsyncadd (%p3979_p1), %s161_s27, 4294967168  ;;  %p3980_p0 = scmp.ne.s32.totalorder %s3964_s17, 0 }
  0x5a   : > { %2045 = dma.done.wait (%p3980_p0), [#allocation7], 16  }
  0x5b   : > { %2047 = vsyncadd (%p3980_p0), [#allocation7], 4294967280 }
  0x5c   : > { %173 = sfence }
  0x5d   : > { %v196_v0 = vld [vmem:[%s164_s28] sm:$0xff]  ;;  %vm210_vm0 = vcmask 1043456   ;;  %vm243_vm1 = vcmask 1040384   ;;  %s2078_s17 = smov 51   ;;  %s2254_s19 = sld [smem:[#allocation8 + $0x7]]  ;;  %v3935_v32 = vlaneseq  ;;  %vm252_vm3 = vcmask 416768  }
  0x5e   : > { %v211_v1 = vsel %vm210_vm0, %v196_v0, 0.0  ;;  %v229_v2 = vsel %vm210_vm0, %v196_v0, -inf  ;;  %v208_v3 = vcombine.high %v196_v0, %v196_v0  ;;  %s2256_s24 = sld [smem:[#allocation8 + $0x38]]  ;;  %s2258_s16 = sld [smem:[#allocation8 + $0x15]]  ;;  %vm315_vm4 = vcmask 916480  }
  0x5f   : > { %v212_v4 = vrot.slane %v211_v1, 4  ;;  %v230_v5 = vrot.slane %v229_v2, 4  ;;  %s2260_s18 = sld [smem:[#allocation8 + $0x46]]  ;;  %s2264_s23 = sld [smem:[#allocation8 + $0x3f]]  ;;  %v2315_v33 = vshrl.u32 %v3935_v32, 7  ;;  %vm339_vm5 = vcmask 785408  }
  0x60   : > { %v218_v6 = vsel %vm210_vm0, %v208_v3, 0.0  ;;  %v236_v7 = vsel %vm210_vm0, %v208_v3, -inf  ;;  %s2262_s22 = sld [smem:[#allocation8 + $0xe]]  ;;  %s2266_s29 = sld [smem:[#allocation8 + $0x23]]  ;;  %vm363_vm6 = vcmask 654336   ;;  %vm387_vm7 = vcmask 523264  }
  0x61   : > { %v213_v8 = vadd.f32 %v212_v4, %v211_v1  ;;  %v231_v9 = vmax.f32 %v229_v2, %v230_v5  ;;  %v219_v10 = vrot.slane %v218_v6, 4  ;;  %v237_v11 = vrot.slane %v236_v7, 4  ;;  %s2268_s30 = sld [smem:[#allocation8 + $0x54]]  ;;  %s2272_s4 = sld [smem:[#allocation8 + $0x4d]]  ;;  %3988 = vst [vmem:[#allocation31_spill] sm:$0xff] %v2315_v33 }
  0x62   : > { %s2270_s6 = sld [smem:[#allocation8 + $0x1c]]  ;;  %s2274_s7 = sld [smem:[#allocation8 + $0x8]]  ;;  %vm290_vm2 = vcmp.eq.s32.totalorder %v2315_v33, 0  ;;  %vm411_vm8 = vcmask 392192   ;;  %vm435_vm9 = vcmask 261120   ;;  %vm634_vm10 = vcmask 1039360  }
  0x63   : > { %v214_v12 = vrot.slane %v213_v8, 2  ;;  %v232_v13 = vrot.slane %v231_v9, 2  ;;  %v220_v14 = vadd.f32 %v219_v10, %v218_v6  ;;  %v238_v15 = vmax.f32 %v236_v7, %v237_v11  ;;  %s2276_s8 = sld [smem:[#allocation8 + $0x39]]  ;;  %s2278_s15 = sld [smem:[#allocation8 + $0x2a]] }
  0x64   : > { %s2280_s25 = sld [smem:[#allocation8 + $0x5b]]  ;;  %s2282_s27 = sld [smem:[#allocation8 + $0x16]]  ;;  %v300_v34 = vstv %s2254_s19  ;;  %v301_v35 = vstv %s2256_s24  ;;  %v348_v36 = vstv %s2258_s16  ;;  %vm821_vm11 = vcmask 1031168  }
  0x65   : > { %v215_v16 = vadd.f32 %v214_v12, %v213_v8  ;;  %v233_v17 = vmax.f32 %v231_v9, %v232_v13  ;;  %v221_v18 = vrot.slane %v220_v14, 2  ;;  %v239_v19 = vrot.slane %v238_v15, 2  ;;  %s2284_s28 = sld [smem:[#allocation8 + $0x47]]  ;;  %s2288_s0 = sld [smem:[#allocation8 + $0x40]] }
  0x66   : > { %s2290_s1 = sld [smem:[#allocation8 + $0x24]]  ;;  %s2292_s26 = sld [smem:[#allocation8 + $0x55]]  ;;  %v349_v37 = vstv %s2260_s18  ;;  %v324_v38 = vstv %s2262_s22  ;;  %v325_v39 = vstv %s2264_s23  ;;  %v396_v40 = vstv %s2266_s29 }
  0x67   : > { %v216_v20 = vrot.slane %v215_v16, 1  ;;  %v234_v21 = vrot.slane %v233_v17, 1  ;;  %v222_v22 = vadd.f32 %v221_v18, %v220_v14  ;;  %v240_v23 = vmax.f32 %v238_v15, %v239_v19  ;;  %s2294_s13 = sld [smem:[#allocation8 + $0x1d]]  ;;  %s2296_s5 = sld [smem:[#allocation8 + $0x4e]] }
  0x68   : > { %s2298_s11 = sld [smem:[#allocation8 + $0x10]]  ;;  %s2300_s10 = sld [smem:[#allocation8 + $0x41]]  ;;  %v397_v41 = vstv %s2268_s30  ;;  %v372_v42 = vstv %s2270_s6  ;;  %v373_v43 = vstv %s2272_s4  ;;  %v2362_v44 = vsel %vm290_vm2, %v300_v34, %v301_v35 }
  0x69   : > { %v217_v24 = vadd.f32 %v216_v20, %v215_v16  ;;  %v235_v25 = vmax.f32 %v233_v17, %v234_v21  ;;  %v223_v26 = vrot.slane %v222_v22, 1  ;;  %v241_v27 = vrot.slane %v240_v23, 1  ;;  %s2302_s14 = sld [smem:[#allocation8 + $0x2b]]  ;;  %s2304_s20 = sld [smem:[#allocation8 + $0x5c]]  ;;  %3995 = vst [vmem:[#allocation38_spill] sm:$0xff] %v2362_v44 }
  0x6a   : > { %s2306_s9 = sld [smem:[#allocation8 + $0x1e]]  ;;  %s2308_s2 = sld [smem:[#allocation8 + $0x4f]]  ;;  %v2366_v45 = vsel %vm290_vm2, %v348_v36, %v349_v37  ;;  %v2370_v46 = vsel %vm290_vm2, %v324_v38, %v325_v39  ;;  %v2378_v47 = vsel %vm290_vm2, %v396_v40, %v397_v41  ;;  %v2382_v48 = vsel %vm290_vm2, %v372_v42, %v373_v43 }
  0x6b   : > { %v244_v28 = vsel %vm243_vm1, %v217_v24, %v235_v25  ;;  %v224_v29 = vadd.f32 %v223_v26, %v222_v22  ;;  %v242_v30 = vmax.f32 %v240_v23, %v241_v27  ;;  %s2310_s3 = sld [smem:[#allocation8 + $0x9]]  ;;  %s2312_s12 = sld [smem:[#allocation8 + $0x3a]]  ;;  %3996 = vst [vmem:[#allocation39_spill] sm:$0xff] %v2366_v45  ;;  %3997 = vst [vmem:[#allocation40_spill] sm:$0xff] %v2370_v46  ;;  %v469_v49 = vstv %s2274_s7 }
  0x6c   : > { %248 = vrot.lane.b32.xlu0 %v244_v28, %s2078_s17  ;;  %s2317_s21 = sld [smem:[#allocation8 + $0x2c]]  ;;  %s2352_s19 = sld [smem:[#allocation8 + $0x11]]  ;;  %4000 = vst [vmem:[#allocation43_spill] sm:$0xff] %v2378_v47  ;;  %v470_v50 = vstv %s2276_s8  ;;  %v420_v51 = vstv %s2278_s15  ;;  %v421_v52 = vstv %s2280_s25  ;;  %vm1195_vm0 = vcmask 1014784  }
  0x6d   : > { %v245_v31 = vsel %vm243_vm1, %v224_v29, %v242_v30  ;;  %s2354_s24 = sld [smem:[#allocation8 + $0x42]]  ;;  %s2356_s16 = sld [smem:[#allocation8 + $0xc]]  ;;  %v519_v53 = vstv %s2282_s27  ;;  %v520_v54 = vstv %s2284_s28  ;;  %v495_v56 = vstv %s2288_s0 }
  0x6e   : > { %3981 = sst [smem:[#allocation24_spill]] %s2300_s10  ;;  %s2331_s10 = sld [smem:[#allocation8 + $0x56]]  ;;  %v569_v57 = vstv %s2290_s1  ;;  %v570_v58 = vstv %s2292_s26  ;;  %v544_v59 = vstv %s2294_s13  ;;  %v545_v60 = vstv %s2296_s5 }
  0x6f   : > { %3982 = sst [smem:[#allocation25_spill]] %s2302_s14  ;;  %s2319_s14 = sld [smem:[#allocation8 + $0x5d]]  ;;  %v681_v61 = vstv %s2298_s11  ;;  %v2424_v3 = vsel %vm290_vm2, %v469_v49, %v470_v50  ;;  %v2428_v4 = vsel %vm290_vm2, %v420_v51, %v421_v52  ;;  %v2438_v7 = vsel %vm290_vm2, %v519_v53, %v520_v54 }
  0x70   : > { %250 = vrot.lane.b32.xlu0 %v245_v31, %s2078_s17  ;;  %s2286_s17 = sld [smem:[#allocation8 + $0xf]]  ;;  %3983 = sst [smem:[#allocation26_spill]] %s2304_s20  ;;  %v2446_v9 = vsel %vm290_vm2, %v569_v57, %v570_v58  ;;  %v2450_v10 = vsel %vm290_vm2, %v544_v59, %v545_v60 }
  0x71   : > { %3984 = sst [smem:[#allocation27_spill]] %s2306_s9  ;;  %s2321_s20 = sld [smem:[#allocation8 + $0x17]] }
  0x72   : > { %3985 = sst [smem:[#allocation28_spill]] %s2308_s2  ;;  %s2323_s9 = sld [smem:[#allocation8 + $0x48]]  ;;  %v781_v14 = vstv %s2317_s21  ;;  %v868_v27 = vstv %s2352_s19 }
  0x73   : > { %3986 = sst [smem:[#allocation29_spill]] %s2310_s3  ;;  %s2325_s2 = sld [smem:[#allocation8 + $0xb]]  ;;  %v869_v28 = vstv %s2354_s24 }
  0x74   : > { %3987 = sst [smem:[#allocation30_spill]] %s2312_s12  ;;  %s2327_s3 = sld [smem:[#allocation8 + $0x3c]]  ;;  %v757_v22 = vstv %s2331_s10  ;;  %v2546_v43 = vsel %vm290_vm2, %v868_v27, %v869_v28 }
  0x75   : > { %3989 = sst [smem:[#allocation32_spill]] %s2319_s14  ;;  %s2329_s12 = sld [smem:[#allocation8 + $0x25]] }
  0x76   : > { %s2336_s14 = sld [smem:[#allocation8 + $0x12]]  ;;  %3993 = sst [smem:[#allocation36_spill]] %s2356_s16  ;;  %v494_v55 = vstv %s2286_s17 }
  0x77   : > { %3990 = sst [smem:[#allocation33_spill]] %s2321_s20  ;;  %s2358_s18 = sld [smem:[#allocation8 + $0x3d]]  ;;  %v2442_v8 = vsel %vm290_vm2, %v494_v55, %v495_v56 }
  0x78   : > { %s2338_s20 = sld [smem:[#allocation8 + $0x43]]  ;;  %s2372_s22 = sld [smem:[#allocation8 + $0x18]]  ;;  %v707_v18 = vstv %s2323_s9 }
  0x79   : > { %3991 = sst [smem:[#allocation34_spill]] %s2325_s2  ;;  %s2344_s2 = sld [smem:[#allocation8 + $0xa]] }
  0x7a   : > { %3992 = sst [smem:[#allocation35_spill]] %s2327_s3  ;;  %s2346_s3 = sld [smem:[#allocation8 + $0x3b]] }
  0x7b   : > { %s2374_s23 = sld [smem:[#allocation8 + $0x49]]  ;;  %s2388_s30 = sld [smem:[#allocation8 + $0x4a]]  ;;  %v756_v21 = vstv %s2329_s12 }
  0x7c   : > { %s2386_s29 = sld [smem:[#allocation8 + $0x19]]  ;;  %s4003_s6 = sld [smem:[#allocation24_spill]]  ;;  %v1055_v23 = vstv %s2336_s14  ;;  %v2530_v40 = vsel %vm290_vm2, %v756_v21, %v757_v22 }
  0x7d   : > { %3994 = sst [smem:[#allocation37_spill]] %s2358_s18  ;;  %s4004_s4 = sld [smem:[#allocation25_spill]] }
  0x7e   : > { %3998 = sst [smem:[#allocation41_spill]] %s2372_s22  ;;  %s2394_s22 = sld [smem:[#allocation8 + $0x13]]  ;;  %v1056_v24 = vstv %s2338_s20 }
  0x7f   : > { %s4006_s18 = sld [smem:[#allocation27_spill]]  ;;  %s2396_s16 = sld [smem:[#allocation8 + $0x44]]  ;;  %v843_v25 = vstv %s2344_s2  ;;  %v2538_v41 = vsel %vm290_vm2, %v1055_v23, %v1056_v24 }
  0x80   : > { %s4007_s7 = sld [smem:[#allocation28_spill]]  ;;  %s2402_s8 = sld [smem:[#allocation8 + $0xd]]  ;;  %v844_v26 = vstv %s2346_s3 }
  0x81   : > { %3999 = sst [smem:[#allocation42_spill]] %s2374_s23  ;;  %s4005_s23 = sld [smem:[#allocation26_spill]]  ;;  %v2542_v42 = vsel %vm290_vm2, %v843_v25, %v844_v26 }
  0x82   : > { %4001 = sst [smem:[#allocation44_spill]] %s2386_s29  ;;  %s2404_s29 = sld [smem:[#allocation8 + $0x3e]]  ;;  %v682_v62 = vstv %s4003_s6 }
  0x83   : > { %4002 = sst [smem:[#allocation45_spill]] %s2388_s30  ;;  %s4008_s30 = sld [smem:[#allocation29_spill]]  ;;  %v594_v63 = vstv %s4004_s4  ;;  %v2458_v11 = vsel %vm290_vm2, %v681_v61, %v682_v62 }
  0x84   : > { %s4009_s15 = sld [smem:[#allocation30_spill]]  ;;  %s2410_s25 = sld [smem:[#allocation8 + $0x1f]]  ;;  %4016 = vst [vmem:[#allocation46_spill] sm:$0xff] %v2458_v11  ;;  %v1242_v52 = vstv %s2394_s22 }
  0x85   : > { %s2412_s27 = sld [smem:[#allocation8 + $0x50]]  ;;  %v731_v1 = vstv %s4006_s18  ;;  %s2420_s1 = sld [smem:[#allocation8 + $0x31]]  ;;  %v1243_v53 = vstv %s2396_s16 }
  0x86   : > { %v732_v2 = vstv %s4007_s7  ;;  %s2418_s0 = sld [smem:[#allocation8]]  ;;  %s4010_s11 = sld [smem:[#allocation32_spill]]  ;;  %v1404_v54 = vstv %s2402_s8 }
  0x87   : > { %v595_v0 = vstv %s4005_s23  ;;  %s2432_s13 = sld [smem:[#allocation8 + $0x20]]  ;;  %s4011_s26 = sld [smem:[#allocation33_spill]]  ;;  %v2466_v13 = vsel %vm290_vm2, %v731_v1, %v732_v2 }
  0x88   : > { %s2434_s5 = sld [smem:[#allocation8 + $0x51]]  ;;  %s4012_s28 = sld [smem:[#allocation34_spill]]  ;;  %v2462_v12 = vsel %vm290_vm2, %v594_v63, %v595_v0  ;;  %v1405_v55 = vstv %s2404_s29 }
  0x89   : > { %v656_v5 = vstv %s4008_s30  ;;  %s4013_s17 = sld [smem:[#allocation35_spill]]  ;;  %s2452_s18 = sld [smem:[#allocation8 + $0x1a]]  ;;  %v2616_v21 = vsel %vm290_vm2, %v1404_v54, %v1405_v55 }
  0x8a   : > { %v657_v6 = vstv %s4009_s15  ;;  %s2454_s23 = sld [smem:[#allocation8 + $0x4b]]  ;;  %s2469_s30 = sld [smem:[#allocation8 + $0x14]]  ;;  %v918_v56 = vstv %s2410_s25 }
  0x8b   : > { %s2471_s6 = sld [smem:[#allocation8 + $0x45]]  ;;  %v2475_v15 = vsel %vm290_vm2, %v656_v5, %v657_v6  ;;  %s2480_s4 = sld [smem:[#allocation8 + $0x1]]  ;;  %v919_v57 = vstv %s2412_s27  ;;  %v292_v59 = vstv %s2420_s1 }
  0x8c   : > { %v782_v16 = vstv %s4010_s11  ;;  %s4019_s7 = sld [smem:[#allocation36_spill]]  ;;  %s2482_s21 = sld [smem:[#allocation8 + $0x32]]  ;;  %v291_v58 = vstv %s2418_s0  ;;  %v2620_v22 = vsel %vm290_vm2, %v918_v56, %v919_v57 }
  0x8d   : > { %v706_v17 = vstv %s4011_s26  ;;  %s4021_s15 = sld [smem:[#allocation37_spill]]  ;;  %s4025_s26 = sld [smem:[#allocation45_spill]]  ;;  %v2518_v37 = vsel %vm290_vm2, %v781_v14, %v782_v16  ;;  %v1105_v60 = vstv %s2432_s13  ;;  %v2624_v23 = vsel %vm290_vm2, %v291_v58, %v292_v59 }
  0x8e   : > { %v1030_v19 = vstv %s4012_s28  ;;  %s2490_s11 = sld [smem:[#allocation8 + $0x57]]  ;;  %s2504_s10 = sld [smem:[#allocation8 + $0x21]]  ;;  %v2522_v38 = vsel %vm290_vm2, %v706_v17, %v707_v18  ;;  %v1106_v61 = vstv %s2434_s5 }
  0x8f   : > { %4014 = sst [smem:[#allocation24_spill]] %s2452_s18  ;;  %v1031_v20 = vstv %s4013_s17  ;;  %s4024_s18 = sld [smem:[#allocation44_spill]]  ;;  %4026 = vst [vmem:[#allocation47_spill] sm:$0xff] %v2522_v38  ;;  %v2632_v24 = vsel %vm290_vm2, %v1105_v60, %v1106_v61 }
  0x90   : > { %4015 = sst [smem:[#allocation25_spill]] %s2454_s23  ;;  %s2488_s23 = sld [smem:[#allocation8 + $0x26]]  ;;  %v2526_v39 = vsel %vm290_vm2, %v1030_v19, %v1031_v20  ;;  %v2612_v20 = vsel %vm290_vm2, %v1242_v52, %v1243_v53 }
  0x91   : > { %4017 = sst [smem:[#allocation26_spill]] %s2469_s30  ;;  %s4023_s30 = sld [smem:[#allocation42_spill]]  ;;  %v458_v2 = vstv %s2480_s4 }
  0x92   : > { %4018 = sst [smem:[#allocation27_spill]] %s2471_s6  ;;  %s4022_s6 = sld [smem:[#allocation41_spill]]  ;;  %v1217_v29 = vstv %s4019_s7 }
  0x93   : > { %4020 = sst [smem:[#allocation28_spill]] %s2482_s21  ;;  %s2498_s21 = sld [smem:[#allocation8 + $0x58]]  ;;  %v1218_v30 = vstv %s4021_s15  ;;  %v1081_v36 = vstv %s4025_s26 }
  0x94   : > { %s2496_s9 = sld [smem:[#allocation8 + $0x27]]  ;;  %s2506_s12 = sld [smem:[#allocation8 + $0x52]]  ;;  %v2550_v49 = vsel %vm290_vm2, %v1217_v29, %v1218_v30  ;;  %v944_v14 = vstv %s2490_s11  ;;  %v1292_v18 = vstv %s2504_s10 }
  0x95   : > { %v1080_v35 = vstv %s4024_s18  ;;  %s2512_s14 = sld [smem:[#allocation8 + $0x1b]]  ;;  %s2514_s2 = sld [smem:[#allocation8 + $0x4c]] }
  0x96   : > { %s2532_s20 = sld [smem:[#allocation8 + $0x2]]  ;;  %s2534_s3 = sld [smem:[#allocation8 + $0x33]]  ;;  %v2562_v51 = vsel %vm290_vm2, %v1080_v35, %v1081_v36  ;;  %v943_v6 = vstv %s2488_s23 }
  0x97   : > { %v894_v34 = vstv %s4023_s30  ;;  %s2552_s19 = sld [smem:[#allocation8 + $0x2d]]  ;;  %s2554_s24 = sld [smem:[#allocation8 + $0x5e]]  ;;  %v2654_v29 = vsel %vm290_vm2, %v943_v6, %v944_v14 }
  0x98   : > { %v893_v31 = vstv %s4022_s6  ;;  %s4028_s28 = sld [smem:[#allocation24_spill]]  ;;  %s4029_s17 = sld [smem:[#allocation25_spill]] }
  0x99   : > { %v2558_v50 = vsel %vm290_vm2, %v893_v31, %v894_v34  ;;  %s2566_s18 = sld [smem:[#allocation8 + $0x2e]]  ;;  %s4030_s30 = sld [smem:[#allocation26_spill]]  ;;  %v1131_v17 = vstv %s2498_s21 }
  0x9a   : > { %s2568_s6 = sld [smem:[#allocation8 + $0x5f]]  ;;  %s4031_s7 = sld [smem:[#allocation27_spill]]  ;;  %v1130_v16 = vstv %s2496_s9  ;;  %v1293_v19 = vstv %s2506_s12 }
  0x9b   : > { %s4032_s15 = sld [smem:[#allocation28_spill]]  ;;  %s2574_s26 = sld [smem:[#allocation8 + $0x28]]  ;;  %v2658_v30 = vsel %vm290_vm2, %v1130_v16, %v1131_v17  ;;  %v2662_v31 = vsel %vm290_vm2, %v1292_v18, %v1293_v19  ;;  %v1454_v34 = vstv %s2512_s14  ;;  %v1455_v36 = vstv %s2514_s2 }
  0x9c   : > { %s2582_s16 = sld [smem:[#allocation8 + $0x22]]  ;;  %s2584_s22 = sld [smem:[#allocation8 + $0x53]]  ;;  %v645_v52 = vstv %s2532_s20  ;;  %v646_v53 = vstv %s2534_s3 }
  0x9d   : > { %4027 = sst [smem:[#allocation29_spill]] %s2554_s24  ;;  %s2576_s24 = sld [smem:[#allocation8 + $0x59]]  ;;  %v968_v56 = vstv %s2552_s19 }
  0x9e   : > { %v1267_v62 = vstv %s4028_s28  ;;  %v1268_v63 = vstv %s4029_s17  ;;  %s2590_s29 = sld [smem:[#allocation8 + $0x3]]  ;;  %s2592_s8 = sld [smem:[#allocation8 + $0x34]] }
  0x9f   : > { %v1429_v0 = vstv %s4030_s30  ;;  %s2598_s25 = sld [smem:[#allocation8 + $0x2f]]  ;;  %s2600_s27 = sld [smem:[#allocation8 + $0x60]]  ;;  %v2636_v25 = vsel %vm290_vm2, %v1267_v62, %v1268_v63  ;;  %v1155_v58 = vstv %s2566_s18  ;;  %v2694_v62 = vsel %vm290_vm2, %v1454_v34, %v1455_v36 }
  0xa0   : > { %v1430_v1 = vstv %s4031_s7  ;;  %s2606_s0 = sld [smem:[#allocation8 + $0x4]]  ;;  %s2608_s1 = sld [smem:[#allocation8 + $0x35]]  ;;  %v1156_v59 = vstv %s2568_s6  ;;  %v2698_v63 = vsel %vm290_vm2, %v645_v52, %v646_v53 }
  0xa1   : > { %v459_v5 = vstv %s4032_s15  ;;  %s2626_s13 = sld [smem:[#allocation8 + $0x29]]  ;;  %s2628_s5 = sld [smem:[#allocation8 + $0x5a]]  ;;  %v2640_v26 = vsel %vm290_vm2, %v1429_v0, %v1430_v1  ;;  %v1317_v60 = vstv %s2574_s26 }
  0xa2   : > { %v2644_v27 = vsel %vm290_vm2, %v458_v2, %v459_v5  ;;  %s2646_s23 = sld [smem:[#allocation8 + $0x30]]  ;;  %s2648_s4 = sld [smem:[#allocation8 + $0x61]]  ;;  %v1479_v0 = vstv %s2582_s16  ;;  %v1480_v1 = vstv %s2584_s22 }
  0xa3   : > { %s4033_s21 = sld [smem:[#allocation29_spill]]  ;;  %s2665_s11 = sld [smem:[#allocation8 + $0x5]]  ;;  %v1318_v61 = vstv %s2576_s24 }
  0xa4   : > { %s2667_s9 = sld [smem:[#allocation8 + $0x36]]  ;;  %s2678_s12 = sld [smem:[#allocation8 + $0x37]]  ;;  %v832_v2 = vstv %s2590_s29  ;;  %v833_v5 = vstv %s2592_s8 }
  0xa5   : > { %s2676_s10 = sld [smem:[#allocation8 + $0x6]]  ;;  %s2079_s14 = smov 112   ;;  %v1342_v6 = vstv %s2598_s25  ;;  %v1343_v14 = vstv %s2600_s27 }
  0xa6   : > { %s2080_s2 = smov 80   ;;  %v1019_v18 = vstv %s2606_s0  ;;  %v1020_v19 = vstv %s2608_s1  ;;  %s2081_s20 = smov 96  }
  0xa7   : > { %v1504_v34 = vstv %s2626_s13  ;;  %v1505_v36 = vstv %s2628_s5  ;;  %s2082_s3 = smov 48   ;;  %s2083_s19 = smov 64  }
  0xa8   : > { %v1529_v52 = vstv %s2646_s23  ;;  %v1530_v53 = vstv %s2648_s4  ;;  %s2084_s24 = smov 32   ;;  %s2085_s28 = smov 127  }
  0xa9   : > { %v969_v57 = vstv %s4033_s21  ;;  %v1206_v32 = vstv %s2665_s11  ;;  %s2086_s17 = smov 126   ;;  %s2087_s18 = smov 125  }
  0xaa   : > { %s2088_s30 = smov 124   ;;  %s2089_s6 = smov 123  }
  0xab   : > { %s2090_s7 = smov 122   ;;  %s4183_s15 = sld [smem:[#allocation23_spill]] }
  0xac   : > { %s4184_s26 = sld [smem:[#allocation16_spill]]  ;;  %s4186_s22 = sld [smem:[#allocation21_spill]] }
  0xad   : > { %s4187_s1 = sld [smem:[#allocation102_spill]]  ;;  %s2092_s4 = smov [#allocation9]  }
  0xae   : > { %s1992_s21 = sshll.u32 %s2092_s4, 4  ;;  %s1993_s21 = int_to_ptr.vmem [resolvable:$false] %s1992_s21 }
  0xaf   : > { %s1994_s11 = scalar_lea.vmem %s1993_s21, 64 }
  0xb1   : > { %s1740_s16 = sshll.u32 %s4183_s15, 1  ;;  %s1622_s5 = scalar_lea.sflag [#allocation6], %s4183_s15 }
  0xb2   : > { %s1846_s29 = sshll.u32 %s4184_s26, 5  ;;  %s189_s8 = scalar_lea.vmem [#allocation9], %s1740_s16 }
  0xb3   : > { %s1636_s25 = sshll.u32 %s189_s8, 4  ;;  %s3866_s13 = scalar_lea.hbm %s4187_s1, %s1846_s29  ;;  %s3868_s25 = int_to_ptr.vmem [resolvable:$true] %s1636_s25 }
  0xb4   : > { %s1988_s23 = scalar_lea.vmem %s3868_s25, 32  ;;  %p4188_p2 = scmp.ne.s32.totalorder %s4186_s22, 0 }
  0xb5   : > { %p1989_p8 = scmp.ne.s32.totalorder %s3868_s25, %s1988_s23  ;;  %p1995_p4 = scmp.lt.s32.totalorder %s3868_s25, %s1993_s21 }
  0xb6   : > { %p1996_p9 = scmp.lt.s32.totalorder %s1994_s11, %s1988_s23 }
  0xb7   : > { %p1990_p12 = pnand %p1989_p8, %p4188_p2 }
  0xb8   : > { %p1997_p13 = por %p1996_p9, %p1995_p4 }
  0xb9   : > { %p1991_p5 = pneg %p1990_p12 }
  0xbb   : > { %p1998_p11 = pnand %p1997_p13, %p1991_p5 }
  0xde   : > { %v2650_v28 = vpop.permute.xlu0 %248 }
  0xdf   : > { %v2671_v35 = vsel %vm252_vm3, 0.0, %v2650_v28 }
  0xe0   : > { %v303_v54 = vmul.f32 %v2362_v44, %v2671_v35  ;;  %v351_v55 = vmul.f32 %v2366_v45, %v2671_v35  ;;  %v327_v16 = vmul.f32 %v2370_v46, %v2671_v35  ;;  %v399_v17 = vmul.f32 %v2378_v47, %v2671_v35 }
  0xe1   : > { %v1207_v47 = vstv %s2667_s9  ;;  %v2730_v45 = vsel %vm290_vm2, %v1317_v60, %v1318_v61  ;;  %v1393_v46 = vstv %s2676_s10  ;;  %v2752_v60 = vsel %vm290_vm2, %v1019_v18, %v1020_v19 }
  0xe2   : > { %309 = vrot.lane.b32.xlu1 %v303_v54, %s2079_s14  ;;  %357 = vrot.lane.b32.xlu0 %v351_v55, %s2080_s2  ;;  %v2720_v54 = vsel %vm290_vm2, %v968_v56, %v969_v57  ;;  %v2724_v55 = vsel %vm290_vm2, %v1155_v58, %v1156_v59  ;;  %v251_v44 = vpop.permute.xlu0 %250  ;;  %v375_v56 = vmul.f32 %v2382_v48, %v2671_v35 }
  0xe3   : > { %v472_v57 = vmul.f32 %v2424_v3, %v2671_v35  ;;  %v2744_v58 = vsel %vm290_vm2, %v832_v2, %v833_v5  ;;  %v2748_v59 = vsel %vm290_vm2, %v1342_v6, %v1343_v14  ;;  %v2756_v61 = vsel %vm290_vm2, %v1504_v34, %v1505_v36 }
  0xe4   : > { %v423_v2 = vmul.f32 %v2428_v4, %v2671_v35  ;;  %v522_v5 = vmul.f32 %v2438_v7, %v2671_v35  ;;  %v2778_v14 = vsel %vm252_vm3, %v2650_v28, %v251_v44  ;;  %v547_v18 = vmul.f32 %v2450_v10, %v2671_v35 }
  0xe5   : > { %v2787_v19 = vsel %vm252_vm3, %v251_v44, 0.0  ;;  %v597_v34 = vmul.f32 %v2462_v12, %v2671_v35  ;;  %v734_v28 = vmul.f32 %v2466_v13, %v2671_v35  ;;  %v2797_v36 = vmul.f32 %v2475_v15, %v2671_v35 }
  0xe6   : > { %333 = vrot.lane.b32.xlu1 %v327_v16, %s2081_s20  ;;  %405 = vrot.lane.b32.xlu0 %v399_v17, %s2082_s3  ;;  %v2734_v16 = vsel %vm290_vm2, %v1479_v0, %v1480_v1  ;;  %v1394_v17 = vstv %s2678_s12  ;;  %v2760_v0 = vsel %vm290_vm2, %v1529_v52, %v1530_v53  ;;  %v2764_v1 = vsel %vm290_vm2, %v1206_v32, %v1207_v47 }
  0xe7   : > { %v2774_v6 = vsel %vm290_vm2, %v1393_v46, %v1394_v17  ;;  %v497_v32 = vmul.f32 %v2442_v8, %v2671_v35  ;;  %v572_v47 = vmul.f32 %v2446_v9, %v2671_v35  ;;  %v684_v46 = vmul.f32 %v2458_v11, %v2671_v35 }
  0xe8   : > { %v2801_v52 = vmul.f32 %v2518_v37, %v2671_v35  ;;  %v2805_v44 = vmul.f32 %v2522_v38, %v2671_v35  ;;  %v2809_v53 = vmul.f32 %v2526_v39, %v2671_v35  ;;  %v2815_v17 = vmul.f32 %v2530_v40, %v2671_v35 }
  0xe9   : > { %v2827_v33 = vmul.f32 %v2518_v37, %v2787_v19  ;;  %v2839_v11 = vmul.f32 %v2530_v40, %v2787_v19  ;;  %vm1008_vm2 = vcmask 1022976  }
  0xea   : > { %381 = vrot.lane.b32.xlu1 %v375_v56, %s2083_s19  ;;  %478 = vrot.lane.b32.xlu0 %v472_v57, %s2079_s14  ;;  %v2819_v56 = vmul.f32 %v2538_v41, %v2671_v35  ;;  %v2823_v57 = vmul.f32 %v2522_v38, %v2787_v19  ;;  %v2843_v38 = vmul.f32 %v2526_v39, %v2787_v19 }
  0xeb   : > { %4035 = vst [vmem:[#allocation49_spill] sm:$0xff] %v2827_v33  ;;  %4038 = vst [vmem:[#allocation52_spill] sm:$0xff] %v2839_v11  ;;  %v2851_v33 = vmul.f32 %v2546_v43, %v2778_v14  ;;  %v2863_v11 = vmul.f32 %v2526_v39, %v2778_v14  ;;  %v2881_v39 = vmul.f32 %v2538_v41, %v2778_v14 }
  0xec   : > { %4034 = vst [vmem:[#allocation48_spill] sm:$0xff] %v2823_v57  ;;  %v2847_v57 = vmul.f32 %v2518_v37, %v2778_v14  ;;  %v2867_v37 = vmul.f32 %v2550_v49, %v2778_v14 }
  0xed   : > { %4041 = vst [vmem:[#allocation55_spill] sm:$0xff] %v2863_v11  ;;  %4043 = vst [vmem:[#allocation57_spill] sm:$0xff] %v2881_v39  ;;  %v2885_v11 = vmul.f32 %v2558_v50, %v2787_v19  ;;  %v2905_v39 = vmul.f32 %v2558_v50, %v2778_v14 }
  0xee   : > { %429 = vrot.lane.b32.xlu1 %v423_v2, %s2084_s24  ;;  %528 = vrot.lane.b32.xlu0 %v522_v5, %s2080_s2  ;;  %v2831_v2 = vmul.f32 %v2466_v13, %v2778_v14  ;;  %v2835_v5 = vmul.f32 %v2542_v42, %v2778_v14  ;;  %4039 = vst [vmem:[#allocation53_spill] sm:$0xff] %v2847_v57  ;;  %4042 = vst [vmem:[#allocation56_spill] sm:$0xff] %v2867_v37 }
  0xef   : > { %v2871_v57 = vmul.f32 %v2546_v43, %v2787_v19  ;;  %4044 = vst [vmem:[#allocation58_spill] sm:$0xff] %v2885_v11  ;;  %v2889_v37 = vmul.f32 %v2550_v49, %v2671_v35  ;;  %4047 = vst [vmem:[#allocation61_spill] sm:$0xff] %v2905_v39  ;;  %v2909_v11 = vmul.f32 %v2612_v20, %v2787_v19 }
  0xf0   : > { %4036 = vst [vmem:[#allocation50_spill] sm:$0xff] %v2831_v2  ;;  %4037 = vst [vmem:[#allocation51_spill] sm:$0xff] %v2835_v5  ;;  %v2855_v2 = vmul.f32 %v2542_v42, %v2787_v19  ;;  %v2859_v5 = vmul.f32 %v2538_v41, %v2787_v19  ;;  %v2901_v41 = vmul.f32 %v2612_v20, %v2671_v35 }
  0xf1   : > { %4045 = vst [vmem:[#allocation59_spill] sm:$0xff] %v2889_v37  ;;  %4048 = vst [vmem:[#allocation62_spill] sm:$0xff] %v2909_v11  ;;  %v2913_v37 = vmul.f32 %v2562_v51, %v2671_v35  ;;  %v2929_v39 = vmul.f32 %v2612_v20, %v2778_v14  ;;  %v2933_v11 = vmul.f32 %v2620_v22, %v2787_v19 }
  0xf2   : > { %4040 = vst [vmem:[#allocation54_spill] sm:$0xff] %v2855_v2  ;;  %503 = vrot.lane.b32.xlu1 %v497_v32, %s2081_s20  ;;  %578 = vrot.lane.b32.xlu0 %v572_v47, %s2082_s3  ;;  %v2877_v2 = vmul.f32 %v2558_v50, %v2671_v35  ;;  %v2893_v32 = vmul.f32 %v2562_v51, %v2778_v14 }
  0xf3   : > { %v2897_v47 = vmul.f32 %v2550_v49, %v2787_v19  ;;  %v2917_v49 = vmul.f32 %v2616_v21, %v2778_v14  ;;  %v2925_v50 = vmul.f32 %v2620_v22, %v2671_v35  ;;  %4050 = vst [vmem:[#allocation64_spill] sm:$0xff] %v2929_v39  ;;  %v2947_v20 = vmul.f32 %v2624_v23, %v2778_v14 }
  0xf4   : > { %v2951_v39 = vmul.f32 %v2632_v24, %v2778_v14 }
  0xf5   : > { %4046 = vst [vmem:[#allocation60_spill] sm:$0xff] %v2897_v47  ;;  %v2921_v47 = vmul.f32 %v2562_v51, %v2787_v19  ;;  %v2939_v51 = vmul.f32 %v2616_v21, %v2671_v35  ;;  %4053 = vst [vmem:[#allocation67_spill] sm:$0xff] %v2947_v20  ;;  %v2971_v20 = vmul.f32 %v2632_v24, %v2671_v35 }
  0xf6   : > { %553 = vrot.lane.b32.xlu1 %v547_v18, %s2083_s19  ;;  %690 = vrot.lane.b32.xlu0 %v684_v46, %s2081_s20  ;;  %v2955_v18 = vmul.f32 %v2616_v21, %v2787_v19  ;;  %v2959_v46 = vmul.f32 %v2636_v25, %v2671_v35  ;;  %v2975_v21 = vmul.f32 %v2640_v26, %v2778_v14 }
  0xf7   : > { %4049 = vst [vmem:[#allocation63_spill] sm:$0xff] %v2921_v47  ;;  %4051 = vst [vmem:[#allocation65_spill] sm:$0xff] %v2939_v51  ;;  %v2943_v47 = vmul.f32 %v2624_v23, %v2671_v35  ;;  %v2963_v51 = vmul.f32 %v2620_v22, %v2778_v14  ;;  %v2967_v23 = vmul.f32 %v2636_v25, %v2787_v19 }
  0xf8   : > { %4056 = vst [vmem:[#allocation70_spill] sm:$0xff] %v2971_v20  ;;  %v2983_v22 = vmul.f32 %v2644_v27, %v2787_v19  ;;  %v2995_v20 = vmul.f32 %v2654_v29, %v2787_v19 }
  0xf9   : > { %4052 = vst [vmem:[#allocation66_spill] sm:$0xff] %v2943_v47  ;;  %4054 = vst [vmem:[#allocation68_spill] sm:$0xff] %v2963_v51  ;;  %v2979_v47 = vmul.f32 %v2632_v24, %v2787_v19  ;;  %v2987_v51 = vmul.f32 %v2654_v29, %v2671_v35  ;;  %v3001_v24 = vmul.f32 %v2640_v26, %v2671_v35 }
  0xfa   : > { %4055 = vst [vmem:[#allocation69_spill] sm:$0xff] %v2967_v23  ;;  %4057 = vst [vmem:[#allocation71_spill] sm:$0xff] %v2983_v22  ;;  %v2991_v23 = vmul.f32 %v2636_v25, %v2778_v14  ;;  %603 = vrot.lane.b32.xlu1 %v597_v34, %s2084_s24  ;;  %740 = vrot.lane.b32.xlu0 %v734_v28, %s2083_s19  ;;  %v3005_v22 = vmul.f32 %v2644_v27, %v2671_v35 }
  0xfb   : > { %4059 = vst [vmem:[#allocation73_spill] sm:$0xff] %v3001_v24  ;;  %v3009_v25 = vmul.f32 %v2644_v27, %v2778_v14  ;;  %v3017_v34 = vmul.f32 %v2640_v26, %v2787_v19  ;;  %v3021_v28 = vmul.f32 %v2662_v31, %v2671_v35  ;;  %v3025_v24 = vmul.f32 %v2654_v29, %v2778_v14 }
  0xfc   : > { %4058 = vst [vmem:[#allocation72_spill] sm:$0xff] %v2991_v23  ;;  %4060 = vst [vmem:[#allocation74_spill] sm:$0xff] %v3005_v22  ;;  %v3013_v23 = vmul.f32 %v2658_v30, %v2778_v14  ;;  %v3029_v27 = vmul.f32 %v2658_v30, %v2671_v35  ;;  %v3037_v26 = vmul.f32 %v2658_v30, %v2787_v19 }
  0xfd   : > { %4061 = vst [vmem:[#allocation75_spill] sm:$0xff] %v3009_v25  ;;  %4062 = vst [vmem:[#allocation76_spill] sm:$0xff] %v3025_v24  ;;  %v3033_v25 = vmul.f32 %v2662_v31, %v2787_v19  ;;  %v3041_v22 = vmul.f32 %v2694_v62, %v2778_v14  ;;  %v3045_v29 = vmul.f32 %v2698_v63, %v2671_v35 }
  0xfe   : > { %4063 = vst [vmem:[#allocation77_spill] sm:$0xff] %v3029_v27  ;;  %v3049_v24 = vmul.f32 %v2662_v31, %v2778_v14  ;;  %v3053_v27 = vmul.f32 %v2720_v54, %v2671_v35  ;;  %v3057_v30 = vmul.f32 %v2694_v62, %v2671_v35  ;;  %665 = vrot.lane.b32.xlu1 %v2797_v36, %s2079_s14 }
  0xff   : > { %4064 = vst [vmem:[#allocation78_spill] sm:$0xff] %v3045_v29  ;;  %790 = vrot.lane.b32.xlu0 %v2801_v52, %s2084_s24  ;;  %v3065_v29 = vmul.f32 %v2720_v54, %v2787_v19  ;;  %v3069_v31 = vmul.f32 %v2698_v63, %v2778_v14  ;;  %v3081_v36 = vmul.f32 %v2724_v55, %v2778_v14 }
 0x100   : > { %4065 = vst [vmem:[#allocation79_spill] sm:$0xff] %v3053_v27  ;;  %4066 = vst [vmem:[#allocation80_spill] sm:$0xff] %v3057_v30  ;;  %v3073_v27 = vmul.f32 %v2698_v63, %v2787_v19  ;;  %v3077_v30 = vmul.f32 %v2694_v62, %v2787_v19  ;;  %v3085_v52 = vmul.f32 %v2720_v54, %v2778_v14 }
 0x101   : > { %4067 = vst [vmem:[#allocation81_spill] sm:$0xff] %v3065_v29  ;;  %4068 = vst [vmem:[#allocation82_spill] sm:$0xff] %v3069_v31  ;;  %v3089_v29 = vmul.f32 %v2730_v45, %v2671_v35  ;;  %v4073_v31 = vld [vmem:[#allocation38_spill] sm:$0xff]  ;;  %v3099_v62 = vmul.f32 %v2730_v45, %v2787_v19  ;;  %v3107_v54 = vmul.f32 %v2734_v16, %v2778_v14 }
 0x102   : > { %4069 = vst [vmem:[#allocation83_spill] sm:$0xff] %v3073_v27  ;;  %4070 = vst [vmem:[#allocation84_spill] sm:$0xff] %v3081_v36  ;;  %v305_v63 = vmul.f32 %v4073_v31, %v2787_v19  ;;  %v3095_v27 = vmul.f32 %v2724_v55, %v2671_v35  ;;  %v3103_v36 = vmul.f32 %v2724_v55, %v2787_v19  ;;  %715 = vrot.lane.b32.xlu1 %v2805_v44, %s2080_s2 }
 0x103   : > { %4071 = vst [vmem:[#allocation85_spill] sm:$0xff] %v3085_v52  ;;  %4072 = vst [vmem:[#allocation86_spill] sm:$0xff] %v3089_v29  ;;  %v3111_v29 = vmul.f32 %v2744_v58, %v2671_v35  ;;  %v3115_v52 = vmul.f32 %v2730_v45, %v2778_v14  ;;  %1039 = vrot.lane.b32.xlu0 %v2809_v53, %s2079_s14  ;;  %v3127_v55 = vmul.f32 %v2752_v60, %v2787_v19 }
 0x104   : > { %4074 = vst [vmem:[#allocation38_spill] sm:$0xff] %v3095_v27  ;;  %v3119_v27 = vmul.f32 %v2748_v59, %v2671_v35  ;;  %v3135_v45 = vmul.f32 %v2748_v59, %v2787_v19  ;;  %v3143_v44 = vmul.f32 %v2744_v58, %v2787_v19  ;;  %v3147_v53 = vmul.f32 %v2734_v16, %v2787_v19 }
 0x105   : > { %4075 = vst [vmem:[#allocation87_spill] sm:$0xff] %v3111_v29  ;;  %4077 = vst [vmem:[#allocation89_spill] sm:$0xff] %v3127_v55  ;;  %v3131_v29 = vmul.f32 %v2734_v16, %v2671_v35  ;;  %v3151_v55 = vmul.f32 %v2756_v61, %v2778_v14  ;;  %v3167_v16 = vmul.f32 %v2760_v0, %v2671_v35 }
 0x106   : > { %4076 = vst [vmem:[#allocation88_spill] sm:$0xff] %v3119_v27  ;;  %4079 = vst [vmem:[#allocation91_spill] sm:$0xff] %v3135_v45  ;;  %v3139_v27 = vmul.f32 %v2744_v58, %v2778_v14  ;;  %v3159_v45 = vmul.f32 %v2752_v60, %v2778_v14  ;;  %v3163_v58 = vmul.f32 %v2748_v59, %v2778_v14  ;;  %765 = vrot.lane.b32.xlu1 %v2815_v17, %s2082_s3 }
 0x107   : > { %4078 = vst [vmem:[#allocation90_spill] sm:$0xff] %v3131_v29  ;;  %4080 = vst [vmem:[#allocation92_spill] sm:$0xff] %v3147_v53  ;;  %v3155_v29 = vmul.f32 %v2752_v60, %v2671_v35  ;;  %v3171_v53 = vmul.f32 %v2756_v61, %v2671_v35  ;;  %v3179_v60 = vmul.f32 %v2756_v61, %v2787_v19  ;;  %1064 = vrot.lane.b32.xlu0 %v2819_v56, %s2081_s20 }
 0x108   : > { %4081 = vst [vmem:[#allocation93_spill] sm:$0xff] %v3151_v55  ;;  %v3175_v55 = vmul.f32 %v2760_v0, %v2787_v19  ;;  %v3183_v59 = vmul.f32 %v2764_v1, %v2671_v35  ;;  %v3199_v61 = vmul.f32 %v2764_v1, %v2787_v19  ;;  %v3207_v17 = vmul.f32 %v2774_v6, %v2778_v14 }
 0x109   : > { %4082 = vst [vmem:[#allocation94_spill] sm:$0xff] %v3171_v53  ;;  %v3191_v53 = vmul.f32 %v2760_v0, %v2778_v14  ;;  %v3211_v0 = vmul.f32 %v2774_v6, %v2787_v19  ;;  %v846_v56 = vmul.f32 %v2542_v42, %v2671_v35  ;;  %v304_v42 = vmul.f32 %v4073_v31, %v2778_v14 }
 0x10a   : > { %4083 = vst [vmem:[#allocation95_spill] sm:$0xff] %v3175_v55  ;;  %4084 = vst [vmem:[#allocation96_spill] sm:$0xff] %v3183_v59  ;;  %v3195_v55 = vmul.f32 %v2764_v1, %v2778_v14  ;;  %v3203_v59 = vmul.f32 %v2774_v6, %v2671_v35  ;;  %v871_v1 = vmul.f32 %v2546_v43, %v2671_v35  ;;  %v4089_v6 = vld [vmem:[#allocation39_spill] sm:$0xff] }
 0x10b   : > { %4087 = vst [vmem:[#allocation99_spill] sm:$0xff] %v3207_v17  ;;  %852 = vrot.lane.b32.xlu1 %v846_v56, %s2079_s14  ;;  %313 = vrot.lane.b32.xlu0 %v305_v63, %s2079_s14  ;;  %v353_v17 = vmul.f32 %v4089_v6, %v2787_v19  ;;  %v376_v43 = vmul.f32 %v2382_v48, %v2778_v14  ;;  %v4090_v63 = vld [vmem:[#allocation43_spill] sm:$0xff] }
 0x10c   : > { %4085 = vst [vmem:[#allocation97_spill] sm:$0xff] %v3195_v55  ;;  %4086 = vst [vmem:[#allocation98_spill] sm:$0xff] %v3203_v59  ;;  %v4088_v59 = vld [vmem:[#allocation40_spill] sm:$0xff]  ;;  %v352_v31 = vmul.f32 %v4089_v6, %v2778_v14  ;;  %v474_v56 = vmul.f32 %v2424_v3, %v2787_v19  ;;  %v498_v6 = vmul.f32 %v2442_v8, %v2778_v14 }
 0x10d   : > { %v328_v55 = vmul.f32 %v4088_v59, %v2778_v14  ;;  %v329_v35 = vmul.f32 %v4088_v59, %v2787_v19  ;;  %v377_v59 = vmul.f32 %v2382_v48, %v2787_v19  ;;  %v425_v48 = vmul.f32 %v2428_v4, %v2787_v19 }
 0x10f   : > { %877 = vrot.lane.b32.xlu1 %v871_v1, %s2081_s20  ;;  %335 = vrot.lane.b32.xlu0 %v328_v55, %s2081_s20  ;;  %v401_v55 = vmul.f32 %v4090_v63, %v2787_v19  ;;  %v400_v1 = vmul.f32 %v4090_v63, %v2778_v14  ;;  %v574_v63 = vmul.f32 %v2446_v9, %v2787_v19 }
 0x113   : > { %361 = vrot.lane.b32.xlu0 %v353_v17, %s2080_s2  ;;  %311 = vrot.lane.b32.xlu1 %v304_v42, %s2079_s14  ;;  %v424_v17 = vmul.f32 %v2428_v4, %v2778_v14  ;;  %v524_v42 = vmul.f32 %v2438_v7, %v2787_v19  ;;  %v499_v4 = vmul.f32 %v2442_v8, %v2787_v19 }
 0x114   : > { %v549_v8 = vmul.f32 %v2450_v10, %v2787_v19 }
 0x117   : > { %383 = vrot.lane.b32.xlu0 %v376_v43, %s2083_s19  ;;  %337 = vrot.lane.b32.xlu1 %v329_v35, %s2081_s20  ;;  %v473_v43 = vmul.f32 %v2424_v3, %v2778_v14  ;;  %v548_v35 = vmul.f32 %v2450_v10, %v2778_v14  ;;  %v523_v3 = vmul.f32 %v2438_v7, %v2778_v14 }
 0x118   : > { %v573_v7 = vmul.f32 %v2446_v9, %v2778_v14  ;;  %v599_v10 = vmul.f32 %v2462_v12, %v2787_v19  ;;  %v661_v9 = vmul.f32 %v2475_v15, %v2787_v19 }
 0x11b   : > { %409 = vrot.lane.b32.xlu0 %v401_v55, %s2082_s3  ;;  %359 = vrot.lane.b32.xlu1 %v352_v31, %s2080_s2  ;;  %v598_v55 = vmul.f32 %v2462_v12, %v2778_v14  ;;  %v660_v31 = vmul.f32 %v2475_v15, %v2778_v14  ;;  %v4093_v15 = vld [vmem:[#allocation48_spill] sm:$0xff] }
 0x11f   : > { %431 = vrot.lane.b32.xlu0 %v424_v17, %s2084_s24  ;;  %385 = vrot.lane.b32.xlu1 %v377_v59, %s2083_s19  ;;  %v4091_v17 = vld [vmem:[#allocation46_spill] sm:$0xff] }
 0x120   : > { %v686_v59 = vmul.f32 %v4091_v17, %v2787_v19  ;;  %v685_v12 = vmul.f32 %v4091_v17, %v2778_v14  ;;  %v4107_v17 = vld [vmem:[#allocation56_spill] sm:$0xff] }
 0x123   : > { %482 = vrot.lane.b32.xlu0 %v474_v56, %s2079_s14  ;;  %407 = vrot.lane.b32.xlu1 %v400_v1, %s2082_s3  ;;  %v4092_v56 = vld [vmem:[#allocation47_spill] sm:$0xff] }
 0x124   : > { %v710_v1 = vmul.f32 %v4092_v56, %v2778_v14 }
 0x127   : > { %505 = vrot.lane.b32.xlu0 %v498_v6, %s2081_s20  ;;  %433 = vrot.lane.b32.xlu1 %v425_v48, %s2084_s24  ;;  %v736_v6 = vmul.f32 %v2466_v13, %v2787_v19  ;;  %v760_v48 = vmul.f32 %v2530_v40, %v2778_v14  ;;  %v4095_v13 = vld [vmem:[#allocation50_spill] sm:$0xff]  ;;  %v4096_v19 = vld [vmem:[#allocation51_spill] sm:$0xff]  ;;  %v4100_v14 = vld [vmem:[#allocation53_spill] sm:$0xff] }
 0x12b   : > { %532 = vrot.lane.b32.xlu0 %v524_v42, %s2080_s2  ;;  %480 = vrot.lane.b32.xlu1 %v473_v43, %s2079_s14  ;;  %v4094_v42 = vld [vmem:[#allocation49_spill] sm:$0xff]  ;;  %v4097_v43 = vld [vmem:[#allocation52_spill] sm:$0xff] }
 0x12f   : > { %555 = vrot.lane.b32.xlu0 %v548_v35, %s2083_s19  ;;  %507 = vrot.lane.b32.xlu1 %v499_v4, %s2081_s20 }
 0x133   : > { %582 = vrot.lane.b32.xlu0 %v574_v63, %s2082_s3  ;;  %530 = vrot.lane.b32.xlu1 %v523_v3, %s2080_s2  ;;  %v4103_v3 = vld [vmem:[#allocation54_spill] sm:$0xff] }
 0x137   : > { %605 = vrot.lane.b32.xlu0 %v598_v55, %s2084_s24  ;;  %557 = vrot.lane.b32.xlu1 %v549_v8, %s2083_s19 }
 0x13b   : > { %667 = vrot.lane.b32.xlu0 %v660_v31, %s2079_s14  ;;  %580 = vrot.lane.b32.xlu1 %v573_v7, %s2082_s3 }
 0x13f   : > { %694 = vrot.lane.b32.xlu0 %v686_v59, %s2081_s20  ;;  %607 = vrot.lane.b32.xlu1 %v599_v10, %s2084_s24 }
 0x143   : > { %717 = vrot.lane.b32.xlu0 %v710_v1, %s2080_s2  ;;  %669 = vrot.lane.b32.xlu1 %v661_v9, %s2079_s14  ;;  %v4109_v1 = vld [vmem:[#allocation58_spill] sm:$0xff]  ;;  %v4110_v9 = vld [vmem:[#allocation59_spill] sm:$0xff] }
 0x147   : > { %744 = vrot.lane.b32.xlu0 %v736_v6, %s2083_s19  ;;  %692 = vrot.lane.b32.xlu1 %v685_v12, %s2081_s20 }
 0x14b   : > { %767 = vrot.lane.b32.xlu0 %v760_v48, %s2082_s3  ;;  %719 = vrot.lane.b32.xlu1 %v4093_v15, %s2080_s2  ;;  %v4112_v15 = vld [vmem:[#allocation61_spill] sm:$0xff] }
 0x14f   : > { %794 = vrot.lane.b32.xlu0 %v4094_v42, %s2084_s24  ;;  %742 = vrot.lane.b32.xlu1 %v4095_v13, %s2083_s19 }
 0x153   : > { %854 = vrot.lane.b32.xlu0 %v4096_v19, %s2079_s14  ;;  %769 = vrot.lane.b32.xlu1 %v4097_v43, %s2082_s3  ;;  %v4113_v19 = vld [vmem:[#allocation62_spill] sm:$0xff] }
 0x154   : > { %v3320_v35 = vpop.permute.xlu1 %309  ;;  %v3322_v40 = vpop.permute.xlu0 %357 }
 0x155   : > { %4098 = vst [vmem:[#allocation40_spill] sm:$0xff] %v3320_v35  ;;  %4099 = vst [vmem:[#allocation39_spill] sm:$0xff] %v3322_v40  ;;  %v4146_v40 = vld [vmem:[#allocation74_spill] sm:$0xff] }
 0x157   : > { %1043 = vrot.lane.b32.xlu0 %v2843_v38, %s2079_s14  ;;  %792 = vrot.lane.b32.xlu1 %v4100_v14, %s2084_s24  ;;  %v4105_v38 = vld [vmem:[#allocation55_spill] sm:$0xff] }
 0x158   : > { %v3328_v4 = vpop.permute.xlu1 %333  ;;  %v3330_v63 = vpop.permute.xlu0 %405 }
 0x159   : > { %4101 = vst [vmem:[#allocation43_spill] sm:$0xff] %v3328_v4  ;;  %4102 = vst [vmem:[#allocation46_spill] sm:$0xff] %v3330_v63  ;;  %v4140_v63 = vld [vmem:[#allocation85_spill] sm:$0xff] }
 0x15b   : > { %879 = vrot.lane.b32.xlu0 %v2851_v33, %s2081_s20  ;;  %856 = vrot.lane.b32.xlu1 %v4103_v3, %s2079_s14 }
 0x15c   : > { %v3336_v55 = vpop.permute.xlu1 %381  ;;  %v3338_v8 = vpop.permute.xlu0 %478 }
 0x15d   : > { %4104 = vst [vmem:[#allocation47_spill] sm:$0xff] %v3336_v55  ;;  %v4142_v55 = vld [vmem:[#allocation38_spill] sm:$0xff] }
 0x15f   : > { %1068 = vrot.lane.b32.xlu0 %v2859_v5, %s2081_s20  ;;  %1041 = vrot.lane.b32.xlu1 %v4105_v38, %s2079_s14  ;;  %v4108_v5 = vld [vmem:[#allocation57_spill] sm:$0xff]  ;;  %v4116_v38 = vld [vmem:[#allocation64_spill] sm:$0xff] }
 0x160   : > { %v3344_v31 = vpop.permute.xlu1 %429  ;;  %v3346_v7 = vpop.permute.xlu0 %528 }
 0x161   : > { %4106 = vst [vmem:[#allocation48_spill] sm:$0xff] %v3344_v31  ;;  %v4135_v31 = vld [vmem:[#allocation77_spill] sm:$0xff] }
 0x163   : > { %1228 = vrot.lane.b32.xlu0 %v4107_v17, %s2079_s14  ;;  %881 = vrot.lane.b32.xlu1 %v2871_v57, %s2081_s20 }
 0x164   : > { %v3352_v33 = vpop.permute.xlu1 %503  ;;  %v3354_v59 = vpop.permute.xlu0 %578 }
 0x167   : > { %902 = vrot.lane.b32.xlu0 %v2877_v2, %s2080_s2  ;;  %1066 = vrot.lane.b32.xlu1 %v4108_v5, %s2081_s20  ;;  %v4111_v2 = vld [vmem:[#allocation60_spill] sm:$0xff] }
 0x168   : > { %v3360_v10 = vpop.permute.xlu1 %553  ;;  %v3362_v56 = vpop.permute.xlu0 %690 }
 0x16b   : > { %906 = vrot.lane.b32.xlu0 %v4109_v1, %s2080_s2  ;;  %1226 = vrot.lane.b32.xlu1 %v4110_v9, %s2079_s14 }
 0x16c   : > { %v3368_v57 = vpop.permute.xlu1 %603  ;;  %v3370_v6 = vpop.permute.xlu0 %740 }
 0x16f   : > { %1091 = vrot.lane.b32.xlu0 %v2893_v32, %s2080_s2  ;;  %1230 = vrot.lane.b32.xlu1 %v4111_v2, %s2079_s14 }
 0x170   : > { %v3376_v12 = vpop.permute.xlu1 %665 }
 0x171   : > { %v3378_v48 = vpop.permute.xlu0 %790 }
 0x173   : > { %1251 = vrot.lane.b32.xlu0 %v2901_v41, %s2081_s20  ;;  %904 = vrot.lane.b32.xlu1 %v4112_v15, %s2080_s2  ;;  %v4114_v41 = vld [vmem:[#allocation63_spill] sm:$0xff] }
 0x174   : > { %v3384_v42 = vpop.permute.xlu1 %715 }
 0x175   : > { %v3386_v13 = vpop.permute.xlu0 %1039 }
 0x177   : > { %1255 = vrot.lane.b32.xlu0 %v4113_v19, %s2081_s20  ;;  %1089 = vrot.lane.b32.xlu1 %v2913_v37, %s2080_s2  ;;  %v4126_v19 = vld [vmem:[#allocation69_spill] sm:$0xff] }
 0x178   : > { %v3392_v32 = vpop.permute.xlu1 %765 }
 0x179   : > { %v3394_v43 = vpop.permute.xlu0 %1064 }
 0x17b   : > { %1415 = vrot.lane.b32.xlu0 %v2917_v49, %s2079_s14  ;;  %1093 = vrot.lane.b32.xlu1 %v4114_v41, %s2080_s2  ;;  %v4118_v49 = vld [vmem:[#allocation65_spill] sm:$0xff] }
 0x17d   : > { %v3400_v14 = vpop.permute.xlu1 %852  ;;  %v3402_v3 = vpop.permute.xlu0 %313 }
 0x17e   : > { %4115 = vst [vmem:[#allocation49_spill] sm:$0xff] %v3402_v3  ;;  %v4145_v3 = vld [vmem:[#allocation71_spill] sm:$0xff] }
 0x17f   : > { %927 = vrot.lane.b32.xlu0 %v2925_v50, %s2083_s19  ;;  %1253 = vrot.lane.b32.xlu1 %v4116_v38, %s2081_s20 }
 0x181   : > { %v3408_v37 = vpop.permute.xlu1 %877  ;;  %v3410_v17 = vpop.permute.xlu0 %335 }
 0x182   : > { %4117 = vst [vmem:[#allocation50_spill] sm:$0xff] %v3410_v17 }
 0x183   : > { %931 = vrot.lane.b32.xlu0 %v2933_v11, %s2083_s19  ;;  %1413 = vrot.lane.b32.xlu1 %v4118_v49, %s2079_s14  ;;  %v4123_v11 = vld [vmem:[#allocation68_spill] sm:$0xff] }
 0x184   : > { %v4131_v49 = vld [vmem:[#allocation72_spill] sm:$0xff] }
 0x185   : > { %v3416_v5 = vpop.permute.xlu1 %311  ;;  %v3418_v1 = vpop.permute.xlu0 %361 }
 0x186   : > { %4119 = vst [vmem:[#allocation51_spill] sm:$0xff] %v3416_v5  ;;  %4120 = vst [vmem:[#allocation52_spill] sm:$0xff] %v3418_v1 }
 0x187   : > { %1116 = vrot.lane.b32.xlu0 %v2951_v39, %s2083_s19  ;;  %1417 = vrot.lane.b32.xlu1 %v2955_v18, %s2079_s14  ;;  %v4127_v39 = vld [vmem:[#allocation70_spill] sm:$0xff] }
 0x189   : > { %v3424_v50 = vpop.permute.xlu1 %337  ;;  %v3426_v9 = vpop.permute.xlu0 %383 }
 0x18a   : > { %4121 = vst [vmem:[#allocation53_spill] sm:$0xff] %v3424_v50  ;;  %4122 = vst [vmem:[#allocation54_spill] sm:$0xff] %v3426_v9  ;;  %v4143_v9 = vld [vmem:[#allocation87_spill] sm:$0xff] }
 0x18b   : > { %1276 = vrot.lane.b32.xlu0 %v2959_v46, %s2080_s2  ;;  %929 = vrot.lane.b32.xlu1 %v4123_v11, %s2083_s19 }
 0x18d   : > { %v3432_v2 = vpop.permute.xlu1 %359  ;;  %v3434_v15 = vpop.permute.xlu0 %409 }
 0x18e   : > { %4124 = vst [vmem:[#allocation55_spill] sm:$0xff] %v3432_v2  ;;  %4125 = vst [vmem:[#allocation56_spill] sm:$0xff] %v3434_v15  ;;  %v4137_v15 = vld [vmem:[#allocation80_spill] sm:$0xff] }
 0x18f   : > { %1280 = vrot.lane.b32.xlu0 %v4126_v19, %s2080_s2  ;;  %1114 = vrot.lane.b32.xlu1 %v4127_v39, %s2083_s19 }
 0x191   : > { %v3440_v18 = vpop.permute.xlu1 %385  ;;  %v3442_v41 = vpop.permute.xlu0 %431 }
 0x192   : > { %4128 = vst [vmem:[#allocation57_spill] sm:$0xff] %v3440_v18  ;;  %4129 = vst [vmem:[#allocation58_spill] sm:$0xff] %v3442_v41 }
 0x193   : > { %1440 = vrot.lane.b32.xlu0 %v2975_v21, %s2081_s20  ;;  %1118 = vrot.lane.b32.xlu1 %v2979_v47, %s2083_s19  ;;  %v4133_v21 = vld [vmem:[#allocation73_spill] sm:$0xff] }
 0x195   : > { %v3448_v46 = vpop.permute.xlu1 %407  ;;  %v3450_v38 = vpop.permute.xlu0 %482 }
 0x196   : > { %4130 = vst [vmem:[#allocation59_spill] sm:$0xff] %v3448_v46 }
 0x197   : > { %952 = vrot.lane.b32.xlu0 %v2987_v51, %s2082_s3  ;;  %1278 = vrot.lane.b32.xlu1 %v4131_v49, %s2080_s2 }
 0x199   : > { %v3456_v11 = vpop.permute.xlu1 %433  ;;  %v3458_v19 = vpop.permute.xlu0 %505 }
 0x19a   : > { %4132 = vst [vmem:[#allocation60_spill] sm:$0xff] %v3456_v11 }
 0x19b   : > { %956 = vrot.lane.b32.xlu0 %v2995_v20, %s2082_s3  ;;  %1438 = vrot.lane.b32.xlu1 %v4133_v21, %s2081_s20  ;;  %v4134_v20 = vld [vmem:[#allocation76_spill] sm:$0xff] }
 0x19d   : > { %v481_v47 = vpop.permute.xlu1 %480  ;;  %v3464_v39 = vpop.permute.xlu0 %532 }
 0x19f   : > { %1141 = vrot.lane.b32.xlu0 %v3013_v23, %s2082_s3  ;;  %1442 = vrot.lane.b32.xlu1 %v3017_v34, %s2081_s20 }
 0x1a1   : > { %v508_v51 = vpop.permute.xlu1 %507  ;;  %v3470_v49 = vpop.permute.xlu0 %555 }
 0x1a3   : > { %1301 = vrot.lane.b32.xlu0 %v3021_v28, %s2083_s19  ;;  %954 = vrot.lane.b32.xlu1 %v4134_v20, %s2082_s3 }
 0x1a5   : > { %v3476_v11 = vpop.permute.xlu1 %530  ;;  %v3478_v21 = vpop.permute.xlu0 %582 }
 0x1a7   : > { %1139 = vrot.lane.b32.xlu1 %v4135_v31, %s2082_s3  ;;  %1305 = vrot.lane.b32.xlu0 %v3033_v25, %s2083_s19  ;;  %v4136_v31 = vld [vmem:[#allocation79_spill] sm:$0xff] }
 0x1a9   : > { %v3484_v23 = vpop.permute.xlu1 %557  ;;  %v3486_v34 = vpop.permute.xlu0 %605 }
 0x1ab   : > { %1143 = vrot.lane.b32.xlu1 %v3037_v26, %s2082_s3  ;;  %1465 = vrot.lane.b32.xlu0 %v3041_v22, %s2080_s2  ;;  %v4138_v26 = vld [vmem:[#allocation81_spill] sm:$0xff] }
 0x1ad   : > { %v3492_v28 = vpop.permute.xlu1 %580  ;;  %v3494_v20 = vpop.permute.xlu0 %667 }
 0x1af   : > { %1303 = vrot.lane.b32.xlu1 %v3049_v24, %s2083_s19  ;;  %977 = vrot.lane.b32.xlu0 %v4136_v31, %s2084_s24  ;;  %v4139_v24 = vld [vmem:[#allocation84_spill] sm:$0xff] }
 0x1b1   : > { %v3500_v25 = vpop.permute.xlu1 %607  ;;  %v3502_v41 = vpop.permute.xlu0 %694 }
 0x1b3   : > { %1463 = vrot.lane.b32.xlu1 %v4137_v15, %s2080_s2  ;;  %981 = vrot.lane.b32.xlu0 %v4138_v26, %s2084_s24  ;;  %v4141_v15 = vld [vmem:[#allocation86_spill] sm:$0xff] }
 0x1b5   : > { %v3508_v22 = vpop.permute.xlu1 %669  ;;  %v3510_v18 = vpop.permute.xlu0 %717 }
 0x1b7   : > { %1467 = vrot.lane.b32.xlu1 %v3077_v30, %s2080_s2  ;;  %1166 = vrot.lane.b32.xlu0 %v4139_v24, %s2084_s24 }
 0x1b9   : > { %v3516_v31 = vpop.permute.xlu1 %692  ;;  %v3518_v1 = vpop.permute.xlu0 %744 }
 0x1bb   : > { %979 = vrot.lane.b32.xlu1 %v4140_v63, %s2084_s24  ;;  %1326 = vrot.lane.b32.xlu0 %v4141_v15, %s2082_s3 }
 0x1bd   : > { %v3524_v26 = vpop.permute.xlu1 %719  ;;  %v3526_v46 = vpop.permute.xlu0 %767 }
 0x1bf   : > { %1164 = vrot.lane.b32.xlu1 %v4142_v55, %s2084_s24  ;;  %1330 = vrot.lane.b32.xlu0 %v3099_v62, %s2082_s3  ;;  %v484_v55 = vsel %vm315_vm4, %v3338_v8, %v481_v47  ;;  %v4147_v8 = vld [vmem:[#allocation89_spill] sm:$0xff] }
 0x1c0   : > { %v489_v2 = vadd.f32 %v484_v55, %v4146_v40  ;;  %v485_v40 = vsel %vm315_vm4, %v481_v47, %v3450_v38  ;;  %v4151_v47 = vld [vmem:[#allocation93_spill] sm:$0xff] }
 0x1c1   : > { %v3532_v30 = vpop.permute.xlu1 %742  ;;  %v3534_v24 = vpop.permute.xlu0 %794 }
 0x1c3   : > { %1168 = vrot.lane.b32.xlu1 %v3103_v36, %s2084_s24  ;;  %1490 = vrot.lane.b32.xlu0 %v3107_v54, %s2083_s19  ;;  %v4144_v36 = vld [vmem:[#allocation88_spill] sm:$0xff]  ;;  %v491_v54 = vadd.f32 %v3450_v38, %v4145_v3  ;;  %v509_v3 = vsel %vm339_vm5, %v3352_v33, %v3458_v19 }
 0x1c4   : > { %v514_v55 = vadd.f32 %v509_v3, %v489_v2 }
 0x1c5   : > { %v3540_v63 = vpop.permute.xlu1 %769  ;;  %v855_v15 = vpop.permute.xlu0 %854 }
 0x1c6   : > { %v858_v62 = vsel %vm315_vm4, %v3400_v14, %v855_v15  ;;  %v516_v14 = vadd.f32 %v508_v51, %v491_v54 }
 0x1c7   : > { %v863_v50 = vadd.f32 %v858_v62, %v4143_v9  ;;  %1328 = vrot.lane.b32.xlu1 %v3115_v52, %s2082_s3  ;;  %1351 = vrot.lane.b32.xlu0 %v4144_v36, %s2084_s24  ;;  %v4148_v9 = vld [vmem:[#allocation90_spill] sm:$0xff]  ;;  %v4149_v52 = vld [vmem:[#allocation91_spill] sm:$0xff]  ;;  %v534_v62 = vsel %vm363_vm6, %v3346_v7, %v3476_v11  ;;  %v4150_v7 = vld [vmem:[#allocation92_spill] sm:$0xff] }
 0x1c8   : > { %v541_v5 = vadd.f32 %v3464_v39, %v516_v14 }
 0x1c9   : > { %v3554_v4 = vpop.permute.xlu1 %792  ;;  %v1044_v17 = vpop.permute.xlu0 %1043 }
 0x1ca   : > { %v1052_v35 = vadd.f32 %v1044_v17, %v4147_v8  ;;  %v510_v8 = vsel %vm339_vm5, %v3458_v19, %v508_v51  ;;  %v4152_v19 = vld [vmem:[#allocation75_spill] sm:$0xff] }
 0x1cb   : > { %1488 = vrot.lane.b32.xlu1 %v4148_v9, %s2083_s19  ;;  %1355 = vrot.lane.b32.xlu0 %v4149_v52, %s2084_s24  ;;  %v490_v51 = vadd.f32 %v485_v40, %v4152_v19  ;;  %v559_v40 = vsel %vm387_vm7, %v3360_v10, %v3470_v49  ;;  %v672_v10 = vsel %vm315_vm4, %v3494_v20, %v3508_v22 }
 0x1cd   : > { %v857_v36 = vpop.permute.xlu1 %856  ;;  %v880_v54 = vpop.permute.xlu0 %879 }
 0x1ce   : > { %v859_v9 = vsel %vm315_vm4, %v855_v15, %v857_v36  ;;  %v865_v52 = vadd.f32 %v857_v36, %v3143_v44  ;;  %v883_v33 = vsel %vm339_vm5, %v3408_v37, %v880_v54  ;;  %v539_v15 = vadd.f32 %v534_v62, %v514_v55 }
 0x1cf   : > { %v864_v2 = vadd.f32 %v859_v9, %v3139_v27  ;;  %v3577_v38 = vadd.f32 %v883_v33, %v863_v50  ;;  %1492 = vrot.lane.b32.xlu1 %v4150_v7, %s2083_s19  ;;  %1515 = vrot.lane.b32.xlu0 %v4151_v47, %s2082_s3  ;;  %v535_v44 = vsel %vm363_vm6, %v3476_v11, %v3464_v39  ;;  %v4156_v7 = vld [vmem:[#allocation95_spill] sm:$0xff] }
 0x1d0   : > { %v566_v37 = vadd.f32 %v3484_v23, %v541_v5  ;;  %v515_v50 = vadd.f32 %v510_v8, %v490_v51  ;;  %v564_v5 = vadd.f32 %v559_v40, %v539_v15  ;;  %v696_v39 = vsel %vm339_vm5, %v3362_v56, %v3516_v31  ;;  %v4154_v8 = vld [vmem:[#allocation82_spill] sm:$0xff] }
 0x1d1   : > { %v1042_v14 = vpop.permute.xlu1 %1041  ;;  %v1069_v27 = vpop.permute.xlu0 %1068  ;;  %v722_v47 = vsel %vm363_vm6, %v3510_v18, %v3524_v26 }
 0x1d2   : > { %v1045_v3 = vsel %vm315_vm4, %v3386_v13, %v1042_v14  ;;  %v1046_v36 = vsel %vm315_vm4, %v1042_v14, %v1044_v17  ;;  %v3591_v9 = vadd.f32 %v1069_v27, %v1052_v35  ;;  %v540_v13 = vadd.f32 %v535_v44, %v515_v50 }
 0x1d3   : > { %v1050_v55 = vadd.f32 %v1045_v3, %v3155_v29  ;;  %v1051_v11 = vadd.f32 %v1046_v36, %v3159_v45  ;;  %1353 = vrot.lane.b32.xlu1 %v3163_v58, %s2084_s24  ;;  %1538 = vrot.lane.b32.xlu0 %v3167_v16, %s2084_s24  ;;  %v671_v35 = vsel %vm315_vm4, %v3376_v12, %v3494_v20 }
 0x1d4   : > { %v560_v29 = vsel %vm387_vm7, %v3470_v49, %v3484_v23  ;;  %v584_v45 = vsel %vm411_vm8, %v3354_v59, %v3492_v28  ;;  %v585_v58 = vsel %vm411_vm8, %v3492_v28, %v3478_v21  ;;  %v591_v16 = vadd.f32 %v3478_v21, %v566_v37  ;;  %v4153_v59 = vld [vmem:[#allocation78_spill] sm:$0xff] }
 0x1d5   : > { %v882_v17 = vpop.permute.xlu1 %881  ;;  %v1229_v12 = vpop.permute.xlu0 %1228  ;;  %v697_v49 = vsel %vm339_vm5, %v3516_v31, %v3502_v41  ;;  %v676_v62 = vadd.f32 %v671_v35, %v4153_v59  ;;  %v677_v28 = vadd.f32 %v672_v10, %v4154_v8  ;;  %v4155_v21 = vld [vmem:[#allocation94_spill] sm:$0xff]  ;;  %v565_v56 = vadd.f32 %v560_v29, %v540_v13 }
 0x1d6   : > { %v884_v23 = vsel %vm339_vm5, %v880_v54, %v882_v17  ;;  %v890_v20 = vadd.f32 %v882_v17, %v865_v52  ;;  %v609_v31 = vsel %vm435_vm9, %v3368_v57, %v3486_v34  ;;  %v4157_v54 = vld [vmem:[#allocation83_spill] sm:$0xff]  ;;  %v616_v19 = vadd.f32 %v3500_v25, %v591_v16 }
 0x1d7   : > { %v3627_v33 = vadd.f32 %v884_v23, %v864_v2  ;;  %1513 = vrot.lane.b32.xlu1 %v4155_v21, %s2082_s3  ;;  %1542 = vrot.lane.b32.xlu0 %v4156_v7, %s2084_s24  ;;  %v678_v52 = vadd.f32 %v3508_v22, %v4157_v54  ;;  %v589_v2 = vadd.f32 %v584_v45, %v564_v5 }
 0x1d8   : > { %v701_v51 = vadd.f32 %v696_v39, %v676_v62  ;;  %v702_v15 = vadd.f32 %v697_v49, %v677_v28  ;;  %v590_v14 = vadd.f32 %v585_v58, %v565_v56  ;;  %v747_v50 = vsel %vm387_vm7, %v3532_v30, %v3518_v1  ;;  %v4158_v58 = vld [vmem:[#allocation96_spill] sm:$0xff]  ;;  %v4159_v62 = vld [vmem:[#allocation97_spill] sm:$0xff] }
 0x1d9   : > { %v1067_v44 = vpop.permute.xlu1 %1066  ;;  %v903_v37 = vpop.permute.xlu0 %902  ;;  %v721_v13 = vsel %vm363_vm6, %v3384_v42, %v3510_v18  ;;  %v703_v5 = vadd.f32 %v3502_v41, %v678_v52  ;;  %v797_v18 = vsel %vm435_vm9, %v3554_v4, %v3534_v24  ;;  %v771_v39 = vsel %vm411_vm8, %v3392_v32, %v3526_v46 }
 0x1da   : > { %v1070_v57 = vsel %vm339_vm5, %v3394_v43, %v1067_v44  ;;  %v1071_v22 = vsel %vm339_vm5, %v1067_v44, %v1069_v27  ;;  %v727_v3 = vadd.f32 %v722_v47, %v702_v15  ;;  %v746_v43 = vsel %vm387_vm7, %v3370_v6, %v3532_v30 }
 0x1db   : > { %v1075_v36 = vadd.f32 %v1070_v57, %v1050_v55  ;;  %v1076_v40 = vadd.f32 %v1071_v22, %v1051_v11  ;;  %1517 = vrot.lane.b32.xlu1 %v3179_v60, %s2082_s3  ;;  %632 = vrot.lane.b32.xlu0 %v616_v19, %s2085_s28  ;;  %v772_v27 = vsel %vm411_vm8, %v3526_v46, %v3540_v63  ;;  %v4160_v22 = vld [vmem:[#allocation98_spill] sm:$0xff] }
 0x1dc   : > { %v614_v55 = vadd.f32 %v609_v31, %v589_v2  ;;  %v610_v60 = vsel %vm435_vm9, %v3486_v34, %v3500_v25  ;;  %v726_v11 = vadd.f32 %v721_v13, %v701_v51  ;;  %v752_v35 = vadd.f32 %v747_v50, %v727_v3 }
 0x1dd   : > { %v1227_v10 = vpop.permute.xlu1 %1226  ;;  %v907_v29 = vpop.permute.xlu0 %906  ;;  %v728_v42 = vadd.f32 %v3524_v26, %v703_v5  ;;  %v615_v34 = vadd.f32 %v610_v60, %v590_v14  ;;  %v796_v49 = vsel %vm435_vm9, %v3378_v48, %v3554_v4  ;;  %v4161_v5 = vld [vmem:[#allocation99_spill] sm:$0xff] }
 0x1de   : > { %v1232_v6 = vsel %vm315_vm4, %v1227_v10, %v1229_v12  ;;  %v3669_v41 = vadd.f32 %v907_v29, %v890_v20  ;;  %v751_v30 = vadd.f32 %v746_v43, %v726_v11  ;;  %v777_v45 = vadd.f32 %v772_v27, %v752_v35 }
 0x1df   : > { %v1237_v16 = vadd.f32 %v1232_v6, %v4158_v58  ;;  %1540 = vrot.lane.b32.xlu1 %v3191_v53, %s2084_s24  ;;  %628 = vrot.lane.b32.xlu0 %v614_v55, %s2085_s28  ;;  %v753_v53 = vadd.f32 %v3518_v1, %v728_v42 }
 0x1e0   : > { %v802_v25 = vadd.f32 %v797_v18, %v777_v45  ;;  %v776_v59 = vadd.f32 %v771_v39, %v751_v30 }
 0x1e1   : > { %v1231_v26 = vpop.permute.xlu1 %1230  ;;  %v1092_v17 = vpop.permute.xlu0 %1091  ;;  %v778_v28 = vadd.f32 %v3540_v63, %v753_v53 }
 0x1e2   : > { %v1233_v23 = vsel %vm315_vm4, %v1229_v12, %v1231_v26  ;;  %v1239_v20 = vadd.f32 %v1231_v26, %v3199_v61  ;;  %v801_v32 = vadd.f32 %v796_v49, %v776_v59 }
 0x1e3   : > { %v1238_v8 = vadd.f32 %v1233_v23, %v4159_v62  ;;  %630 = vrot.lane.b32.xlu1 %v615_v34, %s2085_s28  ;;  %817 = vrot.lane.b32.xlu0 %v802_v25, %s2086_s17  ;;  %v803_v12 = vadd.f32 %v3534_v24, %v778_v28 }
 0x1e5   : > { %v905_v46 = vpop.permute.xlu1 %904  ;;  %v1252_v21 = vpop.permute.xlu0 %1251 }
 0x1e6   : > { %v908_v4 = vsel %vm363_vm6, %v903_v37, %v905_v46  ;;  %v909_v48 = vsel %vm363_vm6, %v905_v46, %v907_v29 }
 0x1e7   : > { %v913_v61 = vadd.f32 %v908_v4, %v3577_v38  ;;  %v914_v1 = vadd.f32 %v909_v48, %v3627_v33  ;;  %815 = vrot.lane.b32.xlu1 %v801_v32, %s2086_s17 }
 0x1e9   : > { %v1090_v7 = vpop.permute.xlu1 %1089  ;;  %v1256_v56 = vpop.permute.xlu0 %1255 }
 0x1ea   : > { %v1095_v31 = vsel %vm363_vm6, %v1090_v7, %v1092_v17  ;;  %v3693_v54 = vadd.f32 %v1256_v56, %v1239_v20 }
 0x1eb   : > { %v1100_v63 = vadd.f32 %v1095_v31, %v1075_v36  ;;  %819 = vrot.lane.b32.xlu1 %v803_v12, %s2086_s17 }
 0x1ed   : > { %v1094_v52 = vpop.permute.xlu1 %1093  ;;  %v1416_v47 = vpop.permute.xlu0 %1415 }
 0x1ee   : > { %v1096_v2 = vsel %vm363_vm6, %v1092_v17, %v1094_v52  ;;  %v3697_v19 = vadd.f32 %v1094_v52, %v3591_v9 }
 0x1ef   : > { %v3699_v38 = vadd.f32 %v1096_v2, %v1076_v40 }
 0x1f1   : > { %v1254_v33 = vpop.permute.xlu1 %1253  ;;  %v928_v51 = vpop.permute.xlu0 %927 }
 0x1f2   : > { %v1257_v24 = vsel %vm339_vm5, %v1252_v21, %v1254_v33  ;;  %v1258_v15 = vsel %vm339_vm5, %v1254_v33, %v1256_v56 }
 0x1f3   : > { %v3703_v44 = vadd.f32 %v1257_v24, %v1237_v16  ;;  %v3705_v37 = vadd.f32 %v1258_v15, %v1238_v8 }
 0x1f5   : > { %v1414_v14 = vpop.permute.xlu1 %1413  ;;  %v932_v50 = vpop.permute.xlu0 %931 }
 0x1f6   : > { %v1419_v57 = vsel %vm315_vm4, %v1414_v14, %v1416_v47 }
 0x1f7   : > { %v3709_v3 = vadd.f32 %v1419_v57, %v4160_v22 }
 0x1f9   : > { %v1418_v9 = vpop.permute.xlu1 %1417  ;;  %v1117_v36 = vpop.permute.xlu0 %1116 }
 0x1fa   : > { %v1420_v40 = vsel %vm315_vm4, %v1416_v47, %v1418_v9  ;;  %v3713_v13 = vadd.f32 %v1418_v9, %v3211_v0  ;;  %v940_v47 = vadd.f32 %v932_v50, %v3669_v41 }
 0x1fb   : > { %v3716_v43 = vadd.f32 %v1420_v40, %v4161_v5 }
 0x1fd   : > { %v930_v27 = vpop.permute.xlu1 %929  ;;  %v3718_v55 = vpop.permute.xlu0 %1276 }
 0x1fe   : > { %v933_v20 = vsel %vm387_vm7, %v928_v51, %v930_v27  ;;  %v934_v53 = vsel %vm387_vm7, %v930_v27, %v932_v50 }
 0x1ff   : > { %v938_v32 = vadd.f32 %v933_v20, %v913_v61  ;;  %v939_v46 = vadd.f32 %v934_v53, %v914_v1 }
 0x201   : > { %v1115_v60 = vpop.permute.xlu1 %1114  ;;  %v3720_v11 = vpop.permute.xlu0 %1280 }
 0x202   : > { %v1120_v21 = vsel %vm387_vm7, %v1115_v60, %v1117_v36 }
 0x203   : > { %v1125_v2 = vadd.f32 %v1120_v21, %v1100_v63 }
 0x205   : > { %v1119_v35 = vpop.permute.xlu1 %1118  ;;  %v3722_v10 = vpop.permute.xlu0 %1440 }
 0x206   : > { %v1121_v61 = vsel %vm387_vm7, %v1117_v36, %v1119_v35  ;;  %v1127_v57 = vadd.f32 %v1119_v35, %v3697_v19 }
 0x207   : > { %v1126_v41 = vadd.f32 %v1121_v61, %v3699_v38 }
 0x209   : > { %v3724_v29 = vpop.permute.xlu1 %1278  ;;  %v953_v42 = vpop.permute.xlu0 %952 }
 0x20a   : > { %v1282_v38 = vsel %vm363_vm6, %v3718_v55, %v3724_v29 }
 0x20d   : > { %v3726_v18 = vpop.permute.xlu1 %1438  ;;  %v957_v6 = vpop.permute.xlu0 %956 }
 0x20e   : > { %v965_v1 = vadd.f32 %v957_v6, %v940_v47 }
 0x211   : > { %v3728_v0 = vpop.permute.xlu1 %1442  ;;  %v1142_v30 = vpop.permute.xlu0 %1141 }
 0x215   : > { %v955_v45 = vpop.permute.xlu1 %954  ;;  %v1302_v58 = vpop.permute.xlu0 %1301 }
 0x216   : > { %v958_v8 = vsel %vm411_vm8, %v953_v42, %v955_v45  ;;  %v959_v28 = vsel %vm411_vm8, %v955_v45, %v957_v6  ;;  %v1283_v45 = vsel %vm363_vm6, %v3724_v29, %v3720_v11  ;;  %v1289_v29 = vadd.f32 %v3720_v11, %v3693_v54 }
 0x217   : > { %v963_v4 = vadd.f32 %v958_v8, %v938_v32  ;;  %v964_v48 = vadd.f32 %v959_v28, %v939_v46  ;;  %v1288_v20 = vadd.f32 %v1283_v45, %v3705_v37  ;;  %v1445_v54 = vsel %vm339_vm5, %v3722_v10, %v3728_v0 }
 0x219   : > { %v1140_v16 = vpop.permute.xlu1 %1139  ;;  %v3730_v34 = vpop.permute.xlu0 %1305 }
 0x21a   : > { %v1145_v56 = vsel %vm411_vm8, %v1140_v16, %v1142_v30  ;;  %v1314_v37 = vadd.f32 %v3730_v34, %v1289_v29 }
 0x21b   : > { %v1150_v24 = vadd.f32 %v1145_v56, %v1125_v2 }
 0x21d   : > { %v1144_v25 = vpop.permute.xlu1 %1143  ;;  %v3732_v26 = vpop.permute.xlu0 %1465 }
 0x21e   : > { %v1146_v22 = vsel %vm411_vm8, %v1142_v30, %v1144_v25  ;;  %v1152_v40 = vadd.f32 %v1144_v25, %v1127_v57 }
 0x21f   : > { %v1151_v5 = vadd.f32 %v1146_v22, %v1126_v41 }
 0x221   : > { %v1304_v17 = vpop.permute.xlu1 %1303  ;;  %v978_v39 = vpop.permute.xlu0 %977 }
 0x222   : > { %v1307_v25 = vsel %vm387_vm7, %v1302_v58, %v1304_v17 }
 0x225   : > { %v3734_v49 = vpop.permute.xlu1 %1463  ;;  %v982_v23 = vpop.permute.xlu0 %981 }
 0x226   : > { %v990_v63 = vadd.f32 %v982_v23, %v965_v1  ;;  %v1469_v56 = vsel %vm363_vm6, %v3734_v49, %v3732_v26 }
 0x229   : > { %v3738_v59 = vpop.permute.xlu1 %1467  ;;  %v1167_v62 = vpop.permute.xlu0 %1166 }
 0x22d   : > { %v980_v12 = vpop.permute.xlu1 %979  ;;  %v1327_v7 = vpop.permute.xlu0 %1326 }
 0x22e   : > { %v983_v31 = vsel %vm435_vm9, %v978_v39, %v980_v12  ;;  %v984_v52 = vsel %vm435_vm9, %v980_v12, %v982_v23  ;;  %v1308_v39 = vsel %vm387_vm7, %v1304_v17, %v3730_v34  ;;  %v1287_v23 = vadd.f32 %v1282_v38, %v3703_v44 }
 0x22f   : > { %v988_v33 = vadd.f32 %v983_v31, %v963_v4  ;;  %v989_v51 = vadd.f32 %v984_v52, %v964_v48  ;;  %v1313_v28 = vadd.f32 %v1308_v39, %v1288_v20  ;;  %v1444_v12 = vsel %vm339_vm5, %v3726_v18, %v3722_v10  ;;  %v4168_v20 = vld [vmem:[#allocation39_spill] sm:$0xff] }
 0x230   : > { %v1312_v55 = vadd.f32 %v1307_v25, %v1287_v23  ;;  %v1470_v34 = vsel %vm363_vm6, %v3732_v26, %v3738_v59  ;;  %v1449_v31 = vadd.f32 %v1444_v12, %v3709_v3  ;;  %v1450_v18 = vadd.f32 %v1445_v54, %v3716_v43  ;;  %v4166_v25 = vld [vmem:[#allocation43_spill] sm:$0xff]  ;;  %v4167_v23 = vld [vmem:[#allocation55_spill] sm:$0xff] }
 0x231   : > { %v1165_v15 = vpop.permute.xlu1 %1164  ;;  %1002 = vrot.lane.b32.xlu0 %v988_v33, %s2087_s18  ;;  %1004 = vrot.lane.b32.xlu1 %v989_v51, %s2087_s18  ;;  %v1331_v14 = vpop.permute.xlu0 %1330  ;;  %v1451_v33 = vadd.f32 %v3728_v0, %v3713_v13  ;;  %v4175_v54 = vld [vmem:[#allocation59_spill] sm:$0xff] }
 0x232   : > { %v1170_v9 = vsel %vm435_vm9, %v1165_v15, %v1167_v62  ;;  %v1339_v11 = vadd.f32 %v1331_v14, %v1314_v37  ;;  %v1474_v51 = vadd.f32 %v1469_v56, %v1449_v31  ;;  %v1475_v61 = vadd.f32 %v1470_v34, %v1450_v18  ;;  %v4177_v56 = vld [vmem:[#allocation52_spill] sm:$0xff] }
 0x233   : > { %v1175_v50 = vadd.f32 %v1170_v9, %v1150_v24  ;;  %v1476_v3 = vadd.f32 %v3738_v59, %v1451_v33  ;;  %v365_v34 = vsel %vm363_vm6, %v4167_v23, %v4177_v56 }
 0x235   : > { %v1169_v36 = vpop.permute.xlu1 %1168  ;;  %1006 = vrot.lane.b32.xlu0 %v990_v63, %s2087_s18  ;;  %1189 = vrot.lane.b32.xlu1 %v1175_v50, %s2088_s30  ;;  %v1491_v27 = vpop.permute.xlu0 %1490 }
 0x236   : > { %v1171_v60 = vsel %vm435_vm9, %v1167_v62, %v1169_v36  ;;  %v1177_v42 = vadd.f32 %v1169_v36, %v1152_v40 }
 0x237   : > { %v1176_v6 = vadd.f32 %v1171_v60, %v1151_v5  ;;  %v4162_v60 = vld [vmem:[#allocation51_spill] sm:$0xff] }
 0x239   : > { %v1329_v19 = vpop.permute.xlu1 %1328  ;;  %1191 = vrot.lane.b32.xlu0 %v1176_v6, %s2088_s30  ;;  %1193 = vrot.lane.b32.xlu1 %v1177_v42, %s2088_s30  ;;  %v1352_v35 = vpop.permute.xlu0 %1351  ;;  %v4163_v42 = vld [vmem:[#allocation40_spill] sm:$0xff] }
 0x23a   : > { %v1332_v62 = vsel %vm411_vm8, %v1327_v7, %v1329_v19  ;;  %v1333_v8 = vsel %vm411_vm8, %v1329_v19, %v1331_v14  ;;  %v316_v6 = vsel %vm315_vm4, %v4163_v42, %v4162_v60 }
 0x23b   : > { %v1337_v32 = vadd.f32 %v1332_v62, %v1312_v55  ;;  %v1338_v46 = vadd.f32 %v1333_v8, %v1313_v28  ;;  %v4169_v55 = vld [vmem:[#allocation49_spill] sm:$0xff] }
 0x23c   : > { %v317_v28 = vsel %vm315_vm4, %v4162_v60, %v4169_v55  ;;  %vm1382_vm4 = vcmask 1006592  }
 0x23d   : > { %v1489_v30 = vpop.permute.xlu1 %1488  ;;  %v1356_v16 = vpop.permute.xlu0 %1355 }
 0x23e   : > { %v1364_v52 = vadd.f32 %v1356_v16, %v1339_v11  ;;  %v1494_v10 = vsel %vm387_vm7, %v1489_v30, %v1491_v27  ;;  %v4176_v11 = vld [vmem:[#allocation46_spill] sm:$0xff] }
 0x23f   : > { %v1499_v43 = vadd.f32 %v1494_v10, %v1474_v51  ;;  %v4178_v10 = vld [vmem:[#allocation57_spill] sm:$0xff] }
 0x241   : > { %v1493_v53 = vpop.permute.xlu1 %1492  ;;  %v1516_v58 = vpop.permute.xlu0 %1515 }
 0x242   : > { %v1495_v2 = vsel %vm387_vm7, %v1491_v27, %v1493_v53  ;;  %v1501_v15 = vadd.f32 %v1493_v53, %v1476_v3  ;;  %v364_v53 = vsel %vm363_vm6, %v4168_v20, %v4167_v23 }
 0x243   : > { %v1500_v24 = vadd.f32 %v1495_v2, %v1475_v61 }
 0x245   : > { %v1354_v21 = vpop.permute.xlu1 %1353  ;;  %v1539_v47 = vpop.permute.xlu0 %1538 }
 0x246   : > { %v1357_v17 = vsel %vm435_vm9, %v1352_v35, %v1354_v21  ;;  %v1358_v44 = vsel %vm435_vm9, %v1354_v21, %v1356_v16  ;;  %v4164_v35 = vld [vmem:[#allocation66_spill] sm:$0xff] }
 0x247   : > { %v1362_v4 = vadd.f32 %v1357_v17, %v1337_v32  ;;  %v1363_v48 = vadd.f32 %v1358_v44, %v1338_v46  ;;  %v320_v30 = vadd.f32 %v316_v6, %v4164_v35  ;;  %v4165_v16 = vld [vmem:[#allocation50_spill] sm:$0xff]  ;;  %v4170_v32 = vlaneseq  ;;  %v4172_v44 = vld [vmem:[#allocation67_spill] sm:$0xff] }
 0x248   : > { %v340_v39 = vsel %vm339_vm5, %v4166_v25, %v4165_v16  ;;  %v321_v37 = vadd.f32 %v317_v28, %v4172_v44 }
 0x249   : > { %v1514_v7 = vpop.permute.xlu1 %1513  ;;  %1376 = vrot.lane.b32.xlu0 %v1362_v4, %s2089_s6  ;;  %1378 = vrot.lane.b32.xlu1 %v1363_v48, %s2089_s6  ;;  %v1543_v57 = vpop.permute.xlu0 %1542  ;;  %v344_v62 = vadd.f32 %v340_v39, %v320_v30  ;;  %v260_v46 = vand.u32 127, %v4170_v32  ;;  %v4173_v4 = vld [vmem:[#allocation54_spill] sm:$0xff]  ;;  %v4174_v48 = vld [vmem:[#allocation47_spill] sm:$0xff] }
 0x24a   : > { %v1519_v1 = vsel %vm411_vm8, %v1514_v7, %v1516_v58  ;;  %v388_v12 = vsel %vm387_vm7, %v4174_v48, %v4173_v4  ;;  %v412_v7 = vsel %vm411_vm8, %v4176_v11, %v4175_v54  ;;  %v389_v2 = vsel %vm387_vm7, %v4173_v4, %v4178_v10 }
 0x24b   : > { %v1524_v14 = vadd.f32 %v1519_v1, %v1499_v43  ;;  %v368_v29 = vadd.f32 %v364_v53, %v344_v62  ;;  %v261_v18 = vadd.s32 128, %v260_v46  ;;  %v266_v61 = vand.u32 15, %v260_v46 }
 0x24d   : > { %v1518_v49 = vpop.permute.xlu1 %1517  ;;  %1380 = vrot.lane.b32.xlu0 %v1364_v52, %s2089_s6  ;;  %v633_v59 = vpop.permute.xlu0 %632  ;;  %v392_v31 = vadd.f32 %v388_v12, %v368_v29  ;;  %vm617_vm12 = vcmp.ge.s32.totalorder %v266_v61, 2  ;;  %vm442_vm13 = vcmp.ge.s32.totalorder %v266_v61, 3  ;;  %vm804_vm14 = vcmp.ge.s32.totalorder %v266_v61, 1 }
 0x24e   : > { %v1520_v26 = vsel %vm411_vm8, %v1516_v58, %v1518_v49  ;;  %v1526_v0 = vadd.f32 %v1518_v49, %v1501_v15  ;;  %v4171_v58 = vld [vmem:[#allocation53_spill] sm:$0xff]  ;;  %v4179_v49 = vld [vmem:[#allocation56_spill] sm:$0xff]  ;;  %vm1365_vm6 = vcmp.lt.s32.totalorder %v266_v61, 14 }
 0x24f   : > { %v1525_v22 = vadd.f32 %v1520_v26, %v1500_v24  ;;  %v341_v21 = vsel %vm339_vm5, %v4165_v16, %v4171_v58  ;;  %v416_v33 = vadd.f32 %v412_v7, %v392_v31  ;;  %v413_v1 = vsel %vm411_vm8, %v4175_v54, %v4179_v49  ;;  %v4180_v24 = vld [vmem:[#allocation58_spill] sm:$0xff]  ;;  %v4181_v15 = vld [vmem:[#allocation48_spill] sm:$0xff] }
 0x250   : > { %v1551_v40 = vadd.f32 %v1543_v57, %v1526_v0  ;;  %v3829_v26 = vand.u32 15, %v261_v18  ;;  %vm1178_vm5 = vcmp.lt.s32.totalorder %v266_v61, 15 }
 0x251   : > { %v1541_v9 = vpop.permute.xlu1 %1540  ;;  %v629_v36 = vpop.permute.xlu0 %628 }
 0x252   : > { %v1544_v41 = vsel %vm435_vm9, %v1539_v47, %v1541_v9  ;;  %v1545_v13 = vsel %vm435_vm9, %v1541_v9, %v1543_v57  ;;  %v345_v47 = vadd.f32 %v341_v21, %v321_v37  ;;  %v4182_v9 = vld [vmem:[#allocation60_spill] sm:$0xff]  ;;  %vm443_vm15 = vcmp.ge.s32.totalorder %v3829_v26, 3 }
 0x253   : > { %v1549_v63 = vadd.f32 %v1544_v41, %v1524_v14  ;;  %v1550_v50 = vadd.f32 %v1545_v13, %v1525_v22  ;;  %v436_v14 = vsel %vm435_vm9, %v4181_v15, %v4180_v24  ;;  %v437_v41 = vsel %vm435_vm9, %v4180_v24, %v4182_v9 }
 0x254   : > { %v369_v51 = vadd.f32 %v365_v34, %v345_v47  ;;  %v440_v22 = vadd.f32 %v436_v14, %v416_v33  ;;  %vm618_vm1 = vcmp.ge.s32.totalorder %v3829_v26, 2  ;;  %vm805_vm3 = vcmp.ge.s32.totalorder %v3829_v26, 1  ;;  %v4185_v14 = vld [vmem:[#allocation31_spill] sm:$0xff] }
 0x255   : > { %1563 = vrot.lane.b32.xlu1 %v1549_v63, %s2090_s7  ;;  %1565 = vrot.lane.b32.xlu0 %v1550_v50, %s2090_s7  ;;  %v631_v5 = vpop.permute.xlu1 %630  ;;  %v818_v19 = vpop.permute.xlu0 %817  ;;  %vm1179_vm7 = vcmp.lt.s32.totalorder %v3829_v26, 15  ;;  %vm1366_vm8 = vcmp.lt.s32.totalorder %v3829_v26, 14  ;;  %vm1569_vm9 = vcmask 998400  }
 0x256   : > { %v393_v43 = vadd.f32 %v389_v2, %v369_v51  ;;  %v635_v57 = vsel %vm634_vm10, %v629_v36, %v631_v5  ;;  %v636_v36 = vsel %vm634_vm10, %v631_v5, %v633_v59  ;;  %v452_v42 = vsel %vm442_vm13, %v440_v22, 0.0 }
 0x257   : > { %v639_v50 = vsel %vm617_vm12, %v635_v57, 0.0  ;;  %v640_v25 = vsel %vm618_vm1, %v636_v36, 0.0  ;;  %vm1552_vm10 = vcmp.lt.s32.totalorder %v266_v61, 13  ;;  %vm1618_vm12 = vcmp.lt.s32.totalorder %v4170_v32, 256 }
 0x258   : > { %v417_v0 = vadd.f32 %v413_v1, %v393_v43  ;;  %v641_v30 = vadd.f32 %v639_v50, %v452_v42 }
 0x259   : > { %1567 = vrot.lane.b32.xlu1 %v1551_v40, %s2090_s7  ;;  %v816_v27 = vpop.permute.xlu1 %815 }
 0x25a   : > { %v822_v63 = vsel %vm821_vm11, %v816_v27, %v818_v19  ;;  %v441_v60 = vadd.f32 %v437_v41, %v417_v0 }
 0x25b   : > { %v826_v6 = vsel %vm804_vm14, %v822_v63, 0.0 }
 0x25c   : > { %v828_v23 = vadd.f32 %v826_v6, %v641_v30  ;;  %v453_v5 = vsel %vm443_vm15, %v441_v60, 0.0 }
 0x25d   : > { %v820_v38 = vpop.permute.xlu1 %819  ;;  %v642_v55 = vadd.f32 %v640_v25, %v453_v5 }
 0x25e   : > { %v823_v27 = vsel %vm821_vm11, %v818_v19, %v820_v38  ;;  %vm1553_vm11 = vcmp.lt.s32.totalorder %v3829_v26, 13 }
 0x25f   : > { %v827_v20 = vsel %vm805_vm3, %v823_v27, 0.0 }
 0x260   : > { %v829_v29 = vadd.f32 %v827_v20, %v642_v55 }
 0x2a3   : > { %v1003_v45 = vpop.permute.xlu0 %1002  ;;  %v3804_v8 = vpop.permute.xlu1 %1004 }
 0x2a4   : > { %v1009_v39 = vsel %vm1008_vm2, %v1003_v45, %v3804_v8 }
 0x2a5   : > { %v1015_v28 = vadd.f32 %v1009_v39, %v828_v23 }
 0x2a7   : > { %v1007_v17 = vpop.permute.xlu0 %1006  ;;  %v1190_v52 = vpop.permute.xlu1 %1189 }
 0x2a8   : > { %v1010_v38 = vsel %vm1008_vm2, %v3804_v8, %v1007_v17 }
 0x2a9   : > { %v1016_v4 = vadd.f32 %v1010_v38, %v829_v29 }
 0x2ab   : > { %v1192_v3 = vpop.permute.xlu0 %1191  ;;  %v1194_v13 = vpop.permute.xlu1 %1193 }
 0x2ac   : > { %v1196_v16 = vsel %vm1195_vm0, %v1190_v52, %v1192_v3  ;;  %v1197_v19 = vsel %vm1195_vm0, %v1192_v3, %v1194_v13  ;;  %v2091_v3 = vmov 1966171168  }
 0x2ad   : > { %v1200_v53 = vsel %vm1178_vm5, %v1196_v16, 0.0  ;;  %v1201_v21 = vsel %vm1179_vm7, %v1197_v19, 0.0  ;;  %v1602_v43 = vunpack.c.l.s4 %v2091_v3 }
 0x2ae   : > { %v1202_v46 = vadd.f32 %v1200_v53, %v1015_v28  ;;  %v1203_v7 = vadd.f32 %v1201_v21, %v1016_v4 }
 0x2af   : > { %v1603_v24 = vunpack.c.0.s8 %v1602_v43 }
 0x2b1   : > { %v1606_v57 = vsub.s32 %v1603_v24, %v4185_v14 }
 0x2bb   : > { %v1377_v40 = vpop.permute.xlu0 %1376  ;;  %v1379_v35 = vpop.permute.xlu1 %1378 }
 0x2bc   : > { %v1383_v59 = vsel %vm1382_vm4, %v1377_v40, %v1379_v35 }
 0x2bd   : > { %v1387_v45 = vsel %vm1365_vm6, %v1383_v59, 0.0 }
 0x2be   : > { %v1389_v48 = vadd.f32 %v1387_v45, %v1202_v46 }
 0x2bf   : > { %v1381_v62 = vpop.permute.xlu0 %1380 }
 0x2c0   : > { %v1384_v58 = vsel %vm1382_vm4, %v1379_v35, %v1381_v62 }
 0x2c1   : > { %v1388_v54 = vsel %vm1366_vm8, %v1384_v58, 0.0 }
 0x2c2   : > { %v1390_v56 = vadd.f32 %v1388_v54, %v1203_v7 }
 0x2c7   : > { %v1564_v44 = vpop.permute.xlu1 %1563  ;;  %v1566_v37 = vpop.permute.xlu0 %1565 }
 0x2c8   : > { %v1570_v12 = vsel %vm1569_vm9, %v1564_v44, %v1566_v37 }
 0x2c9   : > { %v1574_v11 = vsel %vm1552_vm10, %v1570_v12, 0.0 }
 0x2ca   : > { %v1576_v8 = vadd.f32 %v1574_v11, %v1389_v48 }
 0x2cb   : > { %v1568_v17 = vpop.permute.xlu1 %1567 }
 0x2cc   : > { %v1580_v34 = vrot.slane %v1576_v8, 1  ;;  %v1571_v31 = vsel %vm1569_vm9, %v1566_v37, %v1568_v17 }
 0x2cd   : > { %v1575_v18 = vsel %vm1553_vm11, %v1571_v31, 0.0 }
 0x2ce   : > { %v1584_v52 = vadd.f32 %v1580_v34, %v1576_v8  ;;  %v1577_v47 = vadd.f32 %v1575_v18, %v1390_v56 }
 0x2d0   : > { %v1838_v10 = vmul.f32 -1.442695, %v1584_v52  ;;  %v1581_v2 = vrot.slane %v1577_v47, 1 }
 0x2d2   : > { %1935 = vpow2.f32 %v1838_v10  ;;  %v1585_v33 = vadd.f32 %v1581_v2, %v1577_v47 }
 0x2d4   : > { %v1839_v51 = vmul.f32 -1.442695, %v1585_v33 }
 0x2d6   : > { %1937 = vpow2.f32 %v1839_v51 }
 0x2dc   : > { %v1936_v61 = vpop.eup %1935 }
 0x2dd   : > { %v1592_v49 = vadd.f32 1.0, %v1936_v61 }
 0x2df   : > { %1939 = vrcp.f32 %v1592_v49 }
 0x2e0   : > { %v1938_v1 = vpop.eup %1937 }
 0x2e1   : > { %v1593_v26 = vadd.f32 1.0, %v1938_v1 }
 0x2e3   : > { %1941 = vrcp.f32 %v1593_v26 }
 0x2e9   : > { %v1940_v15 = vpop.eup %1939 }
 0x2ed   : > { %v1942_v22 = vpop.eup %1941 }
 0x2ee   : > { %v1600_v9 = vcombine.low %v1940_v15, %v1942_v22 }
 0x2f0   : > { %v1607_v41 = vrot.slane %v1600_v9, %v1606_v57 }
 0x2f2   : > { %v1614_v13 = vrot.slane %v1607_v41, %v1606_v57 }
 0x2f4   : > { %1620 = vst.msk [vmem:[%s189_s8] sm:$0x3] %vm1618_vm12, %v1614_v13 }
 0x2f5   : > { %2001 = shalt.err (!%p1998_p11)
}
 0x2f6   : > { %s2002_s9 = scalar_lea.hbm %s3866_s13, 32  ;;  %s2006_s14 = scalar_lea.hbm %s4187_s1, 64 }
 0x2f7   : > { %p2003_p3 = scmp.ne.s32.totalorder %s3866_s13, %s2002_s9  ;;  %p2007_p6 = scmp.lt.u32.totalorder %s3866_s13, %s4187_s1 }
 0x2f8   : > { %p2008_p1 = scmp.lt.u32.totalorder %s2006_s14, %s2002_s9  ;;  %p2010_p8 = scmp.lt.u32.totalorder %s2002_s9, %s3866_s13 }
 0x2f9   : > { %p2004_p7 = pnand %p2003_p3, %p4188_p2 }
 0x2fa   : > { %p2009_p0 = por %p2008_p1, %p2007_p6 }
 0x2fb   : > { %p2005_p10 = pneg %p2004_p7 }
 0x2fc   : > { %p2011_p12 = por %p2010_p8, %p2009_p0 }
 0x2fe   : > { %p2012_p5 = pnand %p2011_p12, %p2005_p10 }
 0x300   : > { %2015 = shalt.err (!%p2012_p5)
}
 0x301   : > { %1853 = dma.vmem_to_hbm [thread:$0]  (%p4188_p2), %s3868_s25, 32, %s3866_s13, %s1622_s5  }
 0x302 PF: > { %s4189_s3 = sld [smem:[#allocation13_spill]]  ;;  %s4190_s19 = sld [smem:[#allocation19_spill]] }
 0x303   : > { %s4191_s24 = sld [smem:[#allocation18_spill]] }
 0x308   : > { %s1648_s28 = sand.u32 1, %s4189_s3   ;;  %p4192_p4 = scmp.ne.s32.totalorder %s4190_s19, 0 }
 0x309   : > { %p4193_p9 = scmp.ge.s32.totalorder %s4191_s24, 2  ;;  %s1649_s17 = scalar_lea.sflag [#allocation6], %s1648_s28 }
 0x30b   : > { %p1864_p13 = pnand %p4193_p9, %p4192_p4 }
 0x30d   : > { %2049 = dma.done.wait (!%p1864_p13), %s1649_s17, 32  }
 0x30e   : > { %2051 = vsyncadd (!%p1864_p13), %s1649_s17, 4294967264  ;;  %s19_s14 = sadd.s32 1, %s4191_s24   ;;  %s4194_s9 = sld [smem:[#allocation14_spill]] }
 0x30f   : > { %p16_p11 = scmp.ge.s32.totalorder %s19_s14, 4   ;;  %s4195_s10 = sld [smem:[#allocation15_spill]] }
 0x310   : > { %s4196_s11 = sld [smem:[#allocation22_spill]]  ;;  %s4197_s12 = sld [smem:[#allocation17_spill]] }
 0x311   : > { %s4198_s13 = sld [smem:[#allocation20_spill]]  ;;  %18 = sbr.rel (!%p16_p11) target bundleno = 11 (0xb), region = 86 }
 0x318   :  { %1654 = vsyncpa [#allocation5], 1 }
 0x319   :  { %1656 = vsyncpa [#allocation5 + $0x1], 1 }
 0x31a   :  { %1657 = vsyncpa [#allocation6], 1 }
 0x31b   :  { %1659 = vsyncpa [#allocation6 + $0x1], 1 }
 0x31c   :  { %1660 = vsyncpa [#allocation7], 1 }
 0x31d   :  { %1662 = vsyncpa [#allocation7 + $0x1], 1 }

</bundles_post_ra>
